<compile_context>
chip_gen: v6e
topology: v6e:2x2x1
jax: 0.10.0
libtpu: 0.0.40
codegen_flags: <defaults>
</compile_context>

<pallas_src>
import numpy as np
import jax
import jax.numpy as jnp
from jax.experimental import pallas as pl
from jax.experimental.pallas import tpu as pltpu


# ---------------------------------------------------------------------------
# Fused PerformanceEncoder kernel: one grid step == one batch item.
# ---------------------------------------------------------------------------
def _perf_encoder_kernel(
    # per-batch-item inputs
    y_ref, cat_ref,                                   # (1,Th,Cy), (1,Th,Cs)
    # embedding / contractor weights
    emb_w_ref, emb_b_ref, ctr_w_ref, ctr_b_ref,
    # measure attention (make_higher_node)
    ma_w_ref, ma_b_ref, ma_ctx_ref,                   # ctx: (C2, nh) block-diagonal
    seg_ref, segT_ref, segT3_ref,                     # (Th,M), (M,Th), (M,Th,1)
    # final attention
    fa_w_ref, fa_b_ref, fa_ctx_ref, head_exp_ref,     # head_exp: (nh, C2) 0/1
    # bidirectional LSTM (stacked over layers), fwd|bwd input weights fused
    w_ih_ref, w_hh_f_ref, w_hh_b_ref, b_ref,          # (L,C2,8H),(L,H,4H),(L,H,4H),(L,1,8H)
    # mean|var head + noise
    mv_w_ref, mv_b_ref, eps_ref, eps_multi_ref,       # (C2,2Z),(1,2Z),(1,1,Z),(1,S,Z)
    # outputs
    z_ref, mu_ref, var_ref, zs_ref,                   # (1,1,Z)x3, (1,S,Z)
    # scratch
    enc_ref,                                          # VMEM (M, C2)
):
    Cs = cat_ref.shape[2]
    H = w_hh_f_ref.shape[1]
    layers = w_ih_ref.shape[0]
    M = segT_ref.shape[0]
    Z = mv_w_ref.shape[1] // 2

    # ---- 1. _expand_perf_feature: masked Linear embedding (first T//2 notes only)
    y = y_ref[0]                                                    # (Th, Cy)
    cat = cat_ref[0]                                                # (Th, Cs)
    pad_y = jnp.max(jnp.abs(y), axis=-1, keepdims=True) == 0.0      # (Th, 1)  all(y==0)
    exp_y = jnp.dot(y, emb_w_ref[...], preferred_element_type=jnp.float32) + emb_b_ref[...]
    exp_y = jnp.where(pad_y, 0.0, exp_y)                            # (Th, E)

    # ---- 2./3. concat(total_note_cat, expanded_y) -> performance_contractor, masked
    # channel concat folded into a split matmul: [cat|exp_y]@W == cat@W[:Cs] + exp_y@W[Cs:]
    ctr_w = ctr_w_ref[...]
    contracted = (jnp.dot(cat, ctr_w[:Cs, :], preferred_element_type=jnp.float32)
                  + jnp.dot(exp_y, ctr_w[Cs:, :], preferred_element_type=jnp.float32)
                  + ctr_b_ref[...])                                 # (Th, C2)
    pad_c = jnp.logical_and(
        jnp.max(jnp.abs(cat), axis=-1, keepdims=True) == 0.0,
        jnp.max(jnp.abs(exp_y), axis=-1, keepdims=True) == 0.0)
    contracted = jnp.where(pad_c, 0.0, contracted)

    # TODO(synk): _get_note_hidden_states is abstract in the base class
    # (subclass-specific graph/LSTM); identity pass-through used here.
    note_h = contracted

    # ---- shared multi-head ContextAttention over segments (heads vectorized)
    def ctx_attention(x, w_ref, b_ref, ctx_ref, seg, segT, segT3):
        # x:(Tn,C2) seg:(Tn,Mn) segT:(Mn,Tn) segT3:(Mn,Tn,1)  ->  (Mn,C2)
        a = jnp.tanh(jnp.dot(x, w_ref[...], preferred_element_type=jnp.float32) + b_ref[...])
        sim = jnp.dot(a, ctx_ref[...], preferred_element_type=jnp.float32)       # (Tn, nh)
        # numerically stable per-segment softmax: subtract the segment max
        masked = jnp.where(segT3 > 0.0, sim[None, :, :], -1e30)                  # (Mn,Tn,nh)
        seg_max = jnp.max(masked, axis=1)                                        # (Mn, nh)
        note_max = jnp.dot(seg, seg_max, preferred_element_type=jnp.float32)     # (Tn, nh)
        e = jnp.exp(sim - note_max)
        seg_sum = jnp.dot(segT, e, preferred_element_type=jnp.float32)           # (Mn, nh)
        denom = jnp.dot(seg, seg_sum, preferred_element_type=jnp.float32)        # (Tn, nh)
        wgt = e / denom
        w_full = jnp.dot(wgt, head_exp_ref[...],
                         preferred_element_type=jnp.float32)                     # (Tn, C2)
        return jnp.dot(segT, w_full * x, preferred_element_type=jnp.float32)     # (Mn, C2)

    # ---- 4. make_higher_node: note -> measure pooling
    measure_nodes = ctx_attention(note_h, ma_w_ref, ma_b_ref, ma_ctx_ref,
                                  seg_ref[...], segT_ref[...], segT3_ref[...])   # (M, C2)

    # ---- 5. bidirectional LSTM over measures (PyTorch gate order i,f,g,o)
    # TODO(synk): pack_padded_sequence variable-length batching not modelled
    #             (equal measure count per batch item assumed); time loop is
    #             trace-time unrolled since M is small here.
    def cell(gate_in, h, c, w_hh):
        gates = gate_in + jnp.dot(h, w_hh, preferred_element_type=jnp.float32)   # (1, 4H)
        i = jax.nn.sigmoid(gates[:, 0:H])
        f = jax.nn.sigmoid(gates[:, H:2 * H])
        g = jnp.tanh(gates[:, 2 * H:3 * H])
        o = jax.nn.sigmoid(gates[:, 3 * H:4 * H])
        c_new = f * c + i * g
        h_new = o * jnp.tanh(c_new)
        return h_new, c_new

    xin = measure_nodes
    for l in range(layers):
        # hoisted input projection, both directions in one matmul: (M, 8H)
        proj = jnp.dot(xin, w_ih_ref[l], preferred_element_type=jnp.float32) + b_ref[l]
        w_hh_f = w_hh_f_ref[l]
        w_hh_b = w_hh_b_ref[l]

        h = jnp.zeros((1, H), jnp.float32)
        c = jnp.zeros((1, H), jnp.float32)
        for t in range(M):                          # forward direction
            h, c = cell(proj[t:t + 1, 0:4 * H], h, c, w_hh_f)
            enc_ref[t:t + 1, 0:H] = h

        h = jnp.zeros((1, H), jnp.float32)
        c = jnp.zeros((1, H), jnp.float32)
        for t in range(M - 1, -1, -1):              # backward direction
            h, c = cell(proj[t:t + 1, 4 * H:8 * H], h, c, w_hh_b)
            enc_ref[t:t + 1, H:2 * H] = h

        xin = enc_ref[...]                          # (M, C2) -> next layer / attention

    # ---- 6. performance_final_attention: single segment over all measures
    ones_seg = jnp.ones((M, 1), jnp.float32)
    ones_segT = jnp.ones((1, M), jnp.float32)
    ones_segT3 = jnp.ones((1, M, 1), jnp.float32)
    style = ctx_attention(xin, fa_w_ref, fa_b_ref, fa_ctx_ref,
                          ones_seg, ones_segT, ones_segT3)          # (1, C2)

    # ---- 7. encode_with_net (fused mean|var matmul) + reparameterize (+ multi-sample)
    mv = jnp.dot(style, mv_w_ref[...], preferred_element_type=jnp.float32) + mv_b_ref[...]
    mu = mv[:, 0:Z]
    var = mv[:, Z:2 * Z]
    std = jnp.exp(0.5 * var)
    mu_ref[0] = mu
    var_ref[0] = var
    z_ref[0] = mu + eps_ref[0] * std
    zs_ref[0] = mu + eps_multi_ref[0] * std          # (S, Z), broadcast over samples


# ---------------------------------------------------------------------------
# PerformanceEncoder in JAX + Pallas (single fused kernel per forward call)
# ---------------------------------------------------------------------------
class PerformanceEncoderPallas:
    def __init__(self, cfg, key):
        self.perf_emb = cfg['performance_size']
        self.H = cfg['encoder_size']
        self.Z = cfg['encoded_vector_size']
        self.layers = cfg['encoder_layer']
        self.num_head = cfg['num_attention_head']
        self.Cy = cfg['perf_feature_dim']
        self.Cs = cfg['score_feature_dim']
        self.C2 = 2 * self.H
        self.Ccat = self.Cs + self.perf_emb           # encoder_input_size
        C2 = self.C2
        hs = C2 // self.num_head

        ks = iter(jax.random.split(key, 64))

        def lin(kin, kout, scale=0.1):
            return (jax.random.uniform(next(ks), (kin, kout), jnp.float32, -scale, scale),
                    jax.random.uniform(next(ks), (1, kout), jnp.float32, -scale, scale))

        # TODO(synk): performance_embedding_layer / performance_contractor are defined
        # only in subclasses of PerformanceEncoder (usually Linear+Dropout+ReLU);
        # modeled here as plain Linear layers.
        self.emb_w, self.emb_b = lin(self.Cy, self.perf_emb)
        self.ctr_w, self.ctr_b = lin(self.Ccat, C2)

        def ctx_block_diag(ctx):
            # (nh, hs) per-head context vectors -> (C2, nh) block-diagonal matrix so
            # that a_tanh @ mat == per-head similarity for all heads at once.
            m = np.zeros((C2, self.num_head), np.float32)
            cv = np.asarray(ctx)
            for h in range(self.num_head):
                m[h * hs:(h + 1) * hs, h] = cv[h]
            return jnp.asarray(m)

        self.ma_w, self.ma_b = lin(C2, C2)
        self.ma_ctx = ctx_block_diag(
            jax.random.uniform(next(ks), (self.num_head, hs), jnp.float32, -1.0, 1.0))
        self.fa_w, self.fa_b = lin(C2, C2)
        self.fa_ctx = ctx_block_diag(
            jax.random.uniform(next(ks), (self.num_head, hs), jnp.float32, -1.0, 1.0))
        # head -> lane expansion matrix: wgt(T,nh) @ head_exp(nh,C2) repeats each
        # head weight across that head's hs lanes.
        self.head_exp = jnp.asarray(
            np.kron(np.eye(self.num_head, dtype=np.float32),
                    np.ones((1, hs), np.float32)))

        # Bidirectional LSTM: input 2H, hidden H, `layers` layers (all layers take 2H
        # input).  fwd|bwd input weights and (b_ih+b_hh) biases concatenated per layer.
        w_ih_l, w_hh_f_l, w_hh_b_l, b_l = [], [], [], []
        for _ in range(self.layers):
            w_ih_f, _ = lin(C2, 4 * self.H)
            w_hh_f, _ = lin(self.H, 4 * self.H)
            b_f = jax.random.uniform(next(ks), (1, 4 * self.H), jnp.float32, -0.1, 0.1)
            w_ih_b, _ = lin(C2, 4 * self.H)
            w_hh_b, _ = lin(self.H, 4 * self.H)
            b_b = jax.random.uniform(next(ks), (1, 4 * self.H), jnp.float32, -0.1, 0.1)
            w_ih_l.append(jnp.concatenate([w_ih_f, w_ih_b], axis=1))   # (C2, 8H)
            w_hh_f_l.append(w_hh_f)
            w_hh_b_l.append(w_hh_b)
            b_l.append(jnp.concatenate([b_f, b_b], axis=1))            # (1, 8H)
        self.w_ih_all = jnp.stack(w_ih_l)          # (L, C2, 8H)
        self.w_hh_f_all = jnp.stack(w_hh_f_l)      # (L, H, 4H)
        self.w_hh_b_all = jnp.stack(w_hh_b_l)      # (L, H, 4H)
        self.b_all = jnp.stack(b_l)                # (L, 1, 8H)

        mean_w, mean_b = lin(C2, self.Z)
        var_w, var_b = lin(C2, self.Z)
        self.mv_w = jnp.concatenate([mean_w, var_w], axis=1)   # (C2, 2Z)
        self.mv_b = jnp.concatenate([mean_b, var_b], axis=1)   # (1, 2Z)

    # ---------------------------------------------------------------
    def __call__(self, score_embedding, y, edges, note_locations,
                 return_z=False, num_samples=10, rng=None):
        measure_numbers = np.asarray(note_locations['measure'])
        total_note_cat = score_embedding['total_note_cat']
        N, T, _ = y.shape
        Th = T // 2

        # masking_half keeps the first T//2 notes; everything downstream uses only
        # that half, so the embedding/contractor run on the half directly.
        y_h = y[:, :Th, :]
        cat_h = total_note_cat[:, :Th, :]

        # note -> measure one-hot map (make_higher_node boundary rule).
        # TODO(synk): built with NumPy at trace time (a new measure layout retraces);
        # at production sequence lengths replace the dense one-hot with scalar-
        # prefetched segment boundaries to avoid the O(T*M) matrix.
        seg_id = np.concatenate(
            [[0], np.cumsum((measure_numbers[1:] - measure_numbers[:-1]) == 1)]
        ).astype(np.int32)
        M = int(seg_id[-1]) + 1
        seg_np = np.eye(M, dtype=np.float32)[seg_id]             # (Th, M)
        seg = jnp.asarray(seg_np)
        segT = jnp.asarray(seg_np.T)                             # (M, Th)
        segT3 = jnp.asarray(seg_np.T[:, :, None])                # (M, Th, 1)

        S = num_samples if return_z else 1
        k1, k2 = jax.random.split(rng)
        eps = jax.random.normal(k1, (N, 1, self.Z), jnp.float32)
        eps_multi = jax.random.normal(k2, (N, S, self.Z), jnp.float32)

        C2, H, Z, L, nh = self.C2, self.H, self.Z, self.layers, self.num_head

        def rep(shape):        # replicated operand (weights / segment maps)
            nd = len(shape)
            return pl.BlockSpec(shape, lambda n, _nd=nd: (0,) * _nd)

        def per_n(shape):      # per-batch-item operand
            return pl.BlockSpec(shape, lambda n: (n,) + (0,) * (len(shape) - 1))

        z, mu, var, zs = pl.pallas_call(
            _perf_encoder_kernel,
            grid=(N,),
            in_specs=[
                per_n((1, Th, self.Cy)), per_n((1, Th, self.Cs)),
                rep((self.Cy, self.perf_emb)), rep((1, self.perf_emb)),
                rep((self.Ccat, C2)), rep((1, C2)),
                rep((C2, C2)), rep((1, C2)), rep((C2, nh)),
                rep((Th, M)), rep((M, Th)), rep((M, Th, 1)),
                rep((C2, C2)), rep((1, C2)), rep((C2, nh)), rep((nh, C2)),
                rep((L, C2, 8 * H)), rep((L, H, 4 * H)), rep((L, H, 4 * H)),
                rep((L, 1, 8 * H)),
                rep((C2, 2 * Z)), rep((1, 2 * Z)),
                per_n((1, 1, Z)), per_n((1, S, Z)),
            ],
            out_specs=(per_n((1, 1, Z)), per_n((1, 1, Z)), per_n((1, 1, Z)),
                       per_n((1, S, Z))),
            out_shape=(jax.ShapeDtypeStruct((N, 1, Z), jnp.float32),
                       jax.ShapeDtypeStruct((N, 1, Z), jnp.float32),
                       jax.ShapeDtypeStruct((N, 1, Z), jnp.float32),
                       jax.ShapeDtypeStruct((N, S, Z), jnp.float32)),
            scratch_shapes=[pltpu.VMEM((M, C2), jnp.float32)],
            compiler_params=pltpu.CompilerParams(
                dimension_semantics=("parallel",),          # shards batch across TCs (v7x)
                vmem_limit_bytes=32 * 1024 * 1024),
        )(y_h, cat_h,
          self.emb_w, self.emb_b, self.ctr_w, self.ctr_b,
          self.ma_w, self.ma_b, self.ma_ctx, seg, segT, segT3,
          self.fa_w, self.fa_b, self.fa_ctx, self.head_exp,
          self.w_ih_all, self.w_hh_f_all, self.w_hh_b_all, self.b_all,
          self.mv_w, self.mv_b, eps, eps_multi)

        if return_z:
            return zs
        return z[:, 0, :], mu[:, 0, :], var[:, 0, :]


# ---------------------------------------------------------------------------
if __name__ == "__main__":
    key = jax.random.PRNGKey(0)
    k_param, k_score, k_y, k_eps1, k_eps2 = jax.random.split(key, 5)

    cfg = dict(performance_size=32,       # performance_embedding_size
               encoder_size=32,           # H  (LSTM hidden; attention size = 2H)
               encoded_vector_size=16,    # Z
               encoder_layer=2,
               num_attention_head=8,
               perf_feature_dim=5,
               score_feature_dim=24)

    N, T = 2, 16
    total_note_cat = jax.random.normal(k_score, (N, T, cfg['score_feature_dim']), jnp.float32)
    y = jax.random.normal(k_y, (N, T, cfg['perf_feature_dim']), jnp.float32)
    # padded (all-zero) note to exercise the masking path
    y = y.at[1, 3, :].set(0.0)
    total_note_cat = total_note_cat.at[1, 3, :].set(0.0)

    # measure numbers for the (post masking_half) T//2 = 8 notes -> 3 measures
    note_locations = {'measure': np.array([0, 0, 0, 1, 1, 2, 2, 2], dtype=np.int32)}
    score_embedding = {'total_note_cat': total_note_cat}

    enc = PerformanceEncoderPallas(cfg, k_param)

    z, mu, var = enc(score_embedding, y, None, note_locations, rng=k_eps1)
    zs = enc(score_embedding, y, None, note_locations,
             return_z=True, num_samples=10, rng=k_eps2)

    jax.block_until_ready((z, mu, var, zs))
    assert z.shape == (N, cfg['encoded_vector_size'])
    assert mu.shape == (N, cfg['encoded_vector_size'])
    assert var.shape == (N, cfg['encoded_vector_size'])
    assert zs.shape == (N, 10, cfg['encoded_vector_size'])
    assert bool(jnp.all(jnp.isfinite(z))) and bool(jnp.all(jnp.isfinite(zs)))
    print("KERNEL_OK")
</pallas_src>

<mosaic_0001>
module attributes {stable_mosaic.version = 11 : i64} {
  func.func @_perf_encoder_kernel(%arg0: i32, %arg1: memref<1x8x5xf32, #tpu.memory_space<vmem>>, %arg2: memref<1x8x24xf32, #tpu.memory_space<vmem>>, %arg3: memref<5x32xf32, #tpu.memory_space<vmem>>, %arg4: memref<1x32xf32, #tpu.memory_space<vmem>>, %arg5: memref<56x64xf32, #tpu.memory_space<vmem>>, %arg6: memref<1x64xf32, #tpu.memory_space<vmem>>, %arg7: memref<64x64xf32, #tpu.memory_space<vmem>>, %arg8: memref<1x64xf32, #tpu.memory_space<vmem>>, %arg9: memref<64x8xf32, #tpu.memory_space<vmem>>, %arg10: memref<8x3xf32, #tpu.memory_space<vmem>>, %arg11: memref<3x8xf32, #tpu.memory_space<vmem>>, %arg12: memref<3x8x1xf32, #tpu.memory_space<vmem>>, %arg13: memref<64x64xf32, #tpu.memory_space<vmem>>, %arg14: memref<1x64xf32, #tpu.memory_space<vmem>>, %arg15: memref<64x8xf32, #tpu.memory_space<vmem>>, %arg16: memref<8x64xf32, #tpu.memory_space<vmem>>, %arg17: memref<2x64x256xf32, #tpu.memory_space<vmem>>, %arg18: memref<2x32x128xf32, #tpu.memory_space<vmem>>, %arg19: memref<2x32x128xf32, #tpu.memory_space<vmem>>, %arg20: memref<2x1x256xf32, #tpu.memory_space<vmem>>, %arg21: memref<64x32xf32, #tpu.memory_space<vmem>>, %arg22: memref<1x32xf32, #tpu.memory_space<vmem>>, %arg23: memref<1x1x16xf32, #tpu.memory_space<vmem>>, %arg24: memref<1x1x16xf32, #tpu.memory_space<vmem>>, %arg25: memref<1x1x16xf32, #tpu.memory_space<vmem>>, %arg26: memref<1x1x16xf32, #tpu.memory_space<vmem>>, %arg27: memref<1x1x16xf32, #tpu.memory_space<vmem>>, %arg28: memref<1x1x16xf32, #tpu.memory_space<vmem>>, %arg29: memref<3x64xf32, #tpu.memory_space<vmem>>) attributes {dimension_semantics = [#tpu.dimension_semantics<parallel>], iteration_bounds = array<i64: 2>, scalar_prefetch = 0 : i64, scratch_operands = 1 : i64, tpu.core_type = #tpu.core_type<tc>, window_params = [{transform_indices = @transform_0, window_bounds = array<i64: 1, 8, 5>}, {transform_indices = @transform_1, window_bounds = array<i64: 1, 8, 24>}, {pipeline_mode = #tpu.pipeline_mode<synchronous>, transform_indices = @transform_2, window_bounds = array<i64: 5, 32>}, {pipeline_mode = #tpu.pipeline_mode<synchronous>, transform_indices = @transform_3, window_bounds = array<i64: 1, 32>}, {pipeline_mode = #tpu.pipeline_mode<synchronous>, transform_indices = @transform_4, window_bounds = array<i64: 56, 64>}, {pipeline_mode = #tpu.pipeline_mode<synchronous>, transform_indices = @transform_5, window_bounds = array<i64: 1, 64>}, {pipeline_mode = #tpu.pipeline_mode<synchronous>, transform_indices = @transform_6, window_bounds = array<i64: 64, 64>}, {pipeline_mode = #tpu.pipeline_mode<synchronous>, transform_indices = @transform_7, window_bounds = array<i64: 1, 64>}, {pipeline_mode = #tpu.pipeline_mode<synchronous>, transform_indices = @transform_8, window_bounds = array<i64: 64, 8>}, {pipeline_mode = #tpu.pipeline_mode<synchronous>, transform_indices = @transform_9, window_bounds = array<i64: 8, 3>}, {pipeline_mode = #tpu.pipeline_mode<synchronous>, transform_indices = @transform_10, window_bounds = array<i64: 3, 8>}, {pipeline_mode = #tpu.pipeline_mode<synchronous>, transform_indices = @transform_11, window_bounds = array<i64: 3, 8, 1>}, {pipeline_mode = #tpu.pipeline_mode<synchronous>, transform_indices = @transform_12, window_bounds = array<i64: 64, 64>}, {pipeline_mode = #tpu.pipeline_mode<synchronous>, transform_indices = @transform_13, window_bounds = array<i64: 1, 64>}, {pipeline_mode = #tpu.pipeline_mode<synchronous>, transform_indices = @transform_14, window_bounds = array<i64: 64, 8>}, {pipeline_mode = #tpu.pipeline_mode<synchronous>, transform_indices = @transform_15, window_bounds = array<i64: 8, 64>}, {pipeline_mode = #tpu.pipeline_mode<synchronous>, transform_indices = @transform_16, window_bounds = array<i64: 2, 64, 256>}, {pipeline_mode = #tpu.pipeline_mode<synchronous>, transform_indices = @transform_17, window_bounds = array<i64: 2, 32, 128>}, {pipeline_mode = #tpu.pipeline_mode<synchronous>, transform_indices = @transform_18, window_bounds = array<i64: 2, 32, 128>}, {pipeline_mode = #tpu.pipeline_mode<synchronous>, transform_indices = @transform_19, window_bounds = array<i64: 2, 1, 256>}, {pipeline_mode = #tpu.pipeline_mode<synchronous>, transform_indices = @transform_20, window_bounds = array<i64: 64, 32>}, {pipeline_mode = #tpu.pipeline_mode<synchronous>, transform_indices = @transform_21, window_bounds = array<i64: 1, 32>}, {transform_indices = @transform_22, window_bounds = array<i64: 1, 1, 16>}, {transform_indices = @transform_23, window_bounds = array<i64: 1, 1, 16>}, {transform_indices = @transform_24, window_bounds = array<i64: 1, 1, 16>}, {transform_indices = @transform_25, window_bounds = array<i64: 1, 1, 16>}, {transform_indices = @transform_26, window_bounds = array<i64: 1, 1, 16>}, {transform_indices = @transform_27, window_bounds = array<i64: 1, 1, 16>}]} {
    %c0 = arith.constant 0 : index
    %c0_0 = arith.constant 0 : index
    %c0_1 = arith.constant 0 : index
    %0 = vector.load %arg1[%c0, %c0_0, %c0_1] : memref<1x8x5xf32, #tpu.memory_space<vmem>>, vector<1x8x5xf32>
    %1 = vector.shape_cast %0 : vector<1x8x5xf32> to vector<8x5xf32>
    %c0_2 = arith.constant 0 : index
    %c0_3 = arith.constant 0 : index
    %c0_4 = arith.constant 0 : index
    %2 = vector.load %arg2[%c0_2, %c0_3, %c0_4] : memref<1x8x24xf32, #tpu.memory_space<vmem>>, vector<1x8x24xf32>
    %3 = vector.shape_cast %2 : vector<1x8x24xf32> to vector<8x24xf32>
    %4 = math.absf %1 : vector<8x5xf32>
    %cst = arith.constant dense<0xFF800000> : vector<8xf32>
    %5 = vector.multi_reduction <maximumf>, %4, %cst [1] : vector<8x5xf32> to vector<8xf32>
    %6 = vector.shape_cast %5 : vector<8xf32> to vector<8x1xf32>
    %cst_5 = arith.constant 0.000000e+00 : f32
    %7 = vector.broadcast %cst_5 : f32 to vector<8x1xf32>
    %8 = arith.cmpf oeq, %6, %7 : vector<8x1xf32>
    %c0_6 = arith.constant 0 : index
    %c0_7 = arith.constant 0 : index
    %9 = vector.load %arg3[%c0_6, %c0_7] : memref<5x32xf32, #tpu.memory_space<vmem>>, vector<5x32xf32>
    %cst_8 = arith.constant dense<0.000000e+00> : vector<8x32xf32>
    %10 = tpu.matmul %1, %9, %cst_8 {dimension_numbers = #tpu.dot_dimension_numbers<[1], [0], [0], [1], [0, 0, 1, 1], [], []>} : vector<8x5xf32>, vector<5x32xf32>, vector<8x32xf32> -> vector<8x32xf32>
    %c0_9 = arith.constant 0 : index
    %c0_10 = arith.constant 0 : index
    %11 = vector.load %arg4[%c0_9, %c0_10] : memref<1x32xf32, #tpu.memory_space<vmem>>, vector<1x32xf32>
    %12 = vector.broadcast %11 : vector<1x32xf32> to vector<8x32xf32>
    %13 = arith.addf %10, %12 : vector<8x32xf32>
    %cst_11 = arith.constant 0.000000e+00 : f32
    %14 = vector.shape_cast %8 : vector<8x1xi1> to vector<8x1xi1>
    %15 = vector.broadcast %14 : vector<8x1xi1> to vector<8x32xi1>
    %16 = vector.broadcast %cst_11 : f32 to vector<8x32xf32>
    %17 = arith.select %15, %16, %13 : vector<8x32xi1>, vector<8x32xf32>
    %c0_12 = arith.constant 0 : index
    %c0_13 = arith.constant 0 : index
    %18 = vector.load %arg5[%c0_12, %c0_13] : memref<56x64xf32, #tpu.memory_space<vmem>>, vector<56x64xf32>
    %19 = vector.extract_strided_slice %18 {offsets = [0, 0], sizes = [24, 64], strides = [1, 1]} : vector<56x64xf32> to vector<24x64xf32>
    %cst_14 = arith.constant dense<0.000000e+00> : vector<8x64xf32>
    %20 = tpu.matmul %3, %19, %cst_14 {dimension_numbers = #tpu.dot_dimension_numbers<[1], [0], [0], [1], [0, 0, 1, 1], [], []>} : vector<8x24xf32>, vector<24x64xf32>, vector<8x64xf32> -> vector<8x64xf32>
    %21 = vector.extract_strided_slice %18 {offsets = [24, 0], sizes = [32, 64], strides = [1, 1]} : vector<56x64xf32> to vector<32x64xf32>
    %cst_15 = arith.constant dense<0.000000e+00> : vector<8x64xf32>
    %22 = tpu.matmul %17, %21, %cst_15 {dimension_numbers = #tpu.dot_dimension_numbers<[1], [0], [0], [1], [0, 0, 1, 1], [], []>} : vector<8x32xf32>, vector<32x64xf32>, vector<8x64xf32> -> vector<8x64xf32>
    %23 = arith.addf %20, %22 : vector<8x64xf32>
    %c0_16 = arith.constant 0 : index
    %c0_17 = arith.constant 0 : index
    %24 = vector.load %arg6[%c0_16, %c0_17] : memref<1x64xf32, #tpu.memory_space<vmem>>, vector<1x64xf32>
    %25 = vector.broadcast %24 : vector<1x64xf32> to vector<8x64xf32>
    %26 = arith.addf %23, %25 : vector<8x64xf32>
    %27 = math.absf %3 : vector<8x24xf32>
    %cst_18 = arith.constant dense<0xFF800000> : vector<8xf32>
    %28 = vector.multi_reduction <maximumf>, %27, %cst_18 [1] : vector<8x24xf32> to vector<8xf32>
    %29 = vector.shape_cast %28 : vector<8xf32> to vector<8x1xf32>
    %cst_19 = arith.constant 0.000000e+00 : f32
    %30 = vector.broadcast %cst_19 : f32 to vector<8x1xf32>
    %31 = arith.cmpf oeq, %29, %30 : vector<8x1xf32>
    %32 = math.absf %17 : vector<8x32xf32>
    %cst_20 = arith.constant dense<0xFF800000> : vector<8xf32>
    %33 = vector.multi_reduction <maximumf>, %32, %cst_20 [1] : vector<8x32xf32> to vector<8xf32>
    %34 = vector.shape_cast %33 : vector<8xf32> to vector<8x1xf32>
    %cst_21 = arith.constant 0.000000e+00 : f32
    %35 = vector.broadcast %cst_21 : f32 to vector<8x1xf32>
    %36 = arith.cmpf oeq, %34, %35 : vector<8x1xf32>
    %37 = arith.andi %31, %36 : vector<8x1xi1>
    %cst_22 = arith.constant 0.000000e+00 : f32
    %38 = vector.shape_cast %37 : vector<8x1xi1> to vector<8x1xi1>
    %39 = vector.broadcast %38 : vector<8x1xi1> to vector<8x64xi1>
    %40 = vector.broadcast %cst_22 : f32 to vector<8x64xf32>
    %41 = arith.select %39, %40, %26 : vector<8x64xi1>, vector<8x64xf32>
    %c0_23 = arith.constant 0 : index
    %c0_24 = arith.constant 0 : index
    %42 = vector.load %arg10[%c0_23, %c0_24] : memref<8x3xf32, #tpu.memory_space<vmem>>, vector<8x3xf32>
    %c0_25 = arith.constant 0 : index
    %c0_26 = arith.constant 0 : index
    %43 = vector.load %arg11[%c0_25, %c0_26] : memref<3x8xf32, #tpu.memory_space<vmem>>, vector<3x8xf32>
    %c0_27 = arith.constant 0 : index
    %c0_28 = arith.constant 0 : index
    %c0_29 = arith.constant 0 : index
    %44 = vector.load %arg12[%c0_27, %c0_28, %c0_29] : memref<3x8x1xf32, #tpu.memory_space<vmem>>, vector<3x8x1xf32>
    %c0_30 = arith.constant 0 : index
    %c0_31 = arith.constant 0 : index
    %45 = vector.load %arg7[%c0_30, %c0_31] : memref<64x64xf32, #tpu.memory_space<vmem>>, vector<64x64xf32>
    %cst_32 = arith.constant dense<0.000000e+00> : vector<8x64xf32>
    %46 = tpu.matmul %41, %45, %cst_32 {dimension_numbers = #tpu.dot_dimension_numbers<[1], [0], [0], [1], [0, 0, 1, 1], [], []>} : vector<8x64xf32>, vector<64x64xf32>, vector<8x64xf32> -> vector<8x64xf32>
    %c0_33 = arith.constant 0 : index
    %c0_34 = arith.constant 0 : index
    %47 = vector.load %arg8[%c0_33, %c0_34] : memref<1x64xf32, #tpu.memory_space<vmem>>, vector<1x64xf32>
    %48 = vector.broadcast %47 : vector<1x64xf32> to vector<8x64xf32>
    %49 = arith.addf %46, %48 : vector<8x64xf32>
    %50 = math.tanh %49 : vector<8x64xf32>
    %c0_35 = arith.constant 0 : index
    %c0_36 = arith.constant 0 : index
    %51 = vector.load %arg9[%c0_35, %c0_36] : memref<64x8xf32, #tpu.memory_space<vmem>>, vector<64x8xf32>
    %cst_37 = arith.constant dense<0.000000e+00> : vector<8x8xf32>
    %52 = tpu.matmul %50, %51, %cst_37 {dimension_numbers = #tpu.dot_dimension_numbers<[1], [0], [0], [1], [0, 0, 1, 1], [], []>} : vector<8x64xf32>, vector<64x8xf32>, vector<8x8xf32> -> vector<8x8xf32>
    %cst_38 = arith.constant 0.000000e+00 : f32
    %53 = vector.broadcast %cst_38 : f32 to vector<3x8x1xf32>
    %54 = arith.cmpf ogt, %44, %53 : vector<3x8x1xf32>
    %55 = vector.shape_cast %52 : vector<8x8xf32> to vector<1x8x8xf32>
    %cst_39 = arith.constant -1.000000e+30 : f32
    %56 = vector.shape_cast %54 : vector<3x8x1xi1> to vector<3x8x1xi1>
    %57 = vector.broadcast %56 : vector<3x8x1xi1> to vector<3x8x8xi1>
    %58 = vector.shape_cast %55 : vector<1x8x8xf32> to vector<1x8x8xf32>
    %59 = vector.broadcast %58 : vector<1x8x8xf32> to vector<3x8x8xf32>
    %60 = vector.broadcast %cst_39 : f32 to vector<3x8x8xf32>
    %61 = arith.select %57, %59, %60 : vector<3x8x8xi1>, vector<3x8x8xf32>
    %cst_40 = arith.constant dense<0xFF800000> : vector<3x8xf32>
    %62 = vector.multi_reduction <maximumf>, %61, %cst_40 [1] : vector<3x8x8xf32> to vector<3x8xf32>
    %cst_41 = arith.constant dense<0.000000e+00> : vector<8x8xf32>
    %63 = tpu.matmul %42, %62, %cst_41 {dimension_numbers = #tpu.dot_dimension_numbers<[1], [0], [0], [1], [0, 0, 1, 1], [], []>} : vector<8x3xf32>, vector<3x8xf32>, vector<8x8xf32> -> vector<8x8xf32>
    %64 = arith.subf %52, %63 : vector<8x8xf32>
    %65 = math.exp %64 : vector<8x8xf32>
    %cst_42 = arith.constant dense<0.000000e+00> : vector<3x8xf32>
    %66 = tpu.matmul %43, %65, %cst_42 {dimension_numbers = #tpu.dot_dimension_numbers<[1], [0], [0], [1], [0, 0, 1, 1], [], []>} : vector<3x8xf32>, vector<8x8xf32>, vector<3x8xf32> -> vector<3x8xf32>
    %cst_43 = arith.constant dense<0.000000e+00> : vector<8x8xf32>
    %67 = tpu.matmul %42, %66, %cst_43 {dimension_numbers = #tpu.dot_dimension_numbers<[1], [0], [0], [1], [0, 0, 1, 1], [], []>} : vector<8x3xf32>, vector<3x8xf32>, vector<8x8xf32> -> vector<8x8xf32>
    %68 = arith.divf %65, %67 : vector<8x8xf32>
    %c0_44 = arith.constant 0 : index
    %c0_45 = arith.constant 0 : index
    %69 = vector.load %arg16[%c0_44, %c0_45] : memref<8x64xf32, #tpu.memory_space<vmem>>, vector<8x64xf32>
    %cst_46 = arith.constant dense<0.000000e+00> : vector<8x64xf32>
    %70 = tpu.matmul %68, %69, %cst_46 {dimension_numbers = #tpu.dot_dimension_numbers<[1], [0], [0], [1], [0, 0, 1, 1], [], []>} : vector<8x8xf32>, vector<8x64xf32>, vector<8x64xf32> -> vector<8x64xf32>
    %71 = arith.mulf %70, %41 : vector<8x64xf32>
    %cst_47 = arith.constant dense<0.000000e+00> : vector<3x64xf32>
    %72 = tpu.matmul %43, %71, %cst_47 {dimension_numbers = #tpu.dot_dimension_numbers<[1], [0], [0], [1], [0, 0, 1, 1], [], []>} : vector<3x8xf32>, vector<8x64xf32>, vector<3x64xf32> -> vector<3x64xf32>
    %c0_48 = arith.constant 0 : index
    %c0_49 = arith.constant 0 : index
    %c0_50 = arith.constant 0 : index
    %73 = vector.load %arg17[%c0_48, %c0_49, %c0_50] : memref<2x64x256xf32, #tpu.memory_space<vmem>>, vector<1x64x256xf32>
    %74 = vector.shape_cast %73 : vector<1x64x256xf32> to vector<64x256xf32>
    %cst_51 = arith.constant dense<0.000000e+00> : vector<3x256xf32>
    %75 = tpu.matmul %72, %74, %cst_51 {dimension_numbers = #tpu.dot_dimension_numbers<[1], [0], [0], [1], [0, 0, 1, 1], [], []>} : vector<3x64xf32>, vector<64x256xf32>, vector<3x256xf32> -> vector<3x256xf32>
    %c0_52 = arith.constant 0 : index
    %c0_53 = arith.constant 0 : index
    %c0_54 = arith.constant 0 : index
    %76 = vector.load %arg20[%c0_52, %c0_53, %c0_54] : memref<2x1x256xf32, #tpu.memory_space<vmem>>, vector<1x1x256xf32>
    %77 = vector.shape_cast %76 : vector<1x1x256xf32> to vector<1x256xf32>
    %78 = vector.broadcast %77 : vector<1x256xf32> to vector<3x256xf32>
    %79 = arith.addf %75, %78 : vector<3x256xf32>
    %c0_55 = arith.constant 0 : index
    %c0_56 = arith.constant 0 : index
    %c0_57 = arith.constant 0 : index
    %80 = vector.load %arg18[%c0_55, %c0_56, %c0_57] : memref<2x32x128xf32, #tpu.memory_space<vmem>>, vector<1x32x128xf32>
    %81 = vector.shape_cast %80 : vector<1x32x128xf32> to vector<32x128xf32>
    %c0_58 = arith.constant 0 : index
    %c0_59 = arith.constant 0 : index
    %c0_60 = arith.constant 0 : index
    %82 = vector.load %arg19[%c0_58, %c0_59, %c0_60] : memref<2x32x128xf32, #tpu.memory_space<vmem>>, vector<1x32x128xf32>
    %83 = vector.shape_cast %82 : vector<1x32x128xf32> to vector<32x128xf32>
    %cst_61 = arith.constant 0.000000e+00 : f32
    %84 = vector.broadcast %cst_61 : f32 to vector<1x32xf32>
    %cst_62 = arith.constant 0.000000e+00 : f32
    %85 = vector.broadcast %cst_62 : f32 to vector<1x32xf32>
    %86 = vector.extract_strided_slice %79 {offsets = [0, 0], sizes = [1, 128], strides = [1, 1]} : vector<3x256xf32> to vector<1x128xf32>
    %cst_63 = arith.constant dense<0.000000e+00> : vector<1x128xf32>
    %87 = tpu.matmul %84, %81, %cst_63 {dimension_numbers = #tpu.dot_dimension_numbers<[1], [0], [0], [1], [0, 0, 1, 1], [], []>} : vector<1x32xf32>, vector<32x128xf32>, vector<1x128xf32> -> vector<1x128xf32>
    %88 = arith.addf %86, %87 : vector<1x128xf32>
    %89 = vector.extract_strided_slice %88 {offsets = [0, 0], sizes = [1, 32], strides = [1, 1]} : vector<1x128xf32> to vector<1x32xf32>
    %90 = arith.negf %89 : vector<1x32xf32>
    %91 = math.exp %90 : vector<1x32xf32>
    %cst_64 = arith.constant 1.000000e+00 : f32
    %92 = vector.broadcast %cst_64 : f32 to vector<1x32xf32>
    %93 = arith.addf %92, %91 : vector<1x32xf32>
    %94 = arith.divf %92, %93 : vector<1x32xf32>
    %95 = vector.extract_strided_slice %88 {offsets = [0, 32], sizes = [1, 32], strides = [1, 1]} : vector<1x128xf32> to vector<1x32xf32>
    %96 = arith.negf %95 : vector<1x32xf32>
    %97 = math.exp %96 : vector<1x32xf32>
    %cst_65 = arith.constant 1.000000e+00 : f32
    %98 = vector.broadcast %cst_65 : f32 to vector<1x32xf32>
    %99 = arith.addf %98, %97 : vector<1x32xf32>
    %100 = arith.divf %98, %99 : vector<1x32xf32>
    %101 = vector.extract_strided_slice %88 {offsets = [0, 64], sizes = [1, 32], strides = [1, 1]} : vector<1x128xf32> to vector<1x32xf32>
    %102 = math.tanh %101 : vector<1x32xf32>
    %103 = vector.extract_strided_slice %88 {offsets = [0, 96], sizes = [1, 32], strides = [1, 1]} : vector<1x128xf32> to vector<1x32xf32>
    %104 = arith.negf %103 : vector<1x32xf32>
    %105 = math.exp %104 : vector<1x32xf32>
    %cst_66 = arith.constant 1.000000e+00 : f32
    %106 = vector.broadcast %cst_66 : f32 to vector<1x32xf32>
    %107 = arith.addf %106, %105 : vector<1x32xf32>
    %108 = arith.divf %106, %107 : vector<1x32xf32>
    %109 = arith.mulf %100, %85 : vector<1x32xf32>
    %110 = arith.mulf %94, %102 : vector<1x32xf32>
    %111 = arith.addf %109, %110 : vector<1x32xf32>
    %112 = math.tanh %111 : vector<1x32xf32>
    %113 = arith.mulf %108, %112 : vector<1x32xf32>
    %c0_67 = arith.constant 0 : index
    %c0_68 = arith.constant 0 : index
    %114 = vector.load %arg29[%c0_67, %c0_68] : memref<3x64xf32, #tpu.memory_space<vmem>>, vector<1x32xf32>
    tpu.vector_store %arg29[%c0_67, %c0_68], %113 {strides = array<i32>} : memref<3x64xf32, #tpu.memory_space<vmem>>, vector<1x32xf32>,
    %115 = vector.extract_strided_slice %79 {offsets = [1, 0], sizes = [1, 128], strides = [1, 1]} : vector<3x256xf32> to vector<1x128xf32>
    %cst_69 = arith.constant dense<0.000000e+00> : vector<1x128xf32>
    %116 = tpu.matmul %113, %81, %cst_69 {dimension_numbers = #tpu.dot_dimension_numbers<[1], [0], [0], [1], [0, 0, 1, 1], [], []>} : vector<1x32xf32>, vector<32x128xf32>, vector<1x128xf32> -> vector<1x128xf32>
    %117 = arith.addf %115, %116 : vector<1x128xf32>
    %118 = vector.extract_strided_slice %117 {offsets = [0, 0], sizes = [1, 32], strides = [1, 1]} : vector<1x128xf32> to vector<1x32xf32>
    %119 = arith.negf %118 : vector<1x32xf32>
    %120 = math.exp %119 : vector<1x32xf32>
    %cst_70 = arith.constant 1.000000e+00 : f32
    %121 = vector.broadcast %cst_70 : f32 to vector<1x32xf32>
    %122 = arith.addf %121, %120 : vector<1x32xf32>
    %123 = arith.divf %121, %122 : vector<1x32xf32>
    %124 = vector.extract_strided_slice %117 {offsets = [0, 32], sizes = [1, 32], strides = [1, 1]} : vector<1x128xf32> to vector<1x32xf32>
    %125 = arith.negf %124 : vector<1x32xf32>
    %126 = math.exp %125 : vector<1x32xf32>
    %cst_71 = arith.constant 1.000000e+00 : f32
    %127 = vector.broadcast %cst_71 : f32 to vector<1x32xf32>
    %128 = arith.addf %127, %126 : vector<1x32xf32>
    %129 = arith.divf %127, %128 : vector<1x32xf32>
    %130 = vector.extract_strided_slice %117 {offsets = [0, 64], sizes = [1, 32], strides = [1, 1]} : vector<1x128xf32> to vector<1x32xf32>
    %131 = math.tanh %130 : vector<1x32xf32>
    %132 = vector.extract_strided_slice %117 {offsets = [0, 96], sizes = [1, 32], strides = [1, 1]} : vector<1x128xf32> to vector<1x32xf32>
    %133 = arith.negf %132 : vector<1x32xf32>
    %134 = math.exp %133 : vector<1x32xf32>
    %cst_72 = arith.constant 1.000000e+00 : f32
    %135 = vector.broadcast %cst_72 : f32 to vector<1x32xf32>
    %136 = arith.addf %135, %134 : vector<1x32xf32>
    %137 = arith.divf %135, %136 : vector<1x32xf32>
    %138 = arith.mulf %129, %111 : vector<1x32xf32>
    %139 = arith.mulf %123, %131 : vector<1x32xf32>
    %140 = arith.addf %138, %139 : vector<1x32xf32>
    %141 = math.tanh %140 : vector<1x32xf32>
    %142 = arith.mulf %137, %141 : vector<1x32xf32>
    %c1 = arith.constant 1 : index
    %c0_73 = arith.constant 0 : index
    %143 = vector.load %arg29[%c1, %c0_73] : memref<3x64xf32, #tpu.memory_space<vmem>>, vector<1x32xf32>
    tpu.vector_store %arg29[%c1, %c0_73], %142 {strides = array<i32>} : memref<3x64xf32, #tpu.memory_space<vmem>>, vector<1x32xf32>,
    %144 = vector.extract_strided_slice %79 {offsets = [2, 0], sizes = [1, 128], strides = [1, 1]} : vector<3x256xf32> to vector<1x128xf32>
    %cst_74 = arith.constant dense<0.000000e+00> : vector<1x128xf32>
    %145 = tpu.matmul %142, %81, %cst_74 {dimension_numbers = #tpu.dot_dimension_numbers<[1], [0], [0], [1], [0, 0, 1, 1], [], []>} : vector<1x32xf32>, vector<32x128xf32>, vector<1x128xf32> -> vector<1x128xf32>
    %146 = arith.addf %144, %145 : vector<1x128xf32>
    %147 = vector.extract_strided_slice %146 {offsets = [0, 0], sizes = [1, 32], strides = [1, 1]} : vector<1x128xf32> to vector<1x32xf32>
    %148 = arith.negf %147 : vector<1x32xf32>
    %149 = math.exp %148 : vector<1x32xf32>
    %cst_75 = arith.constant 1.000000e+00 : f32
    %150 = vector.broadcast %cst_75 : f32 to vector<1x32xf32>
    %151 = arith.addf %150, %149 : vector<1x32xf32>
    %152 = arith.divf %150, %151 : vector<1x32xf32>
    %153 = vector.extract_strided_slice %146 {offsets = [0, 32], sizes = [1, 32], strides = [1, 1]} : vector<1x128xf32> to vector<1x32xf32>
    %154 = arith.negf %153 : vector<1x32xf32>
    %155 = math.exp %154 : vector<1x32xf32>
    %cst_76 = arith.constant 1.000000e+00 : f32
    %156 = vector.broadcast %cst_76 : f32 to vector<1x32xf32>
    %157 = arith.addf %156, %155 : vector<1x32xf32>
    %158 = arith.divf %156, %157 : vector<1x32xf32>
    %159 = vector.extract_strided_slice %146 {offsets = [0, 64], sizes = [1, 32], strides = [1, 1]} : vector<1x128xf32> to vector<1x32xf32>
    %160 = math.tanh %159 : vector<1x32xf32>
    %161 = vector.extract_strided_slice %146 {offsets = [0, 96], sizes = [1, 32], strides = [1, 1]} : vector<1x128xf32> to vector<1x32xf32>
    %162 = arith.negf %161 : vector<1x32xf32>
    %163 = math.exp %162 : vector<1x32xf32>
    %cst_77 = arith.constant 1.000000e+00 : f32
    %164 = vector.broadcast %cst_77 : f32 to vector<1x32xf32>
    %165 = arith.addf %164, %163 : vector<1x32xf32>
    %166 = arith.divf %164, %165 : vector<1x32xf32>
    %167 = arith.mulf %158, %140 : vector<1x32xf32>
    %168 = arith.mulf %152, %160 : vector<1x32xf32>
    %169 = arith.addf %167, %168 : vector<1x32xf32>
    %170 = math.tanh %169 : vector<1x32xf32>
    %171 = arith.mulf %166, %170 : vector<1x32xf32>
    %c2 = arith.constant 2 : index
    %c0_78 = arith.constant 0 : index
    %172 = vector.load %arg29[%c2, %c0_78] : memref<3x64xf32, #tpu.memory_space<vmem>>, vector<1x32xf32>
    tpu.vector_store %arg29[%c2, %c0_78], %171 {strides = array<i32>} : memref<3x64xf32, #tpu.memory_space<vmem>>, vector<1x32xf32>,
    %cst_79 = arith.constant 0.000000e+00 : f32
    %173 = vector.broadcast %cst_79 : f32 to vector<1x32xf32>
    %cst_80 = arith.constant 0.000000e+00 : f32
    %174 = vector.broadcast %cst_80 : f32 to vector<1x32xf32>
    %175 = vector.extract_strided_slice %79 {offsets = [2, 128], sizes = [1, 128], strides = [1, 1]} : vector<3x256xf32> to vector<1x128xf32>
    %cst_81 = arith.constant dense<0.000000e+00> : vector<1x128xf32>
    %176 = tpu.matmul %173, %83, %cst_81 {dimension_numbers = #tpu.dot_dimension_numbers<[1], [0], [0], [1], [0, 0, 1, 1], [], []>} : vector<1x32xf32>, vector<32x128xf32>, vector<1x128xf32> -> vector<1x128xf32>
    %177 = arith.addf %175, %176 : vector<1x128xf32>
    %178 = vector.extract_strided_slice %177 {offsets = [0, 0], sizes = [1, 32], strides = [1, 1]} : vector<1x128xf32> to vector<1x32xf32>
    %179 = arith.negf %178 : vector<1x32xf32>
    %180 = math.exp %179 : vector<1x32xf32>
    %cst_82 = arith.constant 1.000000e+00 : f32
    %181 = vector.broadcast %cst_82 : f32 to vector<1x32xf32>
    %182 = arith.addf %181, %180 : vector<1x32xf32>
    %183 = arith.divf %181, %182 : vector<1x32xf32>
    %184 = vector.extract_strided_slice %177 {offsets = [0, 32], sizes = [1, 32], strides = [1, 1]} : vector<1x128xf32> to vector<1x32xf32>
    %185 = arith.negf %184 : vector<1x32xf32>
    %186 = math.exp %185 : vector<1x32xf32>
    %cst_83 = arith.constant 1.000000e+00 : f32
    %187 = vector.broadcast %cst_83 : f32 to vector<1x32xf32>
    %188 = arith.addf %187, %186 : vector<1x32xf32>
    %189 = arith.divf %187, %188 : vector<1x32xf32>
    %190 = vector.extract_strided_slice %177 {offsets = [0, 64], sizes = [1, 32], strides = [1, 1]} : vector<1x128xf32> to vector<1x32xf32>
    %191 = math.tanh %190 : vector<1x32xf32>
    %192 = vector.extract_strided_slice %177 {offsets = [0, 96], sizes = [1, 32], strides = [1, 1]} : vector<1x128xf32> to vector<1x32xf32>
    %193 = arith.negf %192 : vector<1x32xf32>
    %194 = math.exp %193 : vector<1x32xf32>
    %cst_84 = arith.constant 1.000000e+00 : f32
    %195 = vector.broadcast %cst_84 : f32 to vector<1x32xf32>
    %196 = arith.addf %195, %194 : vector<1x32xf32>
    %197 = arith.divf %195, %196 : vector<1x32xf32>
    %198 = arith.mulf %189, %174 : vector<1x32xf32>
    %199 = arith.mulf %183, %191 : vector<1x32xf32>
    %200 = arith.addf %198, %199 : vector<1x32xf32>
    %201 = math.tanh %200 : vector<1x32xf32>
    %202 = arith.mulf %197, %201 : vector<1x32xf32>
    %c2_85 = arith.constant 2 : index
    %c32 = arith.constant 32 : index
    %203 = vector.load %arg29[%c2_85, %c32] : memref<3x64xf32, #tpu.memory_space<vmem>>, vector<1x32xf32>
    tpu.vector_store %arg29[%c2_85, %c32], %202 {strides = array<i32>} : memref<3x64xf32, #tpu.memory_space<vmem>>, vector<1x32xf32>,
    %204 = vector.extract_strided_slice %79 {offsets = [1, 128], sizes = [1, 128], strides = [1, 1]} : vector<3x256xf32> to vector<1x128xf32>
    %cst_86 = arith.constant dense<0.000000e+00> : vector<1x128xf32>
    %205 = tpu.matmul %202, %83, %cst_86 {dimension_numbers = #tpu.dot_dimension_numbers<[1], [0], [0], [1], [0, 0, 1, 1], [], []>} : vector<1x32xf32>, vector<32x128xf32>, vector<1x128xf32> -> vector<1x128xf32>
    %206 = arith.addf %204, %205 : vector<1x128xf32>
    %207 = vector.extract_strided_slice %206 {offsets = [0, 0], sizes = [1, 32], strides = [1, 1]} : vector<1x128xf32> to vector<1x32xf32>
    %208 = arith.negf %207 : vector<1x32xf32>
    %209 = math.exp %208 : vector<1x32xf32>
    %cst_87 = arith.constant 1.000000e+00 : f32
    %210 = vector.broadcast %cst_87 : f32 to vector<1x32xf32>
    %211 = arith.addf %210, %209 : vector<1x32xf32>
    %212 = arith.divf %210, %211 : vector<1x32xf32>
    %213 = vector.extract_strided_slice %206 {offsets = [0, 32], sizes = [1, 32], strides = [1, 1]} : vector<1x128xf32> to vector<1x32xf32>
    %214 = arith.negf %213 : vector<1x32xf32>
    %215 = math.exp %214 : vector<1x32xf32>
    %cst_88 = arith.constant 1.000000e+00 : f32
    %216 = vector.broadcast %cst_88 : f32 to vector<1x32xf32>
    %217 = arith.addf %216, %215 : vector<1x32xf32>
    %218 = arith.divf %216, %217 : vector<1x32xf32>
    %219 = vector.extract_strided_slice %206 {offsets = [0, 64], sizes = [1, 32], strides = [1, 1]} : vector<1x128xf32> to vector<1x32xf32>
    %220 = math.tanh %219 : vector<1x32xf32>
    %221 = vector.extract_strided_slice %206 {offsets = [0, 96], sizes = [1, 32], strides = [1, 1]} : vector<1x128xf32> to vector<1x32xf32>
    %222 = arith.negf %221 : vector<1x32xf32>
    %223 = math.exp %222 : vector<1x32xf32>
    %cst_89 = arith.constant 1.000000e+00 : f32
    %224 = vector.broadcast %cst_89 : f32 to vector<1x32xf32>
    %225 = arith.addf %224, %223 : vector<1x32xf32>
    %226 = arith.divf %224, %225 : vector<1x32xf32>
    %227 = arith.mulf %218, %200 : vector<1x32xf32>
    %228 = arith.mulf %212, %220 : vector<1x32xf32>
    %229 = arith.addf %227, %228 : vector<1x32xf32>
    %230 = math.tanh %229 : vector<1x32xf32>
    %231 = arith.mulf %226, %230 : vector<1x32xf32>
    %c1_90 = arith.constant 1 : index
    %c32_91 = arith.constant 32 : index
    %232 = vector.load %arg29[%c1_90, %c32_91] : memref<3x64xf32, #tpu.memory_space<vmem>>, vector<1x32xf32>
    tpu.vector_store %arg29[%c1_90, %c32_91], %231 {strides = array<i32>} : memref<3x64xf32, #tpu.memory_space<vmem>>, vector<1x32xf32>,
    %233 = vector.extract_strided_slice %79 {offsets = [0, 128], sizes = [1, 128], strides = [1, 1]} : vector<3x256xf32> to vector<1x128xf32>
    %cst_92 = arith.constant dense<0.000000e+00> : vector<1x128xf32>
    %234 = tpu.matmul %231, %83, %cst_92 {dimension_numbers = #tpu.dot_dimension_numbers<[1], [0], [0], [1], [0, 0, 1, 1], [], []>} : vector<1x32xf32>, vector<32x128xf32>, vector<1x128xf32> -> vector<1x128xf32>
    %235 = arith.addf %233, %234 : vector<1x128xf32>
    %236 = vector.extract_strided_slice %235 {offsets = [0, 0], sizes = [1, 32], strides = [1, 1]} : vector<1x128xf32> to vector<1x32xf32>
    %237 = arith.negf %236 : vector<1x32xf32>
    %238 = math.exp %237 : vector<1x32xf32>
    %cst_93 = arith.constant 1.000000e+00 : f32
    %239 = vector.broadcast %cst_93 : f32 to vector<1x32xf32>
    %240 = arith.addf %239, %238 : vector<1x32xf32>
    %241 = arith.divf %239, %240 : vector<1x32xf32>
    %242 = vector.extract_strided_slice %235 {offsets = [0, 32], sizes = [1, 32], strides = [1, 1]} : vector<1x128xf32> to vector<1x32xf32>
    %243 = arith.negf %242 : vector<1x32xf32>
    %244 = math.exp %243 : vector<1x32xf32>
    %cst_94 = arith.constant 1.000000e+00 : f32
    %245 = vector.broadcast %cst_94 : f32 to vector<1x32xf32>
    %246 = arith.addf %245, %244 : vector<1x32xf32>
    %247 = arith.divf %245, %246 : vector<1x32xf32>
    %248 = vector.extract_strided_slice %235 {offsets = [0, 64], sizes = [1, 32], strides = [1, 1]} : vector<1x128xf32> to vector<1x32xf32>
    %249 = math.tanh %248 : vector<1x32xf32>
    %250 = vector.extract_strided_slice %235 {offsets = [0, 96], sizes = [1, 32], strides = [1, 1]} : vector<1x128xf32> to vector<1x32xf32>
    %251 = arith.negf %250 : vector<1x32xf32>
    %252 = math.exp %251 : vector<1x32xf32>
    %cst_95 = arith.constant 1.000000e+00 : f32
    %253 = vector.broadcast %cst_95 : f32 to vector<1x32xf32>
    %254 = arith.addf %253, %252 : vector<1x32xf32>
    %255 = arith.divf %253, %254 : vector<1x32xf32>
    %256 = arith.mulf %247, %229 : vector<1x32xf32>
    %257 = arith.mulf %241, %249 : vector<1x32xf32>
    %258 = arith.addf %256, %257 : vector<1x32xf32>
    %259 = math.tanh %258 : vector<1x32xf32>
    %260 = arith.mulf %255, %259 : vector<1x32xf32>
    %c0_96 = arith.constant 0 : index
    %c32_97 = arith.constant 32 : index
    %261 = vector.load %arg29[%c0_96, %c32_97] : memref<3x64xf32, #tpu.memory_space<vmem>>, vector<1x32xf32>
    tpu.vector_store %arg29[%c0_96, %c32_97], %260 {strides = array<i32>} : memref<3x64xf32, #tpu.memory_space<vmem>>, vector<1x32xf32>,
    %c0_98 = arith.constant 0 : index
    %c0_99 = arith.constant 0 : index
    %262 = vector.load %arg29[%c0_98, %c0_99] : memref<3x64xf32, #tpu.memory_space<vmem>>, vector<3x64xf32>
    %c1_100 = arith.constant 1 : index
    %c0_101 = arith.constant 0 : index
    %c0_102 = arith.constant 0 : index
    %263 = vector.load %arg17[%c1_100, %c0_101, %c0_102] : memref<2x64x256xf32, #tpu.memory_space<vmem>>, vector<1x64x256xf32>
    %264 = vector.shape_cast %263 : vector<1x64x256xf32> to vector<64x256xf32>
    %cst_103 = arith.constant dense<0.000000e+00> : vector<3x256xf32>
    %265 = tpu.matmul %262, %264, %cst_103 {dimension_numbers = #tpu.dot_dimension_numbers<[1], [0], [0], [1], [0, 0, 1, 1], [], []>} : vector<3x64xf32>, vector<64x256xf32>, vector<3x256xf32> -> vector<3x256xf32>
    %c1_104 = arith.constant 1 : index
    %c0_105 = arith.constant 0 : index
    %c0_106 = arith.constant 0 : index
    %266 = vector.load %arg20[%c1_104, %c0_105, %c0_106] : memref<2x1x256xf32, #tpu.memory_space<vmem>>, vector<1x1x256xf32>
    %267 = vector.shape_cast %266 : vector<1x1x256xf32> to vector<1x256xf32>
    %268 = vector.broadcast %267 : vector<1x256xf32> to vector<3x256xf32>
    %269 = arith.addf %265, %268 : vector<3x256xf32>
    %c1_107 = arith.constant 1 : index
    %c0_108 = arith.constant 0 : index
    %c0_109 = arith.constant 0 : index
    %270 = vector.load %arg18[%c1_107, %c0_108, %c0_109] : memref<2x32x128xf32, #tpu.memory_space<vmem>>, vector<1x32x128xf32>
    %271 = vector.shape_cast %270 : vector<1x32x128xf32> to vector<32x128xf32>
    %c1_110 = arith.constant 1 : index
    %c0_111 = arith.constant 0 : index
    %c0_112 = arith.constant 0 : index
    %272 = vector.load %arg19[%c1_110, %c0_111, %c0_112] : memref<2x32x128xf32, #tpu.memory_space<vmem>>, vector<1x32x128xf32>
    %273 = vector.shape_cast %272 : vector<1x32x128xf32> to vector<32x128xf32>
    %cst_113 = arith.constant 0.000000e+00 : f32
    %274 = vector.broadcast %cst_113 : f32 to vector<1x32xf32>
    %cst_114 = arith.constant 0.000000e+00 : f32
    %275 = vector.broadcast %cst_114 : f32 to vector<1x32xf32>
    %276 = vector.extract_strided_slice %269 {offsets = [0, 0], sizes = [1, 128], strides = [1, 1]} : vector<3x256xf32> to vector<1x128xf32>
    %cst_115 = arith.constant dense<0.000000e+00> : vector<1x128xf32>
    %277 = tpu.matmul %274, %271, %cst_115 {dimension_numbers = #tpu.dot_dimension_numbers<[1], [0], [0], [1], [0, 0, 1, 1], [], []>} : vector<1x32xf32>, vector<32x128xf32>, vector<1x128xf32> -> vector<1x128xf32>
    %278 = arith.addf %276, %277 : vector<1x128xf32>
    %279 = vector.extract_strided_slice %278 {offsets = [0, 0], sizes = [1, 32], strides = [1, 1]} : vector<1x128xf32> to vector<1x32xf32>
    %280 = arith.negf %279 : vector<1x32xf32>
    %281 = math.exp %280 : vector<1x32xf32>
    %cst_116 = arith.constant 1.000000e+00 : f32
    %282 = vector.broadcast %cst_116 : f32 to vector<1x32xf32>
    %283 = arith.addf %282, %281 : vector<1x32xf32>
    %284 = arith.divf %282, %283 : vector<1x32xf32>
    %285 = vector.extract_strided_slice %278 {offsets = [0, 32], sizes = [1, 32], strides = [1, 1]} : vector<1x128xf32> to vector<1x32xf32>
    %286 = arith.negf %285 : vector<1x32xf32>
    %287 = math.exp %286 : vector<1x32xf32>
    %cst_117 = arith.constant 1.000000e+00 : f32
    %288 = vector.broadcast %cst_117 : f32 to vector<1x32xf32>
    %289 = arith.addf %288, %287 : vector<1x32xf32>
    %290 = arith.divf %288, %289 : vector<1x32xf32>
    %291 = vector.extract_strided_slice %278 {offsets = [0, 64], sizes = [1, 32], strides = [1, 1]} : vector<1x128xf32> to vector<1x32xf32>
    %292 = math.tanh %291 : vector<1x32xf32>
    %293 = vector.extract_strided_slice %278 {offsets = [0, 96], sizes = [1, 32], strides = [1, 1]} : vector<1x128xf32> to vector<1x32xf32>
    %294 = arith.negf %293 : vector<1x32xf32>
    %295 = math.exp %294 : vector<1x32xf32>
    %cst_118 = arith.constant 1.000000e+00 : f32
    %296 = vector.broadcast %cst_118 : f32 to vector<1x32xf32>
    %297 = arith.addf %296, %295 : vector<1x32xf32>
    %298 = arith.divf %296, %297 : vector<1x32xf32>
    %299 = arith.mulf %290, %275 : vector<1x32xf32>
    %300 = arith.mulf %284, %292 : vector<1x32xf32>
    %301 = arith.addf %299, %300 : vector<1x32xf32>
    %302 = math.tanh %301 : vector<1x32xf32>
    %303 = arith.mulf %298, %302 : vector<1x32xf32>
    %c0_119 = arith.constant 0 : index
    %c0_120 = arith.constant 0 : index
    %304 = vector.load %arg29[%c0_119, %c0_120] : memref<3x64xf32, #tpu.memory_space<vmem>>, vector<1x32xf32>
    tpu.vector_store %arg29[%c0_119, %c0_120], %303 {strides = array<i32>} : memref<3x64xf32, #tpu.memory_space<vmem>>, vector<1x32xf32>,
    %305 = vector.extract_strided_slice %269 {offsets = [1, 0], sizes = [1, 128], strides = [1, 1]} : vector<3x256xf32> to vector<1x128xf32>
    %cst_121 = arith.constant dense<0.000000e+00> : vector<1x128xf32>
    %306 = tpu.matmul %303, %271, %cst_121 {dimension_numbers = #tpu.dot_dimension_numbers<[1], [0], [0], [1], [0, 0, 1, 1], [], []>} : vector<1x32xf32>, vector<32x128xf32>, vector<1x128xf32> -> vector<1x128xf32>
    %307 = arith.addf %305, %306 : vector<1x128xf32>
    %308 = vector.extract_strided_slice %307 {offsets = [0, 0], sizes = [1, 32], strides = [1, 1]} : vector<1x128xf32> to vector<1x32xf32>
    %309 = arith.negf %308 : vector<1x32xf32>
    %310 = math.exp %309 : vector<1x32xf32>
    %cst_122 = arith.constant 1.000000e+00 : f32
    %311 = vector.broadcast %cst_122 : f32 to vector<1x32xf32>
    %312 = arith.addf %311, %310 : vector<1x32xf32>
    %313 = arith.divf %311, %312 : vector<1x32xf32>
    %314 = vector.extract_strided_slice %307 {offsets = [0, 32], sizes = [1, 32], strides = [1, 1]} : vector<1x128xf32> to vector<1x32xf32>
    %315 = arith.negf %314 : vector<1x32xf32>
    %316 = math.exp %315 : vector<1x32xf32>
    %cst_123 = arith.constant 1.000000e+00 : f32
    %317 = vector.broadcast %cst_123 : f32 to vector<1x32xf32>
    %318 = arith.addf %317, %316 : vector<1x32xf32>
    %319 = arith.divf %317, %318 : vector<1x32xf32>
    %320 = vector.extract_strided_slice %307 {offsets = [0, 64], sizes = [1, 32], strides = [1, 1]} : vector<1x128xf32> to vector<1x32xf32>
    %321 = math.tanh %320 : vector<1x32xf32>
    %322 = vector.extract_strided_slice %307 {offsets = [0, 96], sizes = [1, 32], strides = [1, 1]} : vector<1x128xf32> to vector<1x32xf32>
    %323 = arith.negf %322 : vector<1x32xf32>
    %324 = math.exp %323 : vector<1x32xf32>
    %cst_124 = arith.constant 1.000000e+00 : f32
    %325 = vector.broadcast %cst_124 : f32 to vector<1x32xf32>
    %326 = arith.addf %325, %324 : vector<1x32xf32>
    %327 = arith.divf %325, %326 : vector<1x32xf32>
    %328 = arith.mulf %319, %301 : vector<1x32xf32>
    %329 = arith.mulf %313, %321 : vector<1x32xf32>
    %330 = arith.addf %328, %329 : vector<1x32xf32>
    %331 = math.tanh %330 : vector<1x32xf32>
    %332 = arith.mulf %327, %331 : vector<1x32xf32>
    %c1_125 = arith.constant 1 : index
    %c0_126 = arith.constant 0 : index
    %333 = vector.load %arg29[%c1_125, %c0_126] : memref<3x64xf32, #tpu.memory_space<vmem>>, vector<1x32xf32>
    tpu.vector_store %arg29[%c1_125, %c0_126], %332 {strides = array<i32>} : memref<3x64xf32, #tpu.memory_space<vmem>>, vector<1x32xf32>,
    %334 = vector.extract_strided_slice %269 {offsets = [2, 0], sizes = [1, 128], strides = [1, 1]} : vector<3x256xf32> to vector<1x128xf32>
    %cst_127 = arith.constant dense<0.000000e+00> : vector<1x128xf32>
    %335 = tpu.matmul %332, %271, %cst_127 {dimension_numbers = #tpu.dot_dimension_numbers<[1], [0], [0], [1], [0, 0, 1, 1], [], []>} : vector<1x32xf32>, vector<32x128xf32>, vector<1x128xf32> -> vector<1x128xf32>
    %336 = arith.addf %334, %335 : vector<1x128xf32>
    %337 = vector.extract_strided_slice %336 {offsets = [0, 0], sizes = [1, 32], strides = [1, 1]} : vector<1x128xf32> to vector<1x32xf32>
    %338 = arith.negf %337 : vector<1x32xf32>
    %339 = math.exp %338 : vector<1x32xf32>
    %cst_128 = arith.constant 1.000000e+00 : f32
    %340 = vector.broadcast %cst_128 : f32 to vector<1x32xf32>
    %341 = arith.addf %340, %339 : vector<1x32xf32>
    %342 = arith.divf %340, %341 : vector<1x32xf32>
    %343 = vector.extract_strided_slice %336 {offsets = [0, 32], sizes = [1, 32], strides = [1, 1]} : vector<1x128xf32> to vector<1x32xf32>
    %344 = arith.negf %343 : vector<1x32xf32>
    %345 = math.exp %344 : vector<1x32xf32>
    %cst_129 = arith.constant 1.000000e+00 : f32
    %346 = vector.broadcast %cst_129 : f32 to vector<1x32xf32>
    %347 = arith.addf %346, %345 : vector<1x32xf32>
    %348 = arith.divf %346, %347 : vector<1x32xf32>
    %349 = vector.extract_strided_slice %336 {offsets = [0, 64], sizes = [1, 32], strides = [1, 1]} : vector<1x128xf32> to vector<1x32xf32>
    %350 = math.tanh %349 : vector<1x32xf32>
    %351 = vector.extract_strided_slice %336 {offsets = [0, 96], sizes = [1, 32], strides = [1, 1]} : vector<1x128xf32> to vector<1x32xf32>
    %352 = arith.negf %351 : vector<1x32xf32>
    %353 = math.exp %352 : vector<1x32xf32>
    %cst_130 = arith.constant 1.000000e+00 : f32
    %354 = vector.broadcast %cst_130 : f32 to vector<1x32xf32>
    %355 = arith.addf %354, %353 : vector<1x32xf32>
    %356 = arith.divf %354, %355 : vector<1x32xf32>
    %357 = arith.mulf %348, %330 : vector<1x32xf32>
    %358 = arith.mulf %342, %350 : vector<1x32xf32>
    %359 = arith.addf %357, %358 : vector<1x32xf32>
    %360 = math.tanh %359 : vector<1x32xf32>
    %361 = arith.mulf %356, %360 : vector<1x32xf32>
    %c2_131 = arith.constant 2 : index
    %c0_132 = arith.constant 0 : index
    %362 = vector.load %arg29[%c2_131, %c0_132] : memref<3x64xf32, #tpu.memory_space<vmem>>, vector<1x32xf32>
    tpu.vector_store %arg29[%c2_131, %c0_132], %361 {strides = array<i32>} : memref<3x64xf32, #tpu.memory_space<vmem>>, vector<1x32xf32>,
    %cst_133 = arith.constant 0.000000e+00 : f32
    %363 = vector.broadcast %cst_133 : f32 to vector<1x32xf32>
    %cst_134 = arith.constant 0.000000e+00 : f32
    %364 = vector.broadcast %cst_134 : f32 to vector<1x32xf32>
    %365 = vector.extract_strided_slice %269 {offsets = [2, 128], sizes = [1, 128], strides = [1, 1]} : vector<3x256xf32> to vector<1x128xf32>
    %cst_135 = arith.constant dense<0.000000e+00> : vector<1x128xf32>
    %366 = tpu.matmul %363, %273, %cst_135 {dimension_numbers = #tpu.dot_dimension_numbers<[1], [0], [0], [1], [0, 0, 1, 1], [], []>} : vector<1x32xf32>, vector<32x128xf32>, vector<1x128xf32> -> vector<1x128xf32>
    %367 = arith.addf %365, %366 : vector<1x128xf32>
    %368 = vector.extract_strided_slice %367 {offsets = [0, 0], sizes = [1, 32], strides = [1, 1]} : vector<1x128xf32> to vector<1x32xf32>
    %369 = arith.negf %368 : vector<1x32xf32>
    %370 = math.exp %369 : vector<1x32xf32>
    %cst_136 = arith.constant 1.000000e+00 : f32
    %371 = vector.broadcast %cst_136 : f32 to vector<1x32xf32>
    %372 = arith.addf %371, %370 : vector<1x32xf32>
    %373 = arith.divf %371, %372 : vector<1x32xf32>
    %374 = vector.extract_strided_slice %367 {offsets = [0, 32], sizes = [1, 32], strides = [1, 1]} : vector<1x128xf32> to vector<1x32xf32>
    %375 = arith.negf %374 : vector<1x32xf32>
    %376 = math.exp %375 : vector<1x32xf32>
    %cst_137 = arith.constant 1.000000e+00 : f32
    %377 = vector.broadcast %cst_137 : f32 to vector<1x32xf32>
    %378 = arith.addf %377, %376 : vector<1x32xf32>
    %379 = arith.divf %377, %378 : vector<1x32xf32>
    %380 = vector.extract_strided_slice %367 {offsets = [0, 64], sizes = [1, 32], strides = [1, 1]} : vector<1x128xf32> to vector<1x32xf32>
    %381 = math.tanh %380 : vector<1x32xf32>
    %382 = vector.extract_strided_slice %367 {offsets = [0, 96], sizes = [1, 32], strides = [1, 1]} : vector<1x128xf32> to vector<1x32xf32>
    %383 = arith.negf %382 : vector<1x32xf32>
    %384 = math.exp %383 : vector<1x32xf32>
    %cst_138 = arith.constant 1.000000e+00 : f32
    %385 = vector.broadcast %cst_138 : f32 to vector<1x32xf32>
    %386 = arith.addf %385, %384 : vector<1x32xf32>
    %387 = arith.divf %385, %386 : vector<1x32xf32>
    %388 = arith.mulf %379, %364 : vector<1x32xf32>
    %389 = arith.mulf %373, %381 : vector<1x32xf32>
    %390 = arith.addf %388, %389 : vector<1x32xf32>
    %391 = math.tanh %390 : vector<1x32xf32>
    %392 = arith.mulf %387, %391 : vector<1x32xf32>
    %c2_139 = arith.constant 2 : index
    %c32_140 = arith.constant 32 : index
    %393 = vector.load %arg29[%c2_139, %c32_140] : memref<3x64xf32, #tpu.memory_space<vmem>>, vector<1x32xf32>
    tpu.vector_store %arg29[%c2_139, %c32_140], %392 {strides = array<i32>} : memref<3x64xf32, #tpu.memory_space<vmem>>, vector<1x32xf32>,
    %394 = vector.extract_strided_slice %269 {offsets = [1, 128], sizes = [1, 128], strides = [1, 1]} : vector<3x256xf32> to vector<1x128xf32>
    %cst_141 = arith.constant dense<0.000000e+00> : vector<1x128xf32>
    %395 = tpu.matmul %392, %273, %cst_141 {dimension_numbers = #tpu.dot_dimension_numbers<[1], [0], [0], [1], [0, 0, 1, 1], [], []>} : vector<1x32xf32>, vector<32x128xf32>, vector<1x128xf32> -> vector<1x128xf32>
    %396 = arith.addf %394, %395 : vector<1x128xf32>
    %397 = vector.extract_strided_slice %396 {offsets = [0, 0], sizes = [1, 32], strides = [1, 1]} : vector<1x128xf32> to vector<1x32xf32>
    %398 = arith.negf %397 : vector<1x32xf32>
    %399 = math.exp %398 : vector<1x32xf32>
    %cst_142 = arith.constant 1.000000e+00 : f32
    %400 = vector.broadcast %cst_142 : f32 to vector<1x32xf32>
    %401 = arith.addf %400, %399 : vector<1x32xf32>
    %402 = arith.divf %400, %401 : vector<1x32xf32>
    %403 = vector.extract_strided_slice %396 {offsets = [0, 32], sizes = [1, 32], strides = [1, 1]} : vector<1x128xf32> to vector<1x32xf32>
    %404 = arith.negf %403 : vector<1x32xf32>
    %405 = math.exp %404 : vector<1x32xf32>
    %cst_143 = arith.constant 1.000000e+00 : f32
    %406 = vector.broadcast %cst_143 : f32 to vector<1x32xf32>
    %407 = arith.addf %406, %405 : vector<1x32xf32>
    %408 = arith.divf %406, %407 : vector<1x32xf32>
    %409 = vector.extract_strided_slice %396 {offsets = [0, 64], sizes = [1, 32], strides = [1, 1]} : vector<1x128xf32> to vector<1x32xf32>
    %410 = math.tanh %409 : vector<1x32xf32>
    %411 = vector.extract_strided_slice %396 {offsets = [0, 96], sizes = [1, 32], strides = [1, 1]} : vector<1x128xf32> to vector<1x32xf32>
    %412 = arith.negf %411 : vector<1x32xf32>
    %413 = math.exp %412 : vector<1x32xf32>
    %cst_144 = arith.constant 1.000000e+00 : f32
    %414 = vector.broadcast %cst_144 : f32 to vector<1x32xf32>
    %415 = arith.addf %414, %413 : vector<1x32xf32>
    %416 = arith.divf %414, %415 : vector<1x32xf32>
    %417 = arith.mulf %408, %390 : vector<1x32xf32>
    %418 = arith.mulf %402, %410 : vector<1x32xf32>
    %419 = arith.addf %417, %418 : vector<1x32xf32>
    %420 = math.tanh %419 : vector<1x32xf32>
    %421 = arith.mulf %416, %420 : vector<1x32xf32>
    %c1_145 = arith.constant 1 : index
    %c32_146 = arith.constant 32 : index
    %422 = vector.load %arg29[%c1_145, %c32_146] : memref<3x64xf32, #tpu.memory_space<vmem>>, vector<1x32xf32>
    tpu.vector_store %arg29[%c1_145, %c32_146], %421 {strides = array<i32>} : memref<3x64xf32, #tpu.memory_space<vmem>>, vector<1x32xf32>,
    %423 = vector.extract_strided_slice %269 {offsets = [0, 128], sizes = [1, 128], strides = [1, 1]} : vector<3x256xf32> to vector<1x128xf32>
    %cst_147 = arith.constant dense<0.000000e+00> : vector<1x128xf32>
    %424 = tpu.matmul %421, %273, %cst_147 {dimension_numbers = #tpu.dot_dimension_numbers<[1], [0], [0], [1], [0, 0, 1, 1], [], []>} : vector<1x32xf32>, vector<32x128xf32>, vector<1x128xf32> -> vector<1x128xf32>
    %425 = arith.addf %423, %424 : vector<1x128xf32>
    %426 = vector.extract_strided_slice %425 {offsets = [0, 0], sizes = [1, 32], strides = [1, 1]} : vector<1x128xf32> to vector<1x32xf32>
    %427 = arith.negf %426 : vector<1x32xf32>
    %428 = math.exp %427 : vector<1x32xf32>
    %cst_148 = arith.constant 1.000000e+00 : f32
    %429 = vector.broadcast %cst_148 : f32 to vector<1x32xf32>
    %430 = arith.addf %429, %428 : vector<1x32xf32>
    %431 = arith.divf %429, %430 : vector<1x32xf32>
    %432 = vector.extract_strided_slice %425 {offsets = [0, 32], sizes = [1, 32], strides = [1, 1]} : vector<1x128xf32> to vector<1x32xf32>
    %433 = arith.negf %432 : vector<1x32xf32>
    %434 = math.exp %433 : vector<1x32xf32>
    %cst_149 = arith.constant 1.000000e+00 : f32
    %435 = vector.broadcast %cst_149 : f32 to vector<1x32xf32>
    %436 = arith.addf %435, %434 : vector<1x32xf32>
    %437 = arith.divf %435, %436 : vector<1x32xf32>
    %438 = vector.extract_strided_slice %425 {offsets = [0, 64], sizes = [1, 32], strides = [1, 1]} : vector<1x128xf32> to vector<1x32xf32>
    %439 = math.tanh %438 : vector<1x32xf32>
    %440 = vector.extract_strided_slice %425 {offsets = [0, 96], sizes = [1, 32], strides = [1, 1]} : vector<1x128xf32> to vector<1x32xf32>
    %441 = arith.negf %440 : vector<1x32xf32>
    %442 = math.exp %441 : vector<1x32xf32>
    %cst_150 = arith.constant 1.000000e+00 : f32
    %443 = vector.broadcast %cst_150 : f32 to vector<1x32xf32>
    %444 = arith.addf %443, %442 : vector<1x32xf32>
    %445 = arith.divf %443, %444 : vector<1x32xf32>
    %446 = arith.mulf %437, %419 : vector<1x32xf32>
    %447 = arith.mulf %431, %439 : vector<1x32xf32>
    %448 = arith.addf %446, %447 : vector<1x32xf32>
    %449 = math.tanh %448 : vector<1x32xf32>
    %450 = arith.mulf %445, %449 : vector<1x32xf32>
    %c0_151 = arith.constant 0 : index
    %c32_152 = arith.constant 32 : index
    %451 = vector.load %arg29[%c0_151, %c32_152] : memref<3x64xf32, #tpu.memory_space<vmem>>, vector<1x32xf32>
    tpu.vector_store %arg29[%c0_151, %c32_152], %450 {strides = array<i32>} : memref<3x64xf32, #tpu.memory_space<vmem>>, vector<1x32xf32>,
    %c0_153 = arith.constant 0 : index
    %c0_154 = arith.constant 0 : index
    %452 = vector.load %arg29[%c0_153, %c0_154] : memref<3x64xf32, #tpu.memory_space<vmem>>, vector<3x64xf32>
    %cst_155 = arith.constant 1.000000e+00 : f32
    %453 = vector.broadcast %cst_155 : f32 to vector<3x1xf32>
    %cst_156 = arith.constant 1.000000e+00 : f32
    %454 = vector.broadcast %cst_156 : f32 to vector<1x3xf32>
    %cst_157 = arith.constant 1.000000e+00 : f32
    %455 = vector.broadcast %cst_157 : f32 to vector<1x3x1xf32>
    %c0_158 = arith.constant 0 : index
    %c0_159 = arith.constant 0 : index
    %456 = vector.load %arg13[%c0_158, %c0_159] : memref<64x64xf32, #tpu.memory_space<vmem>>, vector<64x64xf32>
    %cst_160 = arith.constant dense<0.000000e+00> : vector<3x64xf32>
    %457 = tpu.matmul %452, %456, %cst_160 {dimension_numbers = #tpu.dot_dimension_numbers<[1], [0], [0], [1], [0, 0, 1, 1], [], []>} : vector<3x64xf32>, vector<64x64xf32>, vector<3x64xf32> -> vector<3x64xf32>
    %c0_161 = arith.constant 0 : index
    %c0_162 = arith.constant 0 : index
    %458 = vector.load %arg14[%c0_161, %c0_162] : memref<1x64xf32, #tpu.memory_space<vmem>>, vector<1x64xf32>
    %459 = vector.broadcast %458 : vector<1x64xf32> to vector<3x64xf32>
    %460 = arith.addf %457, %459 : vector<3x64xf32>
    %461 = math.tanh %460 : vector<3x64xf32>
    %c0_163 = arith.constant 0 : index
    %c0_164 = arith.constant 0 : index
    %462 = vector.load %arg15[%c0_163, %c0_164] : memref<64x8xf32, #tpu.memory_space<vmem>>, vector<64x8xf32>
    %cst_165 = arith.constant dense<0.000000e+00> : vector<3x8xf32>
    %463 = tpu.matmul %461, %462, %cst_165 {dimension_numbers = #tpu.dot_dimension_numbers<[1], [0], [0], [1], [0, 0, 1, 1], [], []>} : vector<3x64xf32>, vector<64x8xf32>, vector<3x8xf32> -> vector<3x8xf32>
    %cst_166 = arith.constant 0.000000e+00 : f32
    %464 = vector.broadcast %cst_166 : f32 to vector<1x3x1xf32>
    %465 = arith.cmpf ogt, %455, %464 : vector<1x3x1xf32>
    %466 = vector.shape_cast %463 : vector<3x8xf32> to vector<1x3x8xf32>
    %cst_167 = arith.constant -1.000000e+30 : f32
    %467 = vector.shape_cast %465 : vector<1x3x1xi1> to vector<1x3x1xi1>
    %468 = vector.broadcast %467 : vector<1x3x1xi1> to vector<1x3x8xi1>
    %469 = vector.broadcast %cst_167 : f32 to vector<1x3x8xf32>
    %470 = arith.select %468, %466, %469 : vector<1x3x8xi1>, vector<1x3x8xf32>
    %cst_168 = arith.constant dense<0xFF800000> : vector<1x8xf32>
    %471 = vector.multi_reduction <maximumf>, %470, %cst_168 [1] : vector<1x3x8xf32> to vector<1x8xf32>
    %cst_169 = arith.constant dense<0.000000e+00> : vector<3x8xf32>
    %472 = tpu.matmul %453, %471, %cst_169 {dimension_numbers = #tpu.dot_dimension_numbers<[1], [0], [0], [1], [0, 0, 1, 1], [], []>} : vector<3x1xf32>, vector<1x8xf32>, vector<3x8xf32> -> vector<3x8xf32>
    %473 = arith.subf %463, %472 : vector<3x8xf32>
    %474 = math.exp %473 : vector<3x8xf32>
    %cst_170 = arith.constant dense<0.000000e+00> : vector<1x8xf32>
    %475 = tpu.matmul %454, %474, %cst_170 {dimension_numbers = #tpu.dot_dimension_numbers<[1], [0], [0], [1], [0, 0, 1, 1], [], []>} : vector<1x3xf32>, vector<3x8xf32>, vector<1x8xf32> -> vector<1x8xf32>
    %cst_171 = arith.constant dense<0.000000e+00> : vector<3x8xf32>
    %476 = tpu.matmul %453, %475, %cst_171 {dimension_numbers = #tpu.dot_dimension_numbers<[1], [0], [0], [1], [0, 0, 1, 1], [], []>} : vector<3x1xf32>, vector<1x8xf32>, vector<3x8xf32> -> vector<3x8xf32>
    %477 = arith.divf %474, %476 : vector<3x8xf32>
    %c0_172 = arith.constant 0 : index
    %c0_173 = arith.constant 0 : index
    %478 = vector.load %arg16[%c0_172, %c0_173] : memref<8x64xf32, #tpu.memory_space<vmem>>, vector<8x64xf32>
    %cst_174 = arith.constant dense<0.000000e+00> : vector<3x64xf32>
    %479 = tpu.matmul %477, %478, %cst_174 {dimension_numbers = #tpu.dot_dimension_numbers<[1], [0], [0], [1], [0, 0, 1, 1], [], []>} : vector<3x8xf32>, vector<8x64xf32>, vector<3x64xf32> -> vector<3x64xf32>
    %480 = arith.mulf %479, %452 : vector<3x64xf32>
    %cst_175 = arith.constant dense<0.000000e+00> : vector<1x64xf32>
    %481 = tpu.matmul %454, %480, %cst_175 {dimension_numbers = #tpu.dot_dimension_numbers<[1], [0], [0], [1], [0, 0, 1, 1], [], []>} : vector<1x3xf32>, vector<3x64xf32>, vector<1x64xf32> -> vector<1x64xf32>
    %c0_176 = arith.constant 0 : index
    %c0_177 = arith.constant 0 : index
    %482 = vector.load %arg21[%c0_176, %c0_177] : memref<64x32xf32, #tpu.memory_space<vmem>>, vector<64x32xf32>
    %cst_178 = arith.constant dense<0.000000e+00> : vector<1x32xf32>
    %483 = tpu.matmul %481, %482, %cst_178 {dimension_numbers = #tpu.dot_dimension_numbers<[1], [0], [0], [1], [0, 0, 1, 1], [], []>} : vector<1x64xf32>, vector<64x32xf32>, vector<1x32xf32> -> vector<1x32xf32>
    %c0_179 = arith.constant 0 : index
    %c0_180 = arith.constant 0 : index
    %484 = vector.load %arg22[%c0_179, %c0_180] : memref<1x32xf32, #tpu.memory_space<vmem>>, vector<1x32xf32>
    %485 = arith.addf %483, %484 : vector<1x32xf32>
    %486 = vector.extract_strided_slice %485 {offsets = [0, 0], sizes = [1, 16], strides = [1, 1]} : vector<1x32xf32> to vector<1x16xf32>
    %487 = vector.extract_strided_slice %485 {offsets = [0, 16], sizes = [1, 16], strides = [1, 1]} : vector<1x32xf32> to vector<1x16xf32>
    %cst_181 = arith.constant 5.000000e-01 : f32
    %488 = vector.broadcast %cst_181 : f32 to vector<1x16xf32>
    %489 = arith.mulf %488, %487 : vector<1x16xf32>
    %490 = math.exp %489 : vector<1x16xf32>
    %c0_182 = arith.constant 0 : index
    %c0_183 = arith.constant 0 : index
    %c0_184 = arith.constant 0 : index
    %491 = vector.load %arg26[%c0_182, %c0_183, %c0_184] : memref<1x1x16xf32, #tpu.memory_space<vmem>>, vector<1x1x16xf32>
    %492 = vector.shape_cast %491 : vector<1x1x16xf32> to vector<1x16xf32>
    %493 = vector.shape_cast %486 : vector<1x16xf32> to vector<1x1x16xf32>
    tpu.vector_store %arg26[%c0_182, %c0_183, %c0_184], %493 {strides = array<i32>} : memref<1x1x16xf32, #tpu.memory_space<vmem>>, vector<1x1x16xf32>,
    %c0_185 = arith.constant 0 : index
    %c0_186 = arith.constant 0 : index
    %c0_187 = arith.constant 0 : index
    %494 = vector.load %arg27[%c0_185, %c0_186, %c0_187] : memref<1x1x16xf32, #tpu.memory_space<vmem>>, vector<1x1x16xf32>
    %495 = vector.shape_cast %494 : vector<1x1x16xf32> to vector<1x16xf32>
    %496 = vector.shape_cast %487 : vector<1x16xf32> to vector<1x1x16xf32>
    tpu.vector_store %arg27[%c0_185, %c0_186, %c0_187], %496 {strides = array<i32>} : memref<1x1x16xf32, #tpu.memory_space<vmem>>, vector<1x1x16xf32>,
    %c0_188 = arith.constant 0 : index
    %c0_189 = arith.constant 0 : index
    %c0_190 = arith.constant 0 : index
    %497 = vector.load %arg23[%c0_188, %c0_189, %c0_190] : memref<1x1x16xf32, #tpu.memory_space<vmem>>, vector<1x1x16xf32>
    %498 = vector.shape_cast %497 : vector<1x1x16xf32> to vector<1x16xf32>
    %499 = arith.mulf %498, %490 : vector<1x16xf32>
    %500 = arith.addf %486, %499 : vector<1x16xf32>
    %c0_191 = arith.constant 0 : index
    %c0_192 = arith.constant 0 : index
    %c0_193 = arith.constant 0 : index
    %501 = vector.load %arg25[%c0_191, %c0_192, %c0_193] : memref<1x1x16xf32, #tpu.memory_space<vmem>>, vector<1x1x16xf32>
    %502 = vector.shape_cast %501 : vector<1x1x16xf32> to vector<1x16xf32>
    %503 = vector.shape_cast %500 : vector<1x16xf32> to vector<1x1x16xf32>
    tpu.vector_store %arg25[%c0_191, %c0_192, %c0_193], %503 {strides = array<i32>} : memref<1x1x16xf32, #tpu.memory_space<vmem>>, vector<1x1x16xf32>,
    %c0_194 = arith.constant 0 : index
    %c0_195 = arith.constant 0 : index
    %c0_196 = arith.constant 0 : index
    %504 = vector.load %arg24[%c0_194, %c0_195, %c0_196] : memref<1x1x16xf32, #tpu.memory_space<vmem>>, vector<1x1x16xf32>
    %505 = vector.shape_cast %504 : vector<1x1x16xf32> to vector<1x16xf32>
    %506 = arith.mulf %505, %490 : vector<1x16xf32>
    %507 = arith.addf %486, %506 : vector<1x16xf32>
    %c0_197 = arith.constant 0 : index
    %c0_198 = arith.constant 0 : index
    %c0_199 = arith.constant 0 : index
    %508 = vector.load %arg28[%c0_197, %c0_198, %c0_199] : memref<1x1x16xf32, #tpu.memory_space<vmem>>, vector<1x1x16xf32>
    %509 = vector.shape_cast %508 : vector<1x1x16xf32> to vector<1x16xf32>
    %510 = vector.shape_cast %507 : vector<1x16xf32> to vector<1x1x16xf32>
    tpu.vector_store %arg28[%c0_197, %c0_198, %c0_199], %510 {strides = array<i32>} : memref<1x1x16xf32, #tpu.memory_space<vmem>>, vector<1x1x16xf32>,
    return
  }
  func.func @transform_0(%arg0: i32) -> (i32, i32, i32) {
    %c0_i32 = arith.constant 0 : i32
    %c0_i32_0 = arith.constant 0 : i32
    %c0_i32_1 = arith.constant 0 : i32
    return %arg0, %c0_i32, %c0_i32_0 : i32, i32, i32
  }
  func.func @transform_1(%arg0: i32) -> (i32, i32, i32) {
    %c0_i32 = arith.constant 0 : i32
    %c0_i32_0 = arith.constant 0 : i32
    %c0_i32_1 = arith.constant 0 : i32
    return %arg0, %c0_i32, %c0_i32_0 : i32, i32, i32
  }
  func.func @transform_2(%arg0: i32) -> (i32, i32) {
    %c0_i32 = arith.constant 0 : i32
    %c0_i32_0 = arith.constant 0 : i32
    %c0_i32_1 = arith.constant 0 : i32
    return %c0_i32, %c0_i32_0 : i32, i32
  }
  func.func @transform_3(%arg0: i32) -> (i32, i32) {
    %c0_i32 = arith.constant 0 : i32
    %c0_i32_0 = arith.constant 0 : i32
    %c0_i32_1 = arith.constant 0 : i32
    return %c0_i32, %c0_i32_0 : i32, i32
  }
  func.func @transform_4(%arg0: i32) -> (i32, i32) {
    %c0_i32 = arith.constant 0 : i32
    %c0_i32_0 = arith.constant 0 : i32
    %c0_i32_1 = arith.constant 0 : i32
    return %c0_i32, %c0_i32_0 : i32, i32
  }
  func.func @transform_5(%arg0: i32) -> (i32, i32) {
    %c0_i32 = arith.constant 0 : i32
    %c0_i32_0 = arith.constant 0 : i32
    %c0_i32_1 = arith.constant 0 : i32
    return %c0_i32, %c0_i32_0 : i32, i32
  }
  func.func @transform_6(%arg0: i32) -> (i32, i32) {
    %c0_i32 = arith.constant 0 : i32
    %c0_i32_0 = arith.constant 0 : i32
    %c0_i32_1 = arith.constant 0 : i32
    return %c0_i32, %c0_i32_0 : i32, i32
  }
  func.func @transform_7(%arg0: i32) -> (i32, i32) {
    %c0_i32 = arith.constant 0 : i32
    %c0_i32_0 = arith.constant 0 : i32
    %c0_i32_1 = arith.constant 0 : i32
    return %c0_i32, %c0_i32_0 : i32, i32
  }
  func.func @transform_8(%arg0: i32) -> (i32, i32) {
    %c0_i32 = arith.constant 0 : i32
    %c0_i32_0 = arith.constant 0 : i32
    %c0_i32_1 = arith.constant 0 : i32
    return %c0_i32, %c0_i32_0 : i32, i32
  }
  func.func @transform_9(%arg0: i32) -> (i32, i32) {
    %c0_i32 = arith.constant 0 : i32
    %c0_i32_0 = arith.constant 0 : i32
    %c0_i32_1 = arith.constant 0 : i32
    return %c0_i32, %c0_i32_0 : i32, i32
  }
  func.func @transform_10(%arg0: i32) -> (i32, i32) {
    %c0_i32 = arith.constant 0 : i32
    %c0_i32_0 = arith.constant 0 : i32
    %c0_i32_1 = arith.constant 0 : i32
    return %c0_i32, %c0_i32_0 : i32, i32
  }
  func.func @transform_11(%arg0: i32) -> (i32, i32, i32) {
    %c0_i32 = arith.constant 0 : i32
    %c0_i32_0 = arith.constant 0 : i32
    %c0_i32_1 = arith.constant 0 : i32
    %c0_i32_2 = arith.constant 0 : i32
    return %c0_i32, %c0_i32_0, %c0_i32_1 : i32, i32, i32
  }
  func.func @transform_12(%arg0: i32) -> (i32, i32) {
    %c0_i32 = arith.constant 0 : i32
    %c0_i32_0 = arith.constant 0 : i32
    %c0_i32_1 = arith.constant 0 : i32
    return %c0_i32, %c0_i32_0 : i32, i32
  }
  func.func @transform_13(%arg0: i32) -> (i32, i32) {
    %c0_i32 = arith.constant 0 : i32
    %c0_i32_0 = arith.constant 0 : i32
    %c0_i32_1 = arith.constant 0 : i32
    return %c0_i32, %c0_i32_0 : i32, i32
  }
  func.func @transform_14(%arg0: i32) -> (i32, i32) {
    %c0_i32 = arith.constant 0 : i32
    %c0_i32_0 = arith.constant 0 : i32
    %c0_i32_1 = arith.constant 0 : i32
    return %c0_i32, %c0_i32_0 : i32, i32
  }
  func.func @transform_15(%arg0: i32) -> (i32, i32) {
    %c0_i32 = arith.constant 0 : i32
    %c0_i32_0 = arith.constant 0 : i32
    %c0_i32_1 = arith.constant 0 : i32
    return %c0_i32, %c0_i32_0 : i32, i32
  }
  func.func @transform_16(%arg0: i32) -> (i32, i32, i32) {
    %c0_i32 = arith.constant 0 : i32
    %c0_i32_0 = arith.constant 0 : i32
    %c0_i32_1 = arith.constant 0 : i32
    %c0_i32_2 = arith.constant 0 : i32
    return %c0_i32, %c0_i32_0, %c0_i32_1 : i32, i32, i32
  }
  func.func @transform_17(%arg0: i32) -> (i32, i32, i32) {
    %c0_i32 = arith.constant 0 : i32
    %c0_i32_0 = arith.constant 0 : i32
    %c0_i32_1 = arith.constant 0 : i32
    %c0_i32_2 = arith.constant 0 : i32
    return %c0_i32, %c0_i32_0, %c0_i32_1 : i32, i32, i32
  }
  func.func @transform_18(%arg0: i32) -> (i32, i32, i32) {
    %c0_i32 = arith.constant 0 : i32
    %c0_i32_0 = arith.constant 0 : i32
    %c0_i32_1 = arith.constant 0 : i32
    %c0_i32_2 = arith.constant 0 : i32
    return %c0_i32, %c0_i32_0, %c0_i32_1 : i32, i32, i32
  }
  func.func @transform_19(%arg0: i32) -> (i32, i32, i32) {
    %c0_i32 = arith.constant 0 : i32
    %c0_i32_0 = arith.constant 0 : i32
    %c0_i32_1 = arith.constant 0 : i32
    %c0_i32_2 = arith.constant 0 : i32
    return %c0_i32, %c0_i32_0, %c0_i32_1 : i32, i32, i32
  }
  func.func @transform_20(%arg0: i32) -> (i32, i32) {
    %c0_i32 = arith.constant 0 : i32
    %c0_i32_0 = arith.constant 0 : i32
    %c0_i32_1 = arith.constant 0 : i32
    return %c0_i32, %c0_i32_0 : i32, i32
  }
  func.func @transform_21(%arg0: i32) -> (i32, i32) {
    %c0_i32 = arith.constant 0 : i32
    %c0_i32_0 = arith.constant 0 : i32
    %c0_i32_1 = arith.constant 0 : i32
    return %c0_i32, %c0_i32_0 : i32, i32
  }
  func.func @transform_22(%arg0: i32) -> (i32, i32, i32) {
    %c0_i32 = arith.constant 0 : i32
    %c0_i32_0 = arith.constant 0 : i32
    %c0_i32_1 = arith.constant 0 : i32
    return %arg0, %c0_i32, %c0_i32_0 : i32, i32, i32
  }
  func.func @transform_23(%arg0: i32) -> (i32, i32, i32) {
    %c0_i32 = arith.constant 0 : i32
    %c0_i32_0 = arith.constant 0 : i32
    %c0_i32_1 = arith.constant 0 : i32
    return %arg0, %c0_i32, %c0_i32_0 : i32, i32, i32
  }
  func.func @transform_24(%arg0: i32) -> (i32, i32, i32) {
    %c0_i32 = arith.constant 0 : i32
    %c0_i32_0 = arith.constant 0 : i32
    %c0_i32_1 = arith.constant 0 : i32
    return %arg0, %c0_i32, %c0_i32_0 : i32, i32, i32
  }
  func.func @transform_25(%arg0: i32) -> (i32, i32, i32) {
    %c0_i32 = arith.constant 0 : i32
    %c0_i32_0 = arith.constant 0 : i32
    %c0_i32_1 = arith.constant 0 : i32
    return %arg0, %c0_i32, %c0_i32_0 : i32, i32, i32
  }
  func.func @transform_26(%arg0: i32) -> (i32, i32, i32) {
    %c0_i32 = arith.constant 0 : i32
    %c0_i32_0 = arith.constant 0 : i32
    %c0_i32_1 = arith.constant 0 : i32
    return %arg0, %c0_i32, %c0_i32_0 : i32, i32, i32
  }
  func.func @transform_27(%arg0: i32) -> (i32, i32, i32) {
    %c0_i32 = arith.constant 0 : i32
    %c0_i32_0 = arith.constant 0 : i32
    %c0_i32_1 = arith.constant 0 : i32
    return %arg0, %c0_i32, %c0_i32_0 : i32, i32, i32
  }
}

</mosaic_0001>

<bundles_post_ra>
// kernel: tpu_custom_call.1
= control target key start
LH: loop header
LB: loop body
LE: loop exit
PB: predicated region body
PF: predicated region fallthrough
CT: control target
= control target key end

     0   :  { %s6824_s0 = inlined_call_operand.vmem [shape: f32[2,8,5], index: 0, kind: input, shape index: {}]   ;;  %s6825_s1 = inlined_call_operand.hbm [shape: f32[2,8,24], index: 1, kind: input, shape index: {}]   ;;  %s6826_s2 = inlined_call_operand.vmem [shape: f32[5,32], index: 2, kind: input, shape index: {}]   ;;  %s6827_s3 = inlined_call_operand.vmem [shape: f32[1,32], index: 3, kind: input, shape index: {}]   ;;  %s6828_s4 = inlined_call_operand.hbm [shape: f32[56,64], index: 4, kind: input, shape index: {}]   ;;  %s6829_s5 = inlined_call_operand.hbm [shape: f32[1,64], index: 5, kind: input, shape index: {}]   ;;  %s6830_s6 = inlined_call_operand.vmem [shape: f32[64,64], index: 6, kind: input, shape index: {}]   ;;  %s6831_s7 = inlined_call_operand.hbm [shape: f32[1,64], index: 7, kind: input, shape index: {}]   ;;  %s6832_s8 = inlined_call_operand.vmem [shape: f32[64,8], index: 8, kind: input, shape index: {}]   ;;  %s6833_s9 = inlined_call_operand.vmem [shape: f32[8,3], index: 9, kind: input, shape index: {}]   ;;  %s6834_s10 = inlined_call_operand.vmem [shape: f32[3,8], index: 10, kind: input, shape index: {}]   ;;  %s6835_s11 = inlined_call_operand.vmem [shape: f32[3,8,1], index: 11, kind: input, shape index: {}]   ;;  %s6836_s12 = inlined_call_operand.hbm [shape: f32[64,64], index: 12, kind: input, shape index: {}]   ;;  %s6837_s13 = inlined_call_operand.hbm [shape: f32[1,64], index: 13, kind: input, shape index: {}]   ;;  %s6838_s14 = inlined_call_operand.vmem [shape: f32[64,8], index: 14, kind: input, shape index: {}]   ;;  %s6839_s15 = inlined_call_operand.hbm [shape: f32[8,64], index: 15, kind: input, shape index: {}]   ;;  %s6840_s16 = inlined_call_operand.vmem [shape: f32[2,64,256], index: 16, kind: input, shape index: {}]   ;;  %s6841_s17 = inlined_call_operand.hbm [shape: f32[2,32,128], index: 17, kind: input, shape index: {}]   ;;  %s6842_s18 = inlined_call_operand.hbm [shape: f32[2,32,128], index: 18, kind: input, shape index: {}]   ;;  %s6843_s19 = inlined_call_operand.vmem [shape: f32[2,1,256], index: 19, kind: input, shape index: {}]   ;;  %s6844_s20 = inlined_call_operand.vmem [shape: f32[64,32], index: 20, kind: input, shape index: {}]   ;;  %s6845_s21 = inlined_call_operand.hbm [shape: f32[1,32], index: 21, kind: input, shape index: {}]   ;;  %s6846_s22 = inlined_call_operand.vmem [shape: f32[2,1,16], index: 22, kind: input, shape index: {}]   ;;  %s6847_s23 = inlined_call_operand.vmem [shape: f32[2,1,16], index: 23, kind: input, shape index: {}]   ;;  %s6848_s24 = inlined_call_operand.hbm [shape: f32[2,1,16], index: 24, kind: output, shape index: {0}]   ;;  %s6849_s25 = inlined_call_operand.hbm [shape: f32[2,1,16], index: 25, kind: output, shape index: {1}]   ;;  %s6850_s26 = inlined_call_operand.hbm [shape: f32[2,1,16], index: 26, kind: output, shape index: {2}]   ;;  %s6851_s27 = inlined_call_operand.hbm [shape: f32[2,1,16], index: 27, kind: output, shape index: {3}]  }
   0x1   :  { %6871 = sst [smem:[#allocation35_spill]] %s6824_s0 }
   0x2   :  { %6872 = sst [smem:[#allocation36_spill]] %s6825_s1 }
   0x3   :  { %6873 = sst [smem:[#allocation37_spill]] %s6826_s2 }
   0x4   :  { %6874 = sst [smem:[#allocation38_spill]] %s6827_s3 }
   0x5   :  { %6875 = sst [smem:[#allocation39_spill]] %s6828_s4 }
   0x6   :  { %6876 = sst [smem:[#allocation40_spill]] %s6829_s5 }
   0x7   :  { %6877 = sst [smem:[#allocation41_spill]] %s6830_s6 }
   0x8   :  { %6878 = sst [smem:[#allocation42_spill]] %s6831_s7 }
   0x9   :  { %6879 = sst [smem:[#allocation43_spill]] %s6832_s8 }
   0xa   :  { %6880 = sst [smem:[#allocation44_spill]] %s6833_s9 }
   0xb   :  { %6881 = sst [smem:[#allocation45_spill]] %s6834_s10 }
   0xc   :  { %6882 = sst [smem:[#allocation46_spill]] %s6835_s11 }
   0xd   :  { %6883 = sst [smem:[#allocation47_spill]] %s6836_s12 }
   0xe   :  { %6884 = sst [smem:[#allocation48_spill]] %s6837_s13 }
   0xf   :  { %6885 = sst [smem:[#allocation49_spill]] %s6838_s14 }
  0x10   :  { %6886 = sst [smem:[#allocation50_spill]] %s6839_s15 }
  0x11   :  { %6887 = sst [smem:[#allocation51_spill]] %s6840_s16 }
  0x12   :  { %6888 = sst [smem:[#allocation52_spill]] %s6841_s17 }
  0x13   :  { %6889 = sst [smem:[#allocation53_spill]] %s6842_s18 }
  0x14   :  { %6890 = sst [smem:[#allocation54_spill]] %s6846_s22 }
  0x15   :  { %6891 = sst [smem:[#allocation55_spill]] %s6847_s23 }
  0x16   :  { %6892 = sst [smem:[#allocation56_spill]] %s6848_s24 }
  0x17   :  { %6893 = sst [smem:[#allocation57_spill]] %s6849_s25 }
  0x18   :  { %6894 = sst [smem:[#allocation58_spill]] %s6850_s26 }
  0x19   :  { %6895 = sst [smem:[#allocation59_spill]] %s6851_s27 }
  0x1a   :  { %33 = vsyncpa [#allocation4], 0 }
  0x1b   :  { %35 = vsyncpa [#allocation4 + $0x1], 0 }
  0x1c   :  { %36 = vsyncpa [#allocation7], 0 }
  0x1d   :  { %37 = vsyncpa [#allocation10], 0 }
  0x1e   :  { %38 = vsyncpa [#allocation13], 0 }
  0x1f   :  { %39 = vsyncpa [#allocation16], 0 }
  0x20   :  { %40 = vsyncpa [#allocation19], 0 }
  0x21   :  { %41 = vsyncpa [#allocation5], 0 }
  0x22   :  { %43 = vsyncpa [#allocation5 + $0x1], 0 }
  0x23   :  { %44 = vsyncpa [#allocation22], 0 }
  0x24   :  { %46 = vsyncpa [#allocation22 + $0x1], 0 }
  0x25   :  { %47 = vsyncpa [#allocation25], 0 }
  0x26   :  { %49 = vsyncpa [#allocation25 + $0x1], 0  ;;  %s5829_s7 = smov 0   ;;  %s5831_s4 = smov 0  }
  0x27   :  { %s5833_s8 = smov 0   ;;  %s5835_s30 = smov 0  }
  0x28 LB: > { %s5665_s9 = smov [#allocation6]   ;;  %s5850_s28 = sadd.s32 4294967295, %s5663_s30   ;;  %s5663_s30 = sphi %s5835_s30, %s6949_s30   ;;  %s5659_s8 = sphi %s5833_s8, %s6948_s8   ;;  %s5655_s4 = sphi %s5831_s4, %s6947_s4   ;;  %s5651_s7 = sphi %s5829_s7, %s6946_s7  }
  0x29   : > { %s706_s5 = sshll.u32 %s5665_s9, 4  ;;  %p4420_p0 = scmp.ge.s32.totalorder %s5663_s30, 1  ;;  %s707_s5 = int_to_ptr.vmem [resolvable:$true] %s706_s5 }
  0x2a   : > { %p6861_p1 = scmp.eq.s32.totalorder %s5850_s28, 0  ;;  %p688_p2 = scmp.lt.s32.totalorder %s5663_s30, 3 }
  0x2b   : > { %s5666_s10 = smov [#allocation9]   ;;  %s5667_s6 = smov [#allocation12]  }
  0x2c   : > { %p5855_p3 = pnand %p4420_p0, %p688_p2  ;;  %s734_s29 = sshll.u32 %s5666_s10, 4  ;;  %s735_s29 = int_to_ptr.vmem [resolvable:$true] %s734_s29 }
  0x2d   : > { %s770_s11 = sshll.u32 %s5667_s6, 4  ;;  %s5242_s3 = scalar_lea.vmem %s707_s5, 896  ;;  %s5868_s11 = int_to_ptr.vmem [resolvable:$true] %s770_s11 }
  0x2e   : > { %s6896_s0 = scalar_select %p5855_p3, 1, 0 }
  0x2f   : > { %p5003_p5 = pneg %p5855_p3  ;;  %p5243_p8 = scmp.ne.s32.totalorder %s707_s5, %s5242_s3 }
  0x30   : > { %p5250_p11 = scmp.lt.s32.totalorder %s707_s5, %s707_s5  ;;  %p5251_p12 = scmp.lt.s32.totalorder %s5242_s3, %s5242_s3 }
  0x31   : > { %p5864_p6 = pnand %p5003_p5, %p6861_p1 }
  0x32   : > { %p5252_p13 = por %p5251_p12, %p5250_p11 }
  0x33   : > { %p5872_p7 = pneg %p5864_p6 }
  0x35   : > { %p5245_p9 = pnand %p5243_p8, %p5872_p7 }
  0x37   : > { %p5246_p10 = pneg %p5245_p9 }
  0x39   : > { %p5253_p0 = pnand %p5252_p13, %p5246_p10 }
  0x3b   : > { %5256 = shalt.err (!%p5253_p0)
}
  0x3c   : > { %s5668_s9 = smov 128   ;;  %s5669_s10 = smov 8  }
  0x3d   : > { %s6899_s24 = sld [smem:[#allocation39_spill]]  ;;  %s5268_s23 = scalar_lea.vmem %s735_s29, 16 }
  0x3e   : > { %p5269_p2 = scmp.ne.s32.totalorder %s735_s29, %s5268_s23  ;;  %s5275_s3 = scalar_lea.vmem %s735_s29, 32 }
  0x3f   : > { %p5276_p9 = scmp.lt.s32.totalorder %s735_s29, %s735_s29  ;;  %p5277_p10 = scmp.lt.s32.totalorder %s5275_s3, %s5268_s23 }
  0x40   : > { %p5271_p5 = pnand %p5269_p2, %p5872_p7 }
  0x41   : > { %p5278_p11 = por %p5277_p10, %p5276_p9 }
  0x42   : > { %p5272_p8 = pneg %p5271_p5 }
  0x43   : > { %5006 = dma.hbm_to_vmem [thread:$0]  (!%p5864_p6), %s6899_s24, 896, %s707_s5, [#allocation7], %s5668_s9, %s5668_s9, %s5669_s10  }
  0x44   : > { %p5279_p12 = pnand %p5278_p11, %p5272_p8 }
  0x46   : > { %5282 = shalt.err (!%p5279_p12)
}
  0x47   : > { %s6900_s25 = sld [smem:[#allocation42_spill]]  ;;  %s5294_s24 = scalar_lea.vmem %s5868_s11, 16 }
  0x48   : > { %p5295_p13 = scmp.ne.s32.totalorder %s5868_s11, %s5294_s24  ;;  %s5301_s23 = scalar_lea.vmem %s5868_s11, 32 }
  0x49   : > { %p5302_p5 = scmp.lt.s32.totalorder %s5868_s11, %s5868_s11  ;;  %p5303_p8 = scmp.lt.s32.totalorder %s5301_s23, %s5294_s24 }
  0x4a   : > { %p5297_p0 = pnand %p5295_p13, %p5872_p7 }
  0x4b   : > { %p5304_p9 = por %p5303_p8, %p5302_p5 }
  0x4c   : > { %p5298_p2 = pneg %p5297_p0 }
  0x4d   : > { %5012 = dma.hbm_to_vmem [thread:$0]  (!%p5864_p6), %s6900_s25, 16, %s735_s29, [#allocation10]  }
  0x4e   : > { %p5305_p10 = pnand %p5304_p9, %p5298_p2 }
  0x50   : > { %5308 = shalt.err (!%p5305_p10)
}
  0x51   : > { %s6901_s13 = sld [smem:[#allocation48_spill]]  ;;  %s5670_s25 = smov [#allocation15]  }
  0x52   : > { %s797_s27 = sshll.u32 %s5670_s25, 4  ;;  %s5671_s5 = smov [#allocation8]   ;;  %s798_s27 = int_to_ptr.vmem [resolvable:$true] %s797_s27 }
  0x53   : > { %s720_s29 = sshll.u32 %s5671_s5, 4  ;;  %s5320_s6 = scalar_lea.vmem %s798_s27, 1024  ;;  %s721_s29 = int_to_ptr.vmem [resolvable:$true] %s720_s29 }
  0x54   : > { %p5321_p11 = scmp.ne.s32.totalorder %s798_s27, %s5320_s6  ;;  %p5328_p0 = scmp.lt.s32.totalorder %s798_s27, %s798_s27 }
  0x55   : > { %p5329_p2 = scmp.lt.s32.totalorder %s5320_s6, %s5320_s6 }
  0x56   : > { %p5323_p12 = pnand %p5321_p11, %p5872_p7 }
  0x57   : > { %5018 = dma.hbm_to_vmem [thread:$0]  (!%p5864_p6), %s6901_s13, 16, %s5868_s11, [#allocation13]  }
  0x58   : > { %p5324_p13 = pneg %p5323_p12  ;;  %p5330_p5 = por %p5329_p2, %p5328_p0 }
  0x5a   : > { %p5331_p8 = pnand %p5330_p5, %p5324_p13 }
  0x5c   : > { %5334 = shalt.err (!%p5331_p8)
}
  0x5d   : > { %s6902_s17 = sld [smem:[#allocation52_spill]]  ;;  %s5346_s24 = scalar_lea.vmem %s721_s29, 16 }
  0x5e   : > { %p5347_p9 = scmp.ne.s32.totalorder %s721_s29, %s5346_s24  ;;  %s5353_s23 = scalar_lea.vmem %s721_s29, 32 }
  0x5f   : > { %p5354_p12 = scmp.lt.s32.totalorder %s721_s29, %s721_s29  ;;  %p5355_p13 = scmp.lt.s32.totalorder %s5353_s23, %s5346_s24 }
  0x60   : > { %p5349_p10 = pnand %p5347_p9, %p5872_p7 }
  0x61   : > { %p5356_p0 = por %p5355_p13, %p5354_p12 }
  0x62   : > { %p5350_p11 = pneg %p5349_p10 }
  0x63   : > { %5024 = dma.hbm_to_vmem [thread:$0]  (!%p5864_p6), %s6902_s17, 1024, %s798_s27, [#allocation16], %s5668_s9, %s5668_s9, %s5669_s10  }
  0x64   : > { %p5357_p2 = pnand %p5356_p0, %p5350_p11 }
  0x66   : > { %5360 = shalt.err (!%p5357_p2)
}
  0x67   : > { %s6903_s25 = sld [smem:[#allocation40_spill]]  ;;  %s5672_s27 = smov [#allocation11]  }
  0x68   : > { %s756_s5 = sshll.u32 %s5672_s27, 4  ;;  %s5673_s6 = smov [#allocation14]   ;;  %s757_s5 = int_to_ptr.vmem [resolvable:$true] %s756_s5 }
  0x69   : > { %s784_s11 = sshll.u32 %s5673_s6, 4  ;;  %s5372_s3 = scalar_lea.vmem %s757_s5, 1024  ;;  %s785_s11 = int_to_ptr.vmem [resolvable:$true] %s784_s11 }
  0x6a   : > { %p5373_p5 = scmp.ne.s32.totalorder %s757_s5, %s5372_s3  ;;  %p5380_p10 = scmp.lt.s32.totalorder %s757_s5, %s757_s5 }
  0x6b   : > { %p5381_p11 = scmp.lt.s32.totalorder %s5372_s3, %s5372_s3 }
  0x6c   : > { %p5375_p8 = pnand %p5373_p5, %p5872_p7 }
  0x6d   : > { %5009 = dma.hbm_to_vmem [thread:$0]  (!%p5864_p6), %s6903_s25, 16, %s721_s29, [#allocation7]  }
  0x6e   : > { %p5376_p9 = pneg %p5375_p8  ;;  %p5382_p12 = por %p5381_p11, %p5380_p10 }
  0x70   : > { %p5383_p13 = pnand %p5382_p12, %p5376_p9 }
  0x72   : > { %5386 = shalt.err (!%p5383_p13)
}
  0x73   : > { %s6904_s12 = sld [smem:[#allocation47_spill]]  ;;  %s5398_s23 = scalar_lea.vmem %s785_s11, 128 }
  0x74   : > { %p5399_p0 = scmp.ne.s32.totalorder %s785_s11, %s5398_s23  ;;  %p5406_p8 = scmp.lt.s32.totalorder %s785_s11, %s785_s11 }
  0x75   : > { %p5407_p10 = scmp.lt.s32.totalorder %s5398_s23, %s5398_s23 }
  0x76   : > { %p5401_p2 = pnand %p5399_p0, %p5872_p7 }
  0x77   : > { %p5408_p9 = por %p5407_p10, %p5406_p8 }
  0x78   : > { %p5402_p5 = pneg %p5401_p2 }
  0x79   : > { %5015 = dma.hbm_to_vmem [thread:$0]  (!%p5864_p6), %s6904_s12, 1024, %s757_s5, [#allocation10], %s5668_s9, %s5668_s9, %s5669_s10  }
  0x7a   : > { %p5409_p11 = pnand %p5408_p9, %p5402_p5 }
  0x7c   : > { %5412 = shalt.err (!%p5409_p11)
}
  0x7d   : > { %s6905_s15 = sld [smem:[#allocation50_spill]]  ;;  %s5674_s25 = smov [#allocation17]  }
  0x7e   : > { %s810_s27 = sshll.u32 %s5674_s25, 4  ;;  %s5675_s5 = smov [#allocation18]   ;;  %s811_s27 = int_to_ptr.vmem [resolvable:$true] %s810_s27 }
  0x7f   : > { %s830_s6 = sshll.u32 %s5675_s5, 4  ;;  %s5424_s3 = scalar_lea.vmem %s811_s27, 1024  ;;  %s831_s6 = int_to_ptr.vmem [resolvable:$true] %s830_s6 }
  0x80   : > { %p5425_p12 = scmp.ne.s32.totalorder %s811_s27, %s5424_s3  ;;  %p5432_p2 = scmp.lt.s32.totalorder %s811_s27, %s811_s27 }
  0x81   : > { %p5433_p5 = scmp.lt.s32.totalorder %s5424_s3, %s5424_s3 }
  0x82   : > { %p5427_p13 = pnand %p5425_p12, %p5872_p7 }
  0x83   : > { %5021 = dma.hbm_to_vmem [thread:$0]  (!%p5864_p6), %s6905_s15, 128, %s785_s11, [#allocation13]  }
  0x84   : > { %p5428_p0 = pneg %p5427_p13  ;;  %p5434_p8 = por %p5433_p5, %p5432_p2 }
  0x86   : > { %p5435_p10 = pnand %p5434_p8, %p5428_p0 }
  0x88   : > { %5438 = shalt.err (!%p5435_p10)
}
  0x89   : > { %s6906_s18 = sld [smem:[#allocation53_spill]]  ;;  %s5450_s24 = scalar_lea.vmem %s831_s6, 16 }
  0x8a   : > { %p5451_p9 = scmp.ne.s32.totalorder %s831_s6, %s5450_s24  ;;  %s5457_s23 = scalar_lea.vmem %s831_s6, 32 }
  0x8b   : > { %p5458_p13 = scmp.lt.s32.totalorder %s831_s6, %s831_s6  ;;  %p5459_p0 = scmp.lt.s32.totalorder %s5457_s23, %s5450_s24 }
  0x8c   : > { %p5453_p11 = pnand %p5451_p9, %p5872_p7 }
  0x8d   : > { %p5460_p2 = por %p5459_p0, %p5458_p13 }
  0x8e   : > { %p5454_p12 = pneg %p5453_p11 }
  0x8f   : > { %5027 = dma.hbm_to_vmem [thread:$0]  (!%p5864_p6), %s6906_s18, 1024, %s811_s27, [#allocation16], %s5668_s9, %s5668_s9, %s5669_s10  }
  0x90   : > { %p5461_p5 = pnand %p5460_p2, %p5454_p12 }
  0x92   : > { %5464 = shalt.err (!%p5461_p5)
}
  0x93   : > { %5030 = dma.hbm_to_vmem [thread:$0]  (!%p5864_p6), %s6845_s21, 16, %s831_s6, [#allocation19]  }
  0x94   : > { %s6860_s1 = sadd.s32 4294967294, %s5663_s30   ;;  %s5959_s2 = sadd.s32 1, %s5663_s30  }
  0x95   : > { %s88_s9 = sadd.s32 1, %s5659_s8  ;;  %s85_s10 = ssub.s32 %s5663_s30, %s5959_s2 }
  0x96   : > { %p95_p7 = scmp.ne.s32.totalorder %s5659_s8, %s5655_s4  ;;  %p86_p8 = scmp.eq.s32.totalorder %s85_s10, 0 }
  0x97   : > { %p96_p10 = scmp.eq.s32.totalorder %s5663_s30, 0  ;;  %p101_p9 = scmp.ne.s32.totalorder %s5655_s4, %s5651_s7 }
  0x98   : > { %p597_p11 = scmp.eq.s32.totalorder %s5850_s28, 1  ;;  %p603_p0 = scmp.eq.s32.totalorder %s6860_s1, 1 }
  0x99   : > { %s5971_s25 = scalar_select %p86_p8, %s5659_s8, %s88_s9  }
  0x9a   : > { %p97_p12 = por %p96_p10, %p95_p7  ;;  %p5975_p13 = por %p6861_p1, %p101_p9 }
  0x9b   : > { %p5979_p6 = por %p597_p11, %p95_p7  ;;  %p5057_p2 = scmp.lt.s32.totalorder %s5663_s30, 2 }
  0x9c   : > { %s6907_s27 = scalar_select %p5975_p13, 1, 0 }
  0x9d   : > { %s6908_s5 = scalar_select %p5979_p6, 1, 0 }
  0x9e   : > { %s848_s6 = sand.u32 1, %s5659_s8   ;;  %p5987_p5 = por %p603_p0, %p101_p9 }
  0x9f   : > { %s4431_s11 = sshll.u32 %s848_s6, 3  ;;  %s4432_s29 = sshll.u32 %s5663_s30, 7 }
  0xa0   : > { %s6909_s3 = scalar_select %p5987_p5, 1, 0 }
  0xa1   : > { %s6910_s22 = sld [smem:[#allocation36_spill]]  ;;  %s852_s9 = scalar_lea.vmem [#allocation3], %s4431_s11 }
  0xa2   : > { %s859_s10 = sshll.u32 %s852_s9, 4  ;;  %p5997_p7 = pnand %p5057_p2, %p97_p12  ;;  %s860_s10 = int_to_ptr.vmem [resolvable:$true] %s859_s10 }
  0xa3   : > { %s849_s12 = scalar_lea.sflag [#allocation4], %s848_s6 }
  0xa4   : > { %p5467_p10 = pneg %p5997_p7 }
  0xa7   : > { %s5995_s26 = scalar_lea.hbm %s6910_s22, %s4432_s29  ;;  %s5470_s23 = scalar_lea.hbm %s6910_s22, 256 }
  0xa8   : > { %s5465_s13 = scalar_lea.hbm %s5995_s26, 128  ;;  %p5471_p12 = scmp.lt.s32.totalorder %s5995_s26, %s6910_s22 }
  0xa9   : > { %p5466_p8 = scmp.ne.s32.totalorder %s5995_s26, %s5465_s13  ;;  %p5472_p0 = scmp.lt.s32.totalorder %s5470_s23, %s5465_s13 }
  0xab   : > { %p5468_p9 = pnand %p5467_p10, %p5466_p8  ;;  %p5473_p2 = por %p5472_p0, %p5471_p12 }
  0xad   : > { %p5469_p11 = pneg %p5468_p9 }
  0xaf   : > { %p5474_p4 = pnand %p5473_p2, %p5469_p11 }
  0xb1   : > { %5477 = shalt.err (!%p5474_p4)
}
  0xb2   : > { %s5478_s9 = scalar_lea.vmem %s860_s10, 128  ;;  %s5676_s6 = smov [#allocation3]  }
  0xb3   : > { %p5479_p1 = scmp.ne.s32.totalorder %s860_s10, %s5478_s9  ;;  %s5483_s17 = sshll.u32 %s5676_s6, 4  ;;  %s5484_s17 = int_to_ptr.vmem [resolvable:$false] %s5483_s17 }
  0xb4   : > { %s5485_s18 = scalar_lea.vmem %s5484_s17, 256  ;;  %p5486_p8 = scmp.lt.s32.totalorder %s860_s10, %s5484_s17 }
  0xb5   : > { %p5481_p5 = pnand %p5479_p1, %p5467_p10  ;;  %p5487_p9 = scmp.lt.s32.totalorder %s5485_s18, %s5478_s9 }
  0xb7   : > { %p5482_p6 = pneg %p5481_p5  ;;  %p5488_p13 = por %p5487_p9, %p5486_p8 }
  0xb9   : > { %p5489_p3 = pnand %p5488_p13, %p5482_p6 }
  0xbb   : > { %5492 = shalt.err (!%p5489_p3)
}
  0xbc   : > { %5034 = dma.hbm_to_vmem [thread:$0]  (!%p5997_p7), %s5995_s26, 128, %s860_s10, %s849_s12  }
  0xbd   : > { %p6912_p11 = scmp.ne.s32.totalorder %s6896_s0, 0 }
  0xbe   : > { %s6018_s13 = sand.u32 (!%p6912_p11), 1, %s5655_s4   ;;  %p6913_p1 = scmp.ne.s32.totalorder (!%p6912_p11), %s6907_s27, 0 }
  0xbf   : > { %880 = sbr.rel (%p6912_p11) target bundleno = 9403 (0x24bb), region = 116  ;;  %s4434_s15 = sshll.u32 (!%p6912_p11), %s6018_s13, 3 }
  0xc0   : > { %s883_s29 = scalar_lea.sflag (!%p6912_p11), [#allocation4], %s6018_s13  ;;  %s6022_s17 = scalar_lea.vmem (!%p6912_p11), [#allocation3], %s4434_s15 }
  0xc4   : > { %5614 = dma.done.wait (%p6913_p1), %s883_s29, 128  }
  0xc5   : > { %5616 = vsyncadd (%p6913_p1), %s883_s29, 4294967168  ;;  %p6914_p3 = scmp.eq.s32.totalorder %s5850_s28, 0 }
  0xc7   : > { %5618 = dma.done.wait (%p6914_p3), [#allocation7], 912   ;;  %p6915_p4 = pmov %p6914_p3 }
  0xc8   : > { %p6916_p13 = pmov %p6914_p3 }
  0xc9   : > { %5620 = vsyncadd (%p6915_p4), [#allocation7], 4294966384 }
  0xca   : > { %5622 = dma.done.wait (%p6916_p13), [#allocation10], 1040   ;;  %p6917_p6 = pmov %p6914_p3 }
  0xcb   : > { %p6918_p5 = pmov %p6914_p3 }
  0xcc   : > { %5624 = vsyncadd (%p6917_p6), [#allocation10], 4294966256 }
  0xcd   : > { %5626 = dma.done.wait (%p6918_p5), [#allocation13], 144   ;;  %p6919_p7 = pmov %p6914_p3 }
  0xce   : > { %p6920_p10 = pmov %p6914_p3 }
  0xcf   : > { %5628 = vsyncadd (%p6919_p7), [#allocation13], 4294967152 }
  0xd0   : > { %5630 = dma.done.wait (%p6920_p10), [#allocation16], 2048   ;;  %p6921_p12 = pmov %p6914_p3 }
  0xd1   : > { %p6922_p0 = pmov %p6914_p3 }
  0xd2   : > { %5632 = vsyncadd (%p6921_p12), [#allocation16], 4294965248 }
  0xd3   : > { %5634 = dma.done.wait (%p6922_p0), [#allocation19], 16   ;;  %p6923_p2 = pmov %p6922_p0 }
  0xd4   : > { %p1014_p8 = scmp.lt.s32.totalorder %s5850_s28, 1  ;;  %v5677_v0 = vmov 0.0   ;;  %vm5678_vm0 = vmmov 0   ;;  %vm1043_vm1 = vcmask 1044480   ;;  %s6924_s27 = sld [smem:[#allocation35_spill]]  ;;  %vm1027_vm2 = vcmask 39936  }
  0xd5   : > { %5636 = vsyncadd (%p6923_p2), [#allocation19], 4294967280  ;;  %4655 = vmatprep.subr.mxu0 %v5677_v0  ;;  %4657 = vmatprep.mubr.msk.f32.mxu0 %vm5678_vm0, %v5677_v0  ;;  %s6925_s23 = sld [smem:[#allocation37_spill]]  ;;  %v1126_v3 = vld [vmem:[#allocation6 + $0x30] sm:$0xff]  ;;  %v1125_v6 = vld [vmem:[#allocation6 + $0x28] sm:$0xff]  ;;  %vm1201_vm3 = vcmask 195584  }
  0xd6   : > { %s6053_s12 = scalar_select %p1014_p8, %s5850_s28, 1  ;;  %4660 = vmatprep.subr.mxu1 %v5677_v0  ;;  %4668 = vmatprep.mubr.msk.f32.mxu1 %vm5678_vm0, %v5677_v0  ;;  %v1122_v5 = vld [vmem:[#allocation6 + $0x10] sm:$0xff]  ;;  %v1121_v7 = vld [vmem:[#allocation6 + $0x8] sm:$0xff]  ;;  %v1124_v9 = vld [vmem:[#allocation6 + $0x20] sm:$0xff]  ;;  %vm1127_vm5 = vcmask 261120   ;;  %vm1317_vm8 = vcmask 523264  }
  0xd7   : > { %4661 = vmatpush3.msra.mxu1 %v1126_v3  ;;  %v1120_v10 = vld [vmem:[#allocation6] sm:$0xff]  ;;  %v1025_v11 = vld [vmem:[%s6022_s17] sm:$0xff]  ;;  %s6926_s6 = sld [smem:[#allocation38_spill]]  ;;  %v5679_v52 = vmov 0   ;;  %vm1494_vm14 = vcmask 64512   ;;  %s5680_s9 = smov 64  }
  0xd8   : > { %s4444_s18 = sshll.u32 %s6053_s12, 3  ;;  %4662 = vmatprep.subr.mxu1 %v5677_v0  ;;  %v1123_v12 = vld [vmem:[#allocation6 + $0x18] sm:$0xff]  ;;  %v1283_v13 = vand.u32 2147483647, %v1025_v11  ;;  %s6927_s17 = sld [smem:[#allocation41_spill]]  ;;  %5119 = vset.pattern.permute.xlu1 %v5679_v52 }
  0xd9   : > { %4663 = vmatpush3.msra.mxu1 %v1125_v6  ;;  %v4450_v36 = vld [vmem:[#allocation8] ss:$0 sm:$0xff]  ;;  %s6929_s11 = sld [smem:[#allocation46_spill]]  ;;  %5120 = vset.pattern.permute.xlu0 %v5679_v52  ;;  %v4451_v56 = vld [vmem:[#allocation9] ss:$0 sm:$0xff]  ;;  %s6684_s10 = sshll.u32 %s5850_s28, 4 }
  0xda   : > { %s1017_s26 = scalar_lea.vmem %s6924_s27, %s4444_s18  ;;  %4664 = vmatprep.subr.mxu1 %v5677_v0  ;;  %v1284_v14 = vsel %vm1201_vm3, %v1283_v13, -inf  ;;  %s6928_s27 = sld [smem:[#allocation43_spill]] }
  0xdb   : > { %v1032_v1 = vld [vmem:[%s6925_s23] sm:$0x1f]  ;;  %4665 = vmatpush3.msra.mxu1 %v1124_v9  ;;  %s6930_s1 = sld [smem:[#allocation44_spill]]  ;;  %p6936_p11 = scmp.ne.s32.totalorder %s6908_s5, 0 }
  0xdc   : > { %v1024_v2 = vld [vmem:[%s1017_s26] sm:$0xff]  ;;  %4656 = vmatpush3.msk.msra.mxu0 %vm1043_vm1, %v1032_v1  ;;  %4666 = vmatprep.subr.mxu1 %v5677_v0  ;;  %s6931_s24 = sld [smem:[#allocation45_spill]]  ;;  %s6867_s26 = smov 112  }
  0xdd   : > { %v1026_v4 = vand.u32 2147483647, %v1024_v2  ;;  %4658 = vmatmul.mubr.msk.f32.vlgmr.msra.gmra.mxu0 %vm1027_vm2, %v1024_v2  ;;  %4671 = vmatprep.subr.mxu0 %v5677_v0  ;;  %v4445_v16 = vld [vmem:[%s6926_s6] ss:$0 sm:$0xff]  ;;  %s6932_s16 = sld [smem:[#allocation51_spill]]  ;;  %s6865_s6 = smov 32  }
  0xde   : > { %4672 = vmatpush3.msra.mxu0 %v1122_v5  ;;  %4677 = vmatprep.mubr.msk.f32.mxu0 %vm5678_vm0, %v5677_v0  ;;  %v1309_v23 = vld [vmem:[%s6927_s17 + $0x38] sm:$0xff]  ;;  %v1308_v24 = vld [vmem:[%s6927_s17 + $0x30] sm:$0xff]  ;;  %v1307_v25 = vld [vmem:[%s6927_s17 + $0x28] sm:$0xff]  ;;  %s6934_s14 = sld [smem:[#allocation49_spill]] }
  0xdf   : > { %v1028_v8 = vsel %vm1027_vm2, %v1026_v4, -inf  ;;  %4673 = vmatprep.subr.mxu0 %v5677_v0  ;;  %4667 = vmatpush3.msra.mxu1 %v1123_v12  ;;  %v1306_v26 = vld [vmem:[%s6927_s17 + $0x20] sm:$0xff]  ;;  %v1305_v27 = vld [vmem:[%s6927_s17 + $0x18] sm:$0xff]  ;;  %v1304_v30 = vld [vmem:[%s6927_s17 + $0x10] sm:$0xff]  ;;  %vm1519_vm2 = vcmask 1041409   ;;  %s6935_s15 = sld [smem:[#allocation57_spill]] }
  0xe0   : > { %1029 = vmax.xlane.f32.xlu0 %v1028_v8  ;;  %4674 = vmatpush3.msra.mxu0 %v1121_v7  ;;  %v1303_v31 = vld [vmem:[%s6927_s17 + $0x8] sm:$0xff]  ;;  %v1302_v32 = vld [vmem:[%s6927_s17] sm:$0xff]  ;;  %v1399_v41 = vld [vmem:[%s6928_s27 + $0x38] sm:$0xff] }
  0xe1   : > { %4675 = vmatprep.subr.mxu0 %v5677_v0  ;;  %4699 = vmatprep.subr.mxu1 %v5677_v0  ;;  %v1398_v42 = vld [vmem:[%s6928_s27 + $0x30] sm:$0xff]  ;;  %v1397_v43 = vld [vmem:[%s6928_s27 + $0x28] sm:$0xff]  ;;  %v1396_v44 = vld [vmem:[%s6928_s27 + $0x20] sm:$0xff] }
  0xe2   : > { %4676 = vmatpush3.msra.mxu0 %v1120_v10  ;;  %v1395_v45 = vld [vmem:[%s6928_s27 + $0x18] sm:$0xff]  ;;  %v1394_v46 = vld [vmem:[%s6928_s27 + $0x10] sm:$0xff]  ;;  %v1393_v47 = vld [vmem:[%s6928_s27 + $0x8] sm:$0xff] }
  0xe3   : > { %4678 = vmatmul.mubr.msk.f32.vlgmr.msra.gmra.mxu0 %vm1201_vm3, %v1025_v11  ;;  %4680 = vmatprep.subr.mxu0 %v5677_v0  ;;  %v1392_v48 = vld [vmem:[%s6928_s27] sm:$0xff]  ;;  %v1301_v50 = vld [vmem:[%s6929_s11 + $0x10] sm:$0xff]  ;;  %v1300_v51 = vld [vmem:[%s6929_s11 + $0x8] sm:$0xff]  ;;  %vm1521_vm3 = vcmask 1042434  }
  0xe4   : > { %4696 = vmatprep.mubr.msk.f32.mxu0 %vm5678_vm0, %v5677_v0  ;;  %1285 = vmax.xlane.f32.xlu0 %v1284_v14  ;;  %v1299_v49 = vld [vmem:[%s6929_s11] sm:$0xff]  ;;  %vm1475_vm11 = vcmp.gt.f32.partialorder %v1301_v50, 0.0  ;;  %vm1474_vm12 = vcmp.gt.f32.partialorder %v1300_v51, 0.0  ;;  %v1905_v50 = vld [vmem:[%s6932_s16 + $0x48] sm:$0xff] }
  0xe5   : > { %4681 = vmatpush3.msra.mxu0 %v1309_v23  ;;  %vm1473_vm10 = vcmp.gt.f32.partialorder %v1299_v49, 0.0  ;;  %v1477_v54 = vsel %vm1474_vm12, 1, %v5679_v52  ;;  %v1478_v55 = vsel %vm1475_vm11, 1, %v5679_v52  ;;  %v1906_v49 = vld [vmem:[%s6932_s16 + $0x50] sm:$0xff]  ;;  %v1904_v51 = vld [vmem:[%s6932_s16 + $0x40] sm:$0xff]  ;;  %vm2433_vm11 = vcmask 518402   ;;  %s6690_s29 = scalar_lea.hbm %s6935_s15, %s6684_s10 }
  0xe6   : > { %4682 = vmatprep.subr.mxu0 %v5677_v0  ;;  %v1476_v53 = vsel %vm1473_vm10, 1, %v5679_v52  ;;  %v1903_v52 = vld [vmem:[%s6932_s16 + $0x38] sm:$0xff]  ;;  %vm2329_vm10 = vcmask 256002   ;;  %vm2545_vm12 = vcmask 517377  }
  0xe7   : > { %4683 = vmatpush3.msra.mxu0 %v1308_v24 }
  0xe8   : > { %4684 = vmatprep.subr.mxu0 %v5677_v0 }
  0xe9   : > { %4685 = vmatpush3.msra.mxu0 %v1307_v25 }
  0xea   : > { %4686 = vmatprep.subr.mxu0 %v5677_v0 }
  0xeb   : > { %4687 = vmatpush3.msra.mxu0 %v1306_v26 }
  0xec   : > { %4688 = vmatprep.subr.mxu0 %v5677_v0 }
  0xed   : > { %4689 = vmatpush3.msra.mxu0 %v1305_v27 }
  0xee   : > { %4690 = vmatprep.subr.mxu0 %v5677_v0 }
  0xef   : > { %4691 = vmatpush3.msra.mxu0 %v1304_v30 }
  0xf0   : > { %4692 = vmatprep.subr.mxu0 %v5677_v0 }
  0xf1   : > { %4693 = vmatpush3.msra.mxu0 %v1303_v31 }
  0xf2   : > { %4694 = vmatprep.subr.mxu0 %v5677_v0 }
  0xf3   : > { %4695 = vmatpush3.msra.mxu0 %v1302_v32 }
  0xf4   : > { %4718 = vmatprep.subr.mxu0 %v5677_v0 }
  0xfa   : > { %1483 = vperm.xlu0 %5120, %v1477_v54   ;;  %v1901_v54 = vld [vmem:[%s6932_s16 + $0x28] sm:$0xff] }
 0x169   : > { %v1030_v15 = vpop.xlane.xlu0 %1029 }
 0x16a   : > { %vm1031_vm4 = vcmp.eq.f32.partialorder %v1030_v15, 0.0 }
 0x16d   : > { %v1286_v34 = vpop.xlane.xlu0 %1285 }
 0x16e   : > { %vm1287_vm7 = vcmp.eq.f32.partialorder %v1286_v34, 0.0  ;;  %v1298_v34 = vld [vmem:[%s6931_s24] sm:$0x7] }
 0x175   : > { %v1484_v62 = vpop.permute.xlu0 %1483 }
 0x176   : > { %vm1489_vm13 = vcmp.eq.s32.totalorder %v1484_v62, 1 }
 0x19d   : > { %v1113_v17 = vpop.f32.mrf.mxu0 }
 0x19e   : > { %v1114_v18 = vadd.f32 %v4445_v16, %v1113_v17 }
 0x19f   : > { %v4659_v19 = vpop.f32.mrf.mxu0 }
 0x1a0   : > { %v1119_v20 = vsel %vm1031_vm4, 0.0, %v1114_v18  ;;  %vm1527_vm4 = vcmask 1042432  }
 0x1a1   : > { %4669 = vmatmul.mubr.msk.f32.vlgmr.msra.gmra.mxu1 %vm1127_vm5, %v1119_v20  ;;  %v1288_v21 = vand.u32 2147483647, %v1119_v20 }
 0x1a2   : > { %4715 = vmatprep.mubr.msk.f32.mxu1 %vm5678_vm0, %v5677_v0  ;;  %4700 = vmatpush3.msra.mxu1 %v1399_v41 }
 0x1a3   : > { %v1289_v22 = vsel %vm1127_vm5, %v1288_v21, -inf  ;;  %v1271_v28 = vpop.f32.mrf.mxu0  ;;  %4701 = vmatprep.subr.mxu1 %v5677_v0 }
 0x1a4   : > { %1290 = vmax.xlane.f32.xlu1 %v1289_v22  ;;  %4702 = vmatpush3.msra.mxu1 %v1398_v42 }
 0x1a5   : > { %v4679_v29 = vpop.f32.mrf.mxu0  ;;  %4703 = vmatprep.subr.mxu1 %v5677_v0 }
 0x1a6   : > { %4704 = vmatpush3.msra.mxu1 %v1397_v43 }
 0x1a7   : > { %4705 = vmatprep.subr.mxu1 %v5677_v0 }
 0x1a8   : > { %4706 = vmatpush3.msra.mxu1 %v1396_v44  ;;  %v1911_v44 = vld [vmem:[%s6932_s16 + $0x78] sm:$0xff] }
 0x1a9   : > { %4707 = vmatprep.subr.mxu1 %v5677_v0 }
 0x1aa   : > { %4708 = vmatpush3.msra.mxu1 %v1395_v45  ;;  %v1910_v45 = vld [vmem:[%s6932_s16 + $0x70] sm:$0xff] }
 0x1ab   : > { %4709 = vmatprep.subr.mxu1 %v5677_v0 }
 0x1ac   : > { %4710 = vmatpush3.msra.mxu1 %v1394_v46  ;;  %v1909_v46 = vld [vmem:[%s6932_s16 + $0x68] sm:$0xff] }
 0x1ad   : > { %4711 = vmatprep.subr.mxu1 %v5677_v0 }
 0x1ae   : > { %4712 = vmatpush3.msra.mxu1 %v1393_v47  ;;  %v1908_v47 = vld [vmem:[%s6932_s16 + $0x60] sm:$0xff] }
 0x1af   : > { %4713 = vmatprep.subr.mxu1 %v5677_v0 }
 0x1b0   : > { %4714 = vmatpush3.msra.mxu1 %v1392_v48  ;;  %v1907_v48 = vld [vmem:[%s6932_s16 + $0x58] sm:$0xff] }
 0x1b1   : > { %4723 = vmatprep.subr.mxu1 %v5677_v0 }
 0x1b5   : > { %1480 = vperm.xlu1 %5119, %v1476_v53   ;;  %v1902_v53 = vld [vmem:[%s6932_s16 + $0x30] sm:$0xff] }
 0x1b9   : > { %1486 = vperm.xlu1 %5119, %v1478_v55   ;;  %v1900_v55 = vld [vmem:[%s6932_s16 + $0x20] sm:$0xff] }
 0x22d   : > { %v1291_v33 = vpop.xlane.xlu1 %1290 }
 0x22e   : > { %vm1292_vm6 = vcmp.eq.f32.partialorder %v1291_v33, 0.0 }
 0x22f   : > { %vm1293_vm9 = vmand %vm1287_vm7, %vm1292_vm6  ;;  %vm1523_vm6 = vcmask 23552   ;;  %vm2108_vm7 = vcmask 253952  }
 0x231   : > { %v1481_v61 = vpop.permute.xlu1 %1480 }
 0x232   : > { %vm1488_vm15 = vcmp.eq.s32.totalorder %v1481_v61, 1 }
 0x235   : > { %v1487_v63 = vpop.permute.xlu1 %1486 }
 0x236   : > { %vm1490_vm1 = vcmp.eq.s32.totalorder %v1487_v63, 1  ;;  %v2001_v63 = vld [vmem:[#allocation15 + $0x18] sm:$0xff] }
 0x261   : > { %v1197_v35 = vpop.f32.mrf.mxu1 }
 0x262   : > { %v1272_v37 = vadd.f32 %v1271_v28, %v1197_v35  ;;  %v1297_v28 = vld [vmem:[%s6930_s1] sm:$0xff] }
 0x263   : > { %v4670_v38 = vpop.f32.mrf.mxu1 }
 0x264   : > { %v1282_v39 = vadd.f32 %v4450_v36, %v1272_v37  ;;  %v1751_v38 = vld [vmem:[#allocation14] sm:$0xff] }
 0x266   : > { %v6117_v40 = vsel %vm1293_vm9, 0.0, %v1282_v39  ;;  %vm2217_vm9 = vcmask 254977  }
 0x267   : > { %4697 = vmatmul.mubr.msk.f32.vlgmr.msra.gmra.mxu0 %vm1317_vm8, %v6117_v40 }
 0x268   : > { %4720 = vmatprep.mubr.msk.f32.mxu0 %vm5678_vm0, %v5677_v0 }
 0x327   : > { %v1387_v57 = vpop.f32.mrf.mxu0 }
 0x328   : > { %v1388_v58 = vadd.f32 %v4451_v56, %v1387_v57  ;;  %v1899_v56 = vld [vmem:[%s6932_s16 + $0x18] sm:$0xff]  ;;  %v1898_v57 = vld [vmem:[%s6932_s16 + $0x10] sm:$0xff] }
 0x329   : > { %v4698_v59 = vpop.f32.mrf.mxu0 }
 0x32a   : > { %5121 = vtanh.f32 %v1388_v58  ;;  %v1897_v58 = vld [vmem:[%s6932_s16 + $0x8] sm:$0xff]  ;;  %v1896_v59 = vld [vmem:[%s6932_s16] sm:$0xff] }
 0x337   : > { %v5122_v60 = vpop.eup %5121 }
 0x338   : > { %4716 = vmatmul.mubr.msk.f32.vlgmr.msra.gmra.mxu1 %vm1317_vm8, %v5122_v60 }
 0x339   : > { %4725 = vmatprep.mubr.msk.f32.mxu1 %vm5678_vm0, %v5677_v0 }
 0x3f8   : > { %v1469_v1 = vpop.f32.mrf.mxu1 }
 0x3f9   : > { %v1491_v2 = vsel %vm1488_vm15, %v1469_v1, -1e+30  ;;  %v1492_v3 = vsel %vm1489_vm13, %v1469_v1, -1e+30  ;;  %v1493_v4 = vsel %vm1490_vm1, %v1469_v1, -1e+30 }
 0x3fa   : > { %v1495_v5 = vsel %vm1494_vm14, %v1491_v2, -inf  ;;  %v1502_v6 = vsel %vm1494_vm14, %v1492_v3, -inf  ;;  %v1509_v7 = vsel %vm1494_vm14, %v1493_v4, -inf  ;;  %v4717_v8 = vpop.f32.mrf.mxu1  ;;  %v1999_v2 = vld [vmem:[#allocation15 + $0x8] sm:$0xff]  ;;  %vm2654_vm13 = vcmask 516352  }
 0x3fb   : > { %v1496_v9 = vrot.slane %v1495_v5, 4  ;;  %v1503_v10 = vrot.slane %v1502_v6, 4  ;;  %v1510_v11 = vrot.slane %v1509_v7, 4  ;;  %v6270_v8 = vld [vmem:[%s6843_s19] sm:$0x3]  ;;  %vm3599_vm15 = vcmask 1040384  }
 0x3fc   : > { %vm3595_vm1 = vcmask 7168  }
 0x3fd   : > { %v1497_v12 = vmax.f32 %v1495_v5, %v1496_v9  ;;  %v1504_v13 = vmax.f32 %v1502_v6, %v1503_v10  ;;  %v1511_v14 = vmax.f32 %v1509_v7, %v1510_v11  ;;  %v1914_v5 = vlaneseq }
 0x3ff   : > { %v1498_v15 = vrot.slane %v1497_v12, 2  ;;  %v1505_v16 = vrot.slane %v1504_v13, 2  ;;  %v1512_v17 = vrot.slane %v1511_v14, 2  ;;  %v6264_v6 = vshrl.u32 %v1914_v5, 7 }
 0x401   : > { %v1499_v18 = vmax.f32 %v1497_v12, %v1498_v15  ;;  %v1506_v19 = vmax.f32 %v1504_v13, %v1505_v16  ;;  %v1513_v20 = vmax.f32 %v1511_v14, %v1512_v17  ;;  %v1916_v7 = vsub.s32 0, %v6264_v6 }
 0x403   : > { %v1500_v21 = vrot.slane %v1499_v18, 1  ;;  %v1507_v22 = vrot.slane %v1506_v19, 1  ;;  %v1514_v23 = vrot.slane %v1513_v20, 1  ;;  %v1917_v10 = vrot.slane %v6270_v8, %v1916_v7 }
 0x405   : > { %v1501_v24 = vmax.f32 %v1499_v18, %v1500_v21  ;;  %v1508_v25 = vmax.f32 %v1506_v19, %v1507_v22  ;;  %v1515_v26 = vmax.f32 %v1513_v20, %v1514_v23 }
 0x407   : > { %v1520_v27 = vsel %vm1519_vm2, %v1508_v25, %v1501_v24 }
 0x408   : > { %v1522_v29 = vsel %vm1521_vm3, %v1515_v26, %v1520_v27 }
 0x409   : > { %4719 = vmatpush3.msk.msra.mxu0 %vm1527_vm4, %v1522_v29  ;;  %v6287_v29 = vld [vmem:[#allocation17 + $0x18] sm:$0xff] }
 0x40a   : > { %4721 = vmatmul.mubr.msk.f32.vlgmr.msra.gmra.mxu0 %vm1523_vm6, %v1297_v28  ;;  %4728 = vmatprep.subr.mxu0 %v5677_v0 }
 0x40b   : > { %4730 = vmatprep.mubr.msk.f32.mxu0 %vm5678_vm0, %v5677_v0 }
 0x4ca   : > { %v1596_v30 = vpop.f32.mrf.mxu0 }
 0x4cb   : > { %v1600_v31 = vsub.f32 %v1469_v1, %v1596_v30  ;;  %v2000_v1 = vld [vmem:[#allocation15 + $0x10] sm:$0xff] }
 0x4cc   : > { %v4722_v32 = vpop.f32.mrf.mxu0 }
 0x4cd   : > { %v1601_v33 = vmul.f32 1.442695, %v1600_v31  ;;  %v6291_v31 = vld [vmem:[#allocation17 + $0x10] sm:$0xff]  ;;  %v6297_v32 = vld [vmem:[#allocation17 + $0x8] sm:$0xff] }
 0x4cf   : > { %5123 = vpow2.f32 %v1601_v33  ;;  %v6301_v33 = vld [vmem:[#allocation17] sm:$0xff] }
 0x4dc   : > { %v5124_v35 = vpop.eup %5123 }
 0x4dd   : > { %4724 = vmatpush3.msra.mxu1 %v5124_v35 }
 0x4de   : > { %4726 = vmatmul.mubr.msk.f32.vlgmr.msra.gmra.mxu1 %vm1494_vm14, %v1298_v34  ;;  %4733 = vmatprep.subr.mxu1 %v5677_v0 }
 0x4df   : > { %4735 = vmatprep.mubr.msk.f32.mxu1 %vm5678_vm0, %v5677_v0  ;;  %4734 = vmatpush3.msra.mxu1 %v1751_v38 }
 0x4e0   : > { %1943 = vmatprep.subr.mxu1 %v1911_v44 }
 0x59e   : > { %v1672_v36 = vpop.f32.mrf.mxu1 }
 0x59f   : > { %4729 = vmatpush3.msk.msra.mxu0 %vm1527_vm4, %v1672_v36 }
 0x5a0   : > { %v4727_v37 = vpop.f32.mrf.mxu1  ;;  %4731 = vmatmul.mubr.msk.f32.vlgmr.msra.gmra.mxu0 %vm1523_vm6, %v1297_v28  ;;  %4738 = vmatprep.subr.mxu0 %v5677_v0 }
 0x5a1   : > { %4740 = vmatprep.mubr.msk.f32.mxu0 %vm5678_vm0, %v5677_v0 }
 0x660   : > { %v1745_v39 = vpop.f32.mrf.mxu0 }
 0x661   : > { %5125 = vrcp.f32 %v1745_v39 }
 0x662   : > { %v4732_v41 = vpop.f32.mrf.mxu0 }
 0x66e   : > { %v5126_v42 = vpop.eup %5125 }
 0x66f   : > { %v1750_v43 = vmul.f32 %v5126_v42, %v5124_v35  ;;  %v1920_v35 = vsub.s32 1, %v6264_v6 }
 0x671   : > { %4736 = vmatmul.mubr.msk.f32.vlgmr.msra.gmra.mxu1 %vm1494_vm14, %v1750_v43  ;;  %v1921_v39 = vrot.slane %v6270_v8, %v1920_v35 }
 0x672   : > { %1991 = vmatprep.mubr.f32.mxu1 %v5677_v0  ;;  %1944 = vmatpush1.msra.mxu1 %v1910_v45 }
 0x673   : > { %1945 = vmatprep.subr.mxu1 %v1909_v46 }
 0x674   : > { %1946 = vmatpush1.msra.mxu1 %v1908_v47 }
 0x675   : > { %1947 = vmatprep.subr.mxu1 %v1907_v48 }
 0x676   : > { %1948 = vmatpush1.msra.mxu1 %v1906_v49 }
 0x677   : > { %1949 = vmatprep.subr.mxu1 %v1905_v50 }
 0x678   : > { %1950 = vmatpush1.msra.mxu1 %v1904_v51 }
 0x679   : > { %1951 = vmatprep.subr.mxu1 %v1903_v52 }
 0x67a   : > { %1952 = vmatpush1.msra.mxu1 %v1902_v53 }
 0x67b   : > { %1953 = vmatprep.subr.mxu1 %v1901_v54 }
 0x67c   : > { %1954 = vmatpush1.msra.mxu1 %v1900_v55 }
 0x67d   : > { %1955 = vmatprep.subr.mxu1 %v1899_v56 }
 0x67e   : > { %1956 = vmatpush1.msra.mxu1 %v1898_v57 }
 0x67f   : > { %1957 = vmatprep.subr.mxu1 %v1897_v58 }
 0x680   : > { %1958 = vmatpush1.msra.mxu1 %v1896_v59 }
 0x681   : > { %4743 = vmatprep.subr.mxu1 %v5677_v0 }
 0x731   : > { %v1821_v60 = vpop.f32.mrf.mxu1 }
 0x732   : > { %v1825_v61 = vmul.f32 %v1821_v60, %v6117_v40  ;;  %v1998_v40 = vld [vmem:[#allocation15] sm:$0xff] }
 0x733   : > { %v4737_v62 = vpop.f32.mrf.mxu1 }
 0x734   : > { %4739 = vmatpush3.msra.mxu0 %v1825_v61 }
 0x735   : > { %4741 = vmatmul.mubr.msk.f32.vlgmr.msra.gmra.mxu0 %vm1494_vm14, %v1298_v34  ;;  %4754 = vmatprep.subr.mxu0 %v5677_v0 }
 0x736   : > { %4762 = vmatprep.mubr.msk.f32.mxu0 %vm5678_vm0, %v5677_v0  ;;  %4755 = vmatpush3.msra.mxu0 %v2001_v63 }
 0x737   : > { %4756 = vmatprep.subr.mxu0 %v5677_v0 }
 0x738   : > { %4757 = vmatpush3.msra.mxu0 %v2000_v1 }
 0x739   : > { %4758 = vmatprep.subr.mxu0 %v5677_v0 }
 0x73a   : > { %4759 = vmatpush3.msra.mxu0 %v1999_v2 }
 0x73b   : > { %4760 = vmatprep.subr.mxu0 %v5677_v0 }
 0x73c   : > { %4761 = vmatpush3.msra.mxu0 %v1998_v40 }
 0x73d   : > { %4776 = vmatprep.subr.mxu0 %v5677_v0 }
 0x7f5   : > { %v1892_v3 = vpop.f32.mrf.mxu0 }
 0x7f6   : > { %4461 = vmatmul.mubr.msk.f32.vlgmr.msra.gmra.mxu1 %vm1317_vm8, %v1892_v3 }
 0x7f7   : > { %4744 = vmatpush3.msra.mxu1 %v2001_v63  ;;  %v4742_v4 = vpop.f32.mrf.mxu0  ;;  %4751 = vmatprep.mubr.msk.f32.mxu1 %vm5678_vm0, %v5677_v0 }
 0x7f8   : > { %4745 = vmatprep.subr.mxu1 %v5677_v0 }
 0x7f9   : > { %4746 = vmatpush3.msra.mxu1 %v2000_v1 }
 0x7fa   : > { %4747 = vmatprep.subr.mxu1 %v5677_v0 }
 0x7fb   : > { %4748 = vmatpush3.msra.mxu1 %v1999_v2 }
 0x7fc   : > { %4749 = vmatprep.subr.mxu1 %v5677_v0 }
 0x7fd   : > { %4750 = vmatpush3.msra.mxu1 %v1998_v40 }
 0x7fe   : > { %4752 = vmatmul.mubr.f32.vlgmr.msra.gmra.mxu1 %v5677_v0  ;;  %4765 = vmatprep.subr.mxu1 %v5677_v0 }
 0x7ff   : > { %4766 = vmatpush3.msra.mxu1 %v2001_v63  ;;  %4773 = vmatprep.mubr.msk.f32.mxu1 %vm5678_vm0, %v5677_v0 }
 0x800   : > { %4767 = vmatprep.subr.mxu1 %v5677_v0 }
 0x801   : > { %4768 = vmatpush3.msra.mxu1 %v2000_v1 }
 0x802   : > { %4769 = vmatprep.subr.mxu1 %v5677_v0 }
 0x803   : > { %4770 = vmatpush3.msra.mxu1 %v1999_v2 }
 0x804   : > { %4771 = vmatprep.subr.mxu1 %v5677_v0 }
 0x805   : > { %4772 = vmatpush3.msra.mxu1 %v1998_v40 }
 0x806   : > { %4787 = vmatprep.subr.mxu1 %v5677_v0 }
 0x8b6   : > { %v1993_v9 = vpop.f32.mrf.mxu1 }
 0x8b7   : > { %v6277_v12 = vadd.f32 %v1993_v9, %v1917_v10 }
 0x8b8   : > { %v6275_v11 = vpop.f32.mrf.mxu1 }
 0x8b9   : > { %v6324_v42 = vadd.f32 %v6275_v11, %v1921_v39 }
 0x8be   : > { %v2075_v13 = vpop.f32.mrf.mxu1 }
 0x8bf   : > { %v2079_v14 = vadd.f32 %v2075_v13, %v6277_v12 }
 0x8c0   : > { %v4753_v15 = vpop.f32.mrf.mxu1 }
 0x8c1   : > { %5127 = vtanh.f32 %v2079_v14  ;;  %v4462_v17 = vmul.f32 -1.442695, %v2079_v14 }
 0x8c3   : > { %5129 = vpow2.f32 %v4462_v17 }
 0x8ce   : > { %v5128_v16 = vpop.eup %5127 }
 0x8cf   : > { %2089 = vrot.lane.b32.xlu1 %v5128_v16, %s5680_s9 }
 0x8d0   : > { %v5130_v18 = vpop.eup %5129 }
 0x8d1   : > { %v2083_v19 = vadd.f32 1.0, %v5130_v18 }
 0x8d3   : > { %5131 = vrcp.f32 %v2083_v19 }
 0x8e0   : > { %v5132_v20 = vpop.eup %5131 }
 0x8e1   : > { %v2087_v23 = vmul.f32 0.0, %v5132_v20 }
 0x941   : > { %v2090_v21 = vpop.permute.xlu1 %2089 }
 0x942   : > { %v2092_v22 = vmul.f32 %v5132_v20, %v2090_v21 }
 0x944   : > { %2094 = vrot.lane.b32.xlu1 %v2092_v22, %s6865_s6 }
 0x9b6   : > { %v2095_v24 = vpop.permute.xlu1 %2094 }
 0x9b7   : > { %v6282_v25 = vadd.f32 %v2095_v24, %v2087_v23 }
 0x9b9   : > { %5133 = vtanh.f32 %v6282_v25  ;;  %v2194_v60 = vrot.slane %v6282_v25, 7 }
 0x9c6   : > { %v5134_v26 = vpop.eup %5133 }
 0x9c7   : > { %2100 = vrot.lane.b32.xlu1 %v5134_v26, %s5680_s9 }
 0xa39   : > { %v2101_v27 = vpop.permute.xlu1 %2100 }
 0xa3a   : > { %v2103_v28 = vmul.f32 %v5132_v20, %v2101_v27 }
 0xa3c   : > { %2105 = vrot.lane.b32.xlu1 %v2103_v28, %s6865_s6 }
 0xaae   : > { %v2106_v30 = vpop.permute.xlu1 %2105 }
 0xaaf   : > { %2109 = vst.msk [vmem:[#allocation2] sm:$0x1] %vm2108_vm7, %v2106_v30  ;;  %4763 = vmatmul.mubr.msk.f32.vlgmr.msra.gmra.mxu0 %vm1127_vm5, %v2106_v30 }
 0xab0   : > { %4777 = vmatpush3.msra.mxu0 %v6287_v29  ;;  %4784 = vmatprep.mubr.msk.f32.mxu0 %vm5678_vm0, %v5677_v0 }
 0xab1   : > { %4778 = vmatprep.subr.mxu0 %v5677_v0 }
 0xab2   : > { %4779 = vmatpush3.msra.mxu0 %v6291_v31 }
 0xab3   : > { %4780 = vmatprep.subr.mxu0 %v5677_v0 }
 0xab4   : > { %4781 = vmatpush3.msra.mxu0 %v6297_v32 }
 0xab5   : > { %4782 = vmatprep.subr.mxu0 %v5677_v0 }
 0xab6   : > { %4783 = vmatpush3.msra.mxu0 %v6301_v33 }
 0xab7   : > { %4785 = vmatmul.mubr.f32.vlgmr.msra.gmra.mxu0 %v5677_v0  ;;  %4798 = vmatprep.subr.mxu0 %v5677_v0 }
 0xab8   : > { %4799 = vmatpush3.msra.mxu0 %v6287_v29  ;;  %4806 = vmatprep.mubr.msk.f32.mxu0 %vm5678_vm0, %v5677_v0 }
 0xab9   : > { %4800 = vmatprep.subr.mxu0 %v5677_v0 }
 0xaba   : > { %4801 = vmatpush3.msra.mxu0 %v6291_v31 }
 0xabb   : > { %4802 = vmatprep.subr.mxu0 %v5677_v0 }
 0xabc   : > { %4803 = vmatpush3.msra.mxu0 %v6297_v32 }
 0xabd   : > { %4804 = vmatprep.subr.mxu0 %v5677_v0 }
 0xabe   : > { %4805 = vmatpush3.msra.mxu0 %v6301_v33 }
 0xabf   : > { %4809 = vmatprep.subr.mxu0 %v5677_v0 }
 0xb6f   : > { %v2178_v34 = vpop.f32.mrf.mxu0 }
 0xb70   : > { %v2183_v36 = vrot.slane %v2178_v34, 7 }
 0xb71   : > { %v4764_v37 = vpop.f32.mrf.mxu0 }
 0xb72   : > { %v2185_v38 = vadd.f32 %v2183_v36, %v6277_v12 }
 0xb74   : > { %5135 = vtanh.f32 %v2185_v38  ;;  %v4464_v48 = vmul.f32 -1.442695, %v2185_v38 }
 0xb77   : > { %v2397_v41 = vpop.f32.mrf.mxu0 }
 0xb78   : > { %v2402_v43 = vrot.slane %v2397_v41, 6 }
 0xb79   : > { %v4786_v44 = vpop.f32.mrf.mxu0 }
 0xb7a   : > { %v2404_v45 = vadd.f32 %v2402_v43, %v6324_v42 }
 0xb7c   : > { %5137 = vtanh.f32 %v2404_v45  ;;  %v4467_v49 = vmul.f32 -1.442695, %v2404_v45 }
 0xb7d   : > { %5139 = vpow2.f32 %v4464_v48 }
 0xb7e   : > { %5141 = vpow2.f32 %v4467_v49 }
 0xb81   : > { %v5136_v46 = vpop.eup %5135 }
 0xb82   : > { %2198 = vrot.lane.b32.xlu1 %v5136_v46, %s5680_s9 }
 0xb89   : > { %v5138_v47 = vpop.eup %5137 }
 0xb8a   : > { %2414 = vrot.lane.b32.xlu1 %v5138_v47, %s5680_s9  ;;  %v5140_v50 = vpop.eup %5139 }
 0xb8b   : > { %v2189_v51 = vadd.f32 1.0, %v5140_v50  ;;  %v5142_v52 = vpop.eup %5141 }
 0xb8c   : > { %v2408_v53 = vadd.f32 1.0, %v5142_v52 }
 0xb8d   : > { %5143 = vrcp.f32 %v2189_v51 }
 0xb8e   : > { %5145 = vrcp.f32 %v2408_v53 }
 0xb9a   : > { %v5144_v54 = vpop.eup %5143 }
 0xb9b   : > { %v5146_v57 = vpop.eup %5145  ;;  %v2196_v61 = vmul.f32 %v5144_v54, %v2194_v60 }
 0xb9c   : > { %v2412_v1 = vmul.f32 0.0, %v5146_v57 }
 0xbf4   : > { %v2199_v55 = vpop.permute.xlu1 %2198 }
 0xbf5   : > { %v2201_v56 = vmul.f32 %v5144_v54, %v2199_v55 }
 0xbf7   : > { %2203 = vrot.lane.b32.xlu1 %v2201_v56, %s6865_s6 }
 0xbfc   : > { %v2415_v58 = vpop.permute.xlu1 %2414 }
 0xbfd   : > { %v2417_v59 = vmul.f32 %v5146_v57, %v2415_v58 }
 0xbff   : > { %2419 = vrot.lane.b32.xlu0 %v2417_v59, %s6865_s6 }
 0xc69   : > { %v2204_v62 = vpop.permute.xlu1 %2203 }
 0xc6a   : > { %v6332_v63 = vadd.f32 %v2204_v62, %v2196_v61 }
 0xc6c   : > { %5147 = vtanh.f32 %v6332_v63 }
 0xc71   : > { %v2420_v2 = vpop.permute.xlu0 %2419 }
 0xc72   : > { %v2422_v40 = vadd.f32 %v2420_v2, %v2412_v1 }
 0xc74   : > { %5149 = vtanh.f32 %v2422_v40 }
 0xc79   : > { %v5148_v3 = vpop.eup %5147 }
 0xc7a   : > { %2209 = vrot.lane.b32.xlu1 %v5148_v3, %s5680_s9 }
 0xc81   : > { %v5150_v4 = vpop.eup %5149 }
 0xc82   : > { %2425 = vrot.lane.b32.xlu0 %v5150_v4, %s5680_s9 }
 0xcec   : > { %v2210_v5 = vpop.permute.xlu1 %2209 }
 0xced   : > { %v6337_v8 = vmul.f32 %v5144_v54, %v2210_v5  ;;  %v4487_v5 = vld [vmem:[%s6932_s16 + $0xf8] sm:$0xff] }
 0xcef   : > { %v2219_v9 = vrot.slane %v6337_v8, 1 }
 0xcf1   : > { %2220 = vrot.lane.b32.xlu1 %v2219_v9, %s6865_s6  ;;  %v4485_v9 = vld [vmem:[%s6932_s16 + $0xe8] sm:$0xff] }
 0xcf4   : > { %v2426_v10 = vpop.permute.xlu0 %2425 }
 0xcf5   : > { %v6341_v11 = vmul.f32 %v5146_v57, %v2426_v10  ;;  %v4484_v10 = vld [vmem:[%s6932_s16 + $0xe0] sm:$0xff] }
 0xcf7   : > { %v2435_v13 = vrot.slane %v6341_v11, 2 }
 0xcf9   : > { %2436 = vrot.lane.b32.xlu0 %v2435_v13, %s6865_s6  ;;  %v4482_v13 = vld [vmem:[%s6932_s16 + $0xd0] sm:$0xff] }
 0xd63   : > { %v2221_v14 = vpop.permute.xlu1 %2220 }
 0xd64   : > { %4774 = vmatmul.mubr.msk.f32.vlgmr.msra.gmra.mxu1 %vm1127_vm5, %v2221_v14 }
 0xd65   : > { %4788 = vmatpush3.msra.mxu1 %v6287_v29  ;;  %4795 = vmatprep.mubr.msk.f32.mxu1 %vm5678_vm0, %v5677_v0  ;;  %v2522_v29 = vrot.slane %v2422_v40, 1 }
 0xd66   : > { %4789 = vmatprep.subr.mxu1 %v5677_v0 }
 0xd67   : > { %4790 = vmatpush3.msra.mxu1 %v6291_v31 }
 0xd68   : > { %4791 = vmatprep.subr.mxu1 %v5677_v0 }
 0xd69   : > { %4792 = vmatpush3.msra.mxu1 %v6297_v32 }
 0xd6a   : > { %4793 = vmatprep.subr.mxu1 %v5677_v0 }
 0xd6b   : > { %4794 = vmatpush3.msra.mxu1 %v6301_v33  ;;  %v2437_v15 = vpop.permute.xlu0 %2436 }
 0xd6c   : > { %4796 = vmatmul.mubr.msk.f32.vlgmr.msra.gmra.mxu1 %vm1127_vm5, %v2437_v15  ;;  %2706 = vmatprep.subr.mxu1 %v4487_v5  ;;  %v4481_v15 = vld [vmem:[%s6932_s16 + $0xc8] sm:$0xff] }
 0xd6d   : > { %2754 = vmatprep.mubr.f32.mxu1 %v5677_v0 }
 0xe24   : > { %v2290_v16 = vpop.f32.mrf.mxu1 }
 0xe25   : > { %v2295_v30 = vrot.slane %v2290_v16, 6  ;;  %v4480_v16 = vld [vmem:[%s6932_s16 + $0xc0] sm:$0xff] }
 0xe26   : > { %v4775_v17 = vpop.f32.mrf.mxu1 }
 0xe27   : > { %v2297_v34 = vadd.f32 %v2295_v30, %v6277_v12  ;;  %v2306_v12 = vrot.slane %v6332_v63, 7 }
 0xe29   : > { %v4466_v38 = vmul.f32 -1.442695, %v2297_v34 }
 0xe2c   : > { %v2506_v18 = vpop.f32.mrf.mxu1 }
 0xe2d   : > { %v2511_v19 = vrot.slane %v2506_v18, 7  ;;  %v4479_v18 = vld [vmem:[%s6932_s16 + $0xb8] sm:$0xff] }
 0xe2e   : > { %v4797_v20 = vpop.f32.mrf.mxu1 }
 0xe2f   : > { %v2513_v21 = vadd.f32 %v2511_v19, %v6324_v42  ;;  %v4478_v19 = vld [vmem:[%s6932_s16 + $0xb0] sm:$0xff] }
 0xe30   : > { %v2765_v20 = vld [vmem:[#allocation15 + $0x38] sm:$0xff] }
 0xe31   : > { %5151 = vtanh.f32 %v2513_v21  ;;  %v4469_v23 = vmul.f32 -1.442695, %v2513_v21  ;;  %v4477_v21 = vld [vmem:[%s6932_s16 + $0xa8] sm:$0xff] }
 0xe33   : > { %5153 = vpow2.f32 %v4469_v23  ;;  %v2764_v23 = vld [vmem:[#allocation15 + $0x30] sm:$0xff] }
 0xe3e   : > { %v5152_v22 = vpop.eup %5151 }
 0xe3f   : > { %2526 = vrot.lane.b32.xlu1 %v5152_v22, %s5680_s9  ;;  %v4476_v22 = vld [vmem:[%s6932_s16 + $0xa0] sm:$0xff] }
 0xe40   : > { %v5154_v24 = vpop.eup %5153 }
 0xe41   : > { %v2517_v25 = vadd.f32 1.0, %v5154_v24  ;;  %v4475_v24 = vld [vmem:[%s6932_s16 + $0x98] sm:$0xff] }
 0xe43   : > { %5155 = vrcp.f32 %v2517_v25  ;;  %v4474_v25 = vld [vmem:[%s6932_s16 + $0x90] sm:$0xff] }
 0xe50   : > { %v5156_v26 = vpop.eup %5155 }
 0xe51   : > { %v2524_v31 = vmul.f32 %v5156_v26, %v2522_v29  ;;  %v2762_v29 = vld [vmem:[#allocation15 + $0x20] sm:$0xff] }
 0xeb1   : > { %v2527_v27 = vpop.permute.xlu1 %2526 }
 0xeb2   : > { %v2529_v28 = vmul.f32 %v5156_v26, %v2527_v27  ;;  %v4473_v27 = vld [vmem:[%s6932_s16 + $0x88] sm:$0xff] }
 0xeb4   : > { %2531 = vrot.lane.b32.xlu0 %v2529_v28, %s6865_s6  ;;  %v4472_v28 = vld [vmem:[%s6932_s16 + $0x80] sm:$0xff] }
 0xf26   : > { %v2532_v32 = vpop.permute.xlu0 %2531 }
 0xf27   : > { %v2534_v33 = vadd.f32 %v2532_v32, %v2524_v31 }
 0xf29   : > { %5157 = vtanh.f32 %v2534_v33  ;;  %v2631_v40 = vrot.slane %v2534_v33, 1 }
 0xf2a   : > { %5159 = vtanh.f32 %v2297_v34 }
 0xf2b   : > { %5161 = vpow2.f32 %v4466_v38 }
 0xf36   : > { %v5158_v36 = vpop.eup %5157 }
 0xf37   : > { %2537 = vrot.lane.b32.xlu1 %v5158_v36, %s5680_s9  ;;  %v5160_v37 = vpop.eup %5159 }
 0xf38   : > { %v5162_v39 = vpop.eup %5161 }
 0xf39   : > { %v2301_v41 = vadd.f32 1.0, %v5162_v39 }
 0xf3b   : > { %2310 = vrot.lane.b32.xlu1 %v5160_v37, %s5680_s9  ;;  %5163 = vrcp.f32 %v2301_v41  ;;  %v4488_v41 = vld [vmem:[%s6843_s19 + $0x2] sm:$0x3] }
 0xf48   : > { %v5164_v46 = vpop.eup %5163 }
 0xf49   : > { %v2308_v50 = vmul.f32 %v5164_v46, %v2306_v12 }
 0xfa9   : > { %v2538_v43 = vpop.permute.xlu1 %2537 }
 0xfaa   : > { %v2540_v44 = vmul.f32 %v5156_v26, %v2538_v43  ;;  %v2763_v26 = vld [vmem:[#allocation15 + $0x28] sm:$0xff]  ;;  %v2680_v43 = vrot.slane %v4488_v41, %v1916_v7 }
 0xfac   : > { %v2547_v45 = vrot.slane %v2540_v44, 1 }
 0xfad   : > { %v2311_v47 = vpop.permute.xlu1 %2310 }
 0xfae   : > { %v2313_v48 = vmul.f32 %v5164_v46, %v2311_v47  ;;  %2548 = vrot.lane.b32.xlu0 %v2547_v45, %s6865_s6 }
 0xfb0   : > { %2315 = vrot.lane.b32.xlu1 %v2313_v48, %s6865_s6 }
0x1020   : > { %v2549_v49 = vpop.permute.xlu0 %2548 }
0x1021   : > { %4807 = vmatmul.mubr.msk.f32.vlgmr.msra.gmra.mxu0 %vm1127_vm5, %v2549_v49 }
0x1022   : > { %v2316_v51 = vpop.permute.xlu1 %2315  ;;  %4817 = vmatprep.mubr.msk.f32.mxu0 %vm5678_vm0, %v5677_v0  ;;  %4810 = vmatpush3.msra.mxu0 %v2765_v20 }
0x1023   : > { %v2318_v52 = vadd.f32 %v2316_v51, %v2308_v50  ;;  %4811 = vmatprep.subr.mxu0 %v5677_v0 }
0x1024   : > { %4812 = vmatpush3.msra.mxu0 %v2764_v23 }
0x1025   : > { %5165 = vtanh.f32 %v2318_v52  ;;  %4813 = vmatprep.subr.mxu0 %v5677_v0 }
0x1026   : > { %4814 = vmatpush3.msra.mxu0 %v2763_v26 }
0x1027   : > { %4815 = vmatprep.subr.mxu0 %v5677_v0 }
0x1028   : > { %4816 = vmatpush3.msra.mxu0 %v2762_v29 }
0x1029   : > { %4818 = vmatmul.mubr.f32.vlgmr.msra.gmra.mxu0 %v5677_v0  ;;  %4820 = vmatprep.subr.mxu0 %v5677_v0 }
0x102a   : > { %4821 = vmatpush3.msra.mxu0 %v2765_v20  ;;  %4828 = vmatprep.mubr.msk.f32.mxu0 %vm5678_vm0, %v5677_v0 }
0x102b   : > { %4822 = vmatprep.subr.mxu0 %v5677_v0 }
0x102c   : > { %4823 = vmatpush3.msra.mxu0 %v2764_v23 }
0x102d   : > { %4824 = vmatprep.subr.mxu0 %v5677_v0 }
0x102e   : > { %4825 = vmatpush3.msra.mxu0 %v2763_v26 }
0x102f   : > { %4826 = vmatprep.subr.mxu0 %v5677_v0 }
0x1030   : > { %4827 = vmatpush3.msra.mxu0 %v2762_v29 }
0x1031   : > { %4842 = vmatprep.subr.mxu0 %v5677_v0 }
0x1032   : > { %v5166_v53 = vpop.eup %5165 }
0x1033   : > { %2321 = vrot.lane.b32.xlu1 %v5166_v53, %s5680_s9 }
0x1037   : > { %2214 = vrot.lane.b32.xlu1 %v6337_v8, %s6865_s6  ;;  %v4486_v8 = vld [vmem:[%s6932_s16 + $0xf0] sm:$0xff] }
0x1038   : > { %2707 = vmatpush1.msra.mxu1 %v4486_v8 }
0x1039   : > { %2708 = vmatprep.subr.mxu1 %v4485_v9 }
0x103a   : > { %2709 = vmatpush1.msra.mxu1 %v4484_v10 }
0x103b   : > { %2430 = vrot.lane.b32.xlu1 %v6341_v11, %s5680_s9  ;;  %v4483_v11 = vld [vmem:[%s6932_s16 + $0xd8] sm:$0xff] }
0x103c   : > { %2710 = vmatprep.subr.mxu1 %v4483_v11 }
0x103d   : > { %2711 = vmatpush1.msra.mxu1 %v4482_v13 }
0x103e   : > { %2712 = vmatprep.subr.mxu1 %v4481_v15 }
0x103f   : > { %2713 = vmatpush1.msra.mxu1 %v4480_v16 }
0x1040   : > { %2714 = vmatprep.subr.mxu1 %v4479_v18 }
0x1041   : > { %2715 = vmatpush1.msra.mxu1 %v4478_v19 }
0x1042   : > { %2716 = vmatprep.subr.mxu1 %v4477_v21 }
0x1043   : > { %2717 = vmatpush1.msra.mxu1 %v4476_v22 }
0x1044   : > { %2718 = vmatprep.subr.mxu1 %v4475_v24 }
0x1045   : > { %2719 = vmatpush1.msra.mxu1 %v4474_v25 }
0x1046   : > { %2720 = vmatprep.subr.mxu1 %v4473_v27 }
0x1047   : > { %2721 = vmatpush1.msra.mxu1 %v4472_v28 }
0x1048   : > { %4831 = vmatprep.subr.mxu1 %v5677_v0 }
0x10a5   : > { %v2322_v54 = vpop.permute.xlu1 %2321 }
0x10a6   : > { %v2324_v17 = vmul.f32 %v5164_v46, %v2322_v54 }
0x10a9   : > { %v2215_v55 = vpop.permute.xlu1 %2214 }
0x10aa   : > { %2218 = vst.msk [vmem:[#allocation2] sm:$0x2] %vm2217_vm9, %v2215_v55 }
0x10ad   : > { %v2431_v33 = vpop.permute.xlu1 %2430 }
0x10e1   : > { %v2618_v56 = vpop.f32.mrf.mxu0 }
0x10e2   : > { %v2622_v57 = vadd.f32 %v2618_v56, %v6324_v42 }
0x10e3   : > { %v4808_v58 = vpop.f32.mrf.mxu0 }
0x10e4   : > { %5167 = vtanh.f32 %v2622_v57  ;;  %v4471_v60 = vmul.f32 -1.442695, %v2622_v57  ;;  %v6473_v58 = vld [vmem:[#allocation17 + $0x38] sm:$0xff] }
0x10e6   : > { %5169 = vpow2.f32 %v4471_v60  ;;  %v6477_v60 = vld [vmem:[#allocation17 + $0x30] sm:$0xff] }
0x10e9   : > { %v2837_v38 = vpop.f32.mrf.mxu0 }
0x10eb   : > { %v4819_v39 = vpop.f32.mrf.mxu0 }
0x10f1   : > { %v5168_v59 = vpop.eup %5167 }
0x10f2   : > { %2635 = vrot.lane.b32.xlu0 %v5168_v59, %s5680_s9 }
0x10f3   : > { %v5170_v61 = vpop.eup %5169 }
0x10f4   : > { %v2626_v62 = vadd.f32 1.0, %v5170_v61  ;;  %v6483_v61 = vld [vmem:[#allocation17 + $0x28] sm:$0xff] }
0x10f6   : > { %5171 = vrcp.f32 %v2626_v62  ;;  %v6487_v62 = vld [vmem:[#allocation17 + $0x20] sm:$0xff] }
0x1103   : > { %v6377_v63 = vpop.eup %5171 }
0x1104   : > { %v2633_v42 = vmul.f32 %v6377_v63, %v2631_v40 }
0x1164   : > { %v2636_v1 = vpop.permute.xlu0 %2635 }
0x1165   : > { %v2638_v2 = vmul.f32 %v6377_v63, %v2636_v1 }
0x1167   : > { %2640 = vrot.lane.b32.xlu0 %v2638_v2, %s6865_s6  ;;  %s6933_s6 = smov 32  }
0x11d9   : > { %v2641_v3 = vpop.permute.xlu0 %2640 }
0x11da   : > { %v2643_v4 = vadd.f32 %v2641_v3, %v2633_v42  ;;  %v2684_v42 = vrot.slane %v4488_v41, %v1920_v35 }
0x11dc   : > { %5173 = vtanh.f32 %v2643_v4 }
0x11e9   : > { %v5174_v14 = vpop.eup %5173 }
0x11ea   : > { %2646 = vrot.lane.b32.xlu0 %v5174_v14, %s5680_s9 }
0x11ee   : > { %2326 = vrot.lane.b32.xlu0 %v2324_v17, %s6933_s6 }
0x11f2   : > { %2542 = vrot.lane.b32.xlu0 %v2540_v44, %s5680_s9 }
0x125c   : > { %v2647_v30 = vpop.permute.xlu0 %2646 }
0x125d   : > { %v2649_v31 = vmul.f32 %v6377_v63, %v2647_v30 }
0x125f   : > { %2651 = vrot.lane.b32.xlu1 %v2649_v31, %s5680_s9 }
0x1260   : > { %v2327_v32 = vpop.permute.xlu0 %2326 }
0x1261   : > { %2330 = vst.msk [vmem:[#allocation2] sm:$0x4] %vm2329_vm10, %v2327_v32 }
0x1262   : > { %2434 = vst.msk [vmem:[#allocation2] sm:$0x4] %vm2433_vm11, %v2431_v33 }
0x1264   : > { %v2543_v34 = vpop.permute.xlu0 %2542 }
0x1265   : > { %2546 = vst.msk [vmem:[#allocation2] sm:$0x2] %vm2545_vm12, %v2543_v34 }
0x12d1   : > { %v2652_v36 = vpop.permute.xlu1 %2651 }
0x12d2   : > { %2655 = vst.msk [vmem:[#allocation2] sm:$0x1] %vm2654_vm13, %v2652_v36 }
0x12d9   : > { %v2656_v37 = vld [vmem:[#allocation2] sm:$0x7] }
0x12da   : > { %4489 = vmatmul.mubr.msk.f32.vlgmr.msra.gmra.mxu1 %vm1317_vm8, %v2656_v37 }
0x12db   : > { %4832 = vmatpush3.msra.mxu1 %v2765_v20  ;;  %4839 = vmatprep.mubr.msk.f32.mxu1 %vm5678_vm0, %v5677_v0 }
0x12dc   : > { %4833 = vmatprep.subr.mxu1 %v5677_v0 }
0x12dd   : > { %4834 = vmatpush3.msra.mxu1 %v2764_v23 }
0x12de   : > { %4835 = vmatprep.subr.mxu1 %v5677_v0 }
0x12df   : > { %4836 = vmatpush3.msra.mxu1 %v2763_v26 }
0x12e0   : > { %4837 = vmatprep.subr.mxu1 %v5677_v0 }
0x12e1   : > { %4838 = vmatpush3.msra.mxu1 %v2762_v29 }
0x12e2   : > { %4853 = vmatprep.subr.mxu1 %v5677_v0 }
0x139a   : > { %v2756_v44 = vpop.f32.mrf.mxu1 }
0x139b   : > { %v6463_v45 = vadd.f32 %v2756_v44, %v2680_v43 }
0x139c   : > { %v2758_v3 = vpop.f32.mrf.mxu1 }
0x139d   : > { %v2841_v46 = vadd.f32 %v2837_v38, %v6463_v45  ;;  %v6507_v5 = vadd.f32 %v2758_v3, %v2684_v42 }
0x139f   : > { %5175 = vtanh.f32 %v2841_v46  ;;  %v4490_v48 = vmul.f32 -1.442695, %v2841_v46 }
0x13a1   : > { %5177 = vpow2.f32 %v4490_v48 }
0x13ac   : > { %v5176_v47 = vpop.eup %5175 }
0x13ad   : > { %2851 = vrot.lane.b32.xlu0 %v5176_v47, %s5680_s9 }
0x13ae   : > { %v5178_v12 = vpop.eup %5177 }
0x13af   : > { %v2845_v49 = vadd.f32 1.0, %v5178_v12 }
0x13b1   : > { %5179 = vrcp.f32 %v2845_v49 }
0x13be   : > { %v5180_v50 = vpop.eup %5179 }
0x13bf   : > { %v2849_v7 = vmul.f32 0.0, %v5180_v50 }
0x141f   : > { %v2852_v51 = vpop.permute.xlu0 %2851 }
0x1420   : > { %v2854_v52 = vmul.f32 %v5180_v50, %v2852_v51 }
0x1422   : > { %2856 = vrot.lane.b32.xlu1 %v2854_v52, %s6933_s6 }
0x1494   : > { %v2857_v53 = vpop.permute.xlu1 %2856 }
0x1495   : > { %v6468_v54 = vadd.f32 %v2857_v53, %v2849_v7 }
0x1497   : > { %5181 = vtanh.f32 %v6468_v54  ;;  %v2955_v25 = vrot.slane %v6468_v54, 7 }
0x14a4   : > { %v5182_v55 = vpop.eup %5181 }
0x14a5   : > { %2862 = vrot.lane.b32.xlu0 %v5182_v55, %s5680_s9 }
0x1517   : > { %v2863_v56 = vpop.permute.xlu0 %2862 }
0x1518   : > { %v2865_v57 = vmul.f32 %v5180_v50, %v2863_v56 }
0x151a   : > { %2867 = vrot.lane.b32.xlu1 %v2865_v57, %s6933_s6 }
0x158c   : > { %v2868_v59 = vpop.permute.xlu1 %2867 }
0x158d   : > { %2870 = vst.msk [vmem:[#allocation2] sm:$0x1] %vm2108_vm7, %v2868_v59  ;;  %4829 = vmatmul.mubr.msk.f32.vlgmr.msra.gmra.mxu0 %vm1127_vm5, %v2868_v59 }
0x158e   : > { %4843 = vmatpush3.msra.mxu0 %v6473_v58  ;;  %4850 = vmatprep.mubr.msk.f32.mxu0 %vm5678_vm0, %v5677_v0 }
0x158f   : > { %4844 = vmatprep.subr.mxu0 %v5677_v0 }
0x1590   : > { %4845 = vmatpush3.msra.mxu0 %v6477_v60 }
0x1591   : > { %4846 = vmatprep.subr.mxu0 %v5677_v0 }
0x1592   : > { %4847 = vmatpush3.msra.mxu0 %v6483_v61 }
0x1593   : > { %4848 = vmatprep.subr.mxu0 %v5677_v0 }
0x1594   : > { %4849 = vmatpush3.msra.mxu0 %v6487_v62 }
0x1595   : > { %4851 = vmatmul.mubr.f32.vlgmr.msra.gmra.mxu0 %v5677_v0  ;;  %4864 = vmatprep.subr.mxu0 %v5677_v0 }
0x1596   : > { %4865 = vmatpush3.msra.mxu0 %v6473_v58  ;;  %4872 = vmatprep.mubr.msk.f32.mxu0 %vm5678_vm0, %v5677_v0 }
0x1597   : > { %4866 = vmatprep.subr.mxu0 %v5677_v0 }
0x1598   : > { %4867 = vmatpush3.msra.mxu0 %v6477_v60 }
0x1599   : > { %4868 = vmatprep.subr.mxu0 %v5677_v0 }
0x159a   : > { %4869 = vmatpush3.msra.mxu0 %v6483_v61 }
0x159b   : > { %4870 = vmatprep.subr.mxu0 %v5677_v0 }
0x159c   : > { %4871 = vmatpush3.msra.mxu0 %v6487_v62 }
0x159d   : > { %4894 = vmatprep.subr.mxu0 %v5677_v0 }
0x164d   : > { %v2939_v63 = vpop.f32.mrf.mxu0 }
0x164e   : > { %v2944_v1 = vrot.slane %v2939_v63, 7 }
0x164f   : > { %v4830_v2 = vpop.f32.mrf.mxu0 }
0x1650   : > { %v2946_v40 = vadd.f32 %v2944_v1, %v6463_v45 }
0x1652   : > { %5183 = vtanh.f32 %v2946_v40  ;;  %v4492_v14 = vmul.f32 -1.442695, %v2946_v40 }
0x1655   : > { %v3156_v4 = vpop.f32.mrf.mxu0 }
0x1656   : > { %v3161_v8 = vrot.slane %v3156_v4, 6 }
0x1657   : > { %v4852_v9 = vpop.f32.mrf.mxu0 }
0x1658   : > { %v3163_v10 = vadd.f32 %v3161_v8, %v6507_v5 }
0x165a   : > { %5185 = vtanh.f32 %v3163_v10  ;;  %v4495_v15 = vmul.f32 -1.442695, %v3163_v10 }
0x165b   : > { %5187 = vpow2.f32 %v4492_v14 }
0x165c   : > { %5189 = vpow2.f32 %v4495_v15 }
0x165f   : > { %v5184_v11 = vpop.eup %5183 }
0x1660   : > { %2959 = vrot.lane.b32.xlu0 %v5184_v11, %s5680_s9 }
0x1667   : > { %v5186_v13 = vpop.eup %5185 }
0x1668   : > { %3173 = vrot.lane.b32.xlu1 %v5186_v13, %s5680_s9  ;;  %v5188_v35 = vpop.eup %5187 }
0x1669   : > { %v2950_v16 = vadd.f32 1.0, %v5188_v35  ;;  %v5190_v17 = vpop.eup %5189 }
0x166a   : > { %v3167_v18 = vadd.f32 1.0, %v5190_v17 }
0x166b   : > { %5191 = vrcp.f32 %v2950_v16 }
0x166c   : > { %5193 = vrcp.f32 %v3167_v18 }
0x1678   : > { %v5192_v19 = vpop.eup %5191 }
0x1679   : > { %v5194_v22 = vpop.eup %5193  ;;  %v2957_v26 = vmul.f32 %v5192_v19, %v2955_v25 }
0x167a   : > { %v3171_v29 = vmul.f32 0.0, %v5194_v22 }
0x16d2   : > { %v2960_v20 = vpop.permute.xlu0 %2959 }
0x16d3   : > { %v2962_v21 = vmul.f32 %v5192_v19, %v2960_v20 }
0x16d5   : > { %2964 = vrot.lane.b32.xlu0 %v2962_v21, %s6933_s6 }
0x16da   : > { %v3174_v23 = vpop.permute.xlu1 %3173 }
0x16db   : > { %v3176_v24 = vmul.f32 %v5194_v22, %v3174_v23 }
0x16dd   : > { %3178 = vrot.lane.b32.xlu1 %v3176_v24, %s6933_s6 }
0x1747   : > { %v2965_v27 = vpop.permute.xlu0 %2964 }
0x1748   : > { %v6515_v28 = vadd.f32 %v2965_v27, %v2957_v26 }
0x174a   : > { %5195 = vtanh.f32 %v6515_v28 }
0x174f   : > { %v3179_v30 = vpop.permute.xlu1 %3178 }
0x1750   : > { %v3181_v31 = vadd.f32 %v3179_v30, %v3171_v29 }
0x1752   : > { %5197 = vtanh.f32 %v3181_v31  ;;  %v3280_v57 = vrot.slane %v3181_v31, 1 }
0x1757   : > { %v5196_v32 = vpop.eup %5195 }
0x1758   : > { %2970 = vrot.lane.b32.xlu0 %v5196_v32, %s5680_s9 }
0x175f   : > { %v5198_v33 = vpop.eup %5197 }
0x1760   : > { %3184 = vrot.lane.b32.xlu1 %v5198_v33, %s5680_s9  ;;  %v3419_v33 = vld [vmem:[#allocation11 + $0x30] sm:$0xff] }
0x17ca   : > { %v2971_v34 = vpop.permute.xlu0 %2970 }
0x17cb   : > { %v6520_v36 = vmul.f32 %v5192_v19, %v2971_v34  ;;  %v3418_v34 = vld [vmem:[#allocation11 + $0x28] sm:$0xff] }
0x17cd   : > { %v2979_v37 = vrot.slane %v6520_v36, 1 }
0x17cf   : > { %2980 = vrot.lane.b32.xlu0 %v2979_v37, %s6933_s6  ;;  %v3417_v37 = vld [vmem:[#allocation11 + $0x20] sm:$0xff] }
0x17d2   : > { %v3185_v38 = vpop.permute.xlu1 %3184 }
0x17d3   : > { %v6524_v39 = vmul.f32 %v5194_v22, %v3185_v38 }
0x17d5   : > { %v3193_v41 = vrot.slane %v6524_v39, 2 }
0x17d7   : > { %3194 = vrot.lane.b32.xlu1 %v3193_v41, %s6933_s6  ;;  %v3415_v41 = vld [vmem:[#allocation11 + $0x10] sm:$0xff] }
0x1841   : > { %v2981_v43 = vpop.permute.xlu0 %2980 }
0x1842   : > { %4840 = vmatmul.mubr.msk.f32.vlgmr.msra.gmra.mxu1 %vm1127_vm5, %v2981_v43  ;;  %v3414_v43 = vld [vmem:[#allocation11 + $0x8] sm:$0xff] }
0x1843   : > { %4854 = vmatpush3.msra.mxu1 %v6473_v58  ;;  %4861 = vmatprep.mubr.msk.f32.mxu1 %vm5678_vm0, %v5677_v0 }
0x1844   : > { %4855 = vmatprep.subr.mxu1 %v5677_v0 }
0x1845   : > { %4856 = vmatpush3.msra.mxu1 %v6477_v60 }
0x1846   : > { %4857 = vmatprep.subr.mxu1 %v5677_v0 }
0x1847   : > { %4858 = vmatpush3.msra.mxu1 %v6483_v61 }
0x1848   : > { %4859 = vmatprep.subr.mxu1 %v5677_v0 }
0x1849   : > { %4860 = vmatpush3.msra.mxu1 %v6487_v62  ;;  %v3195_v44 = vpop.permute.xlu1 %3194 }
0x184a   : > { %4862 = vmatmul.mubr.msk.f32.vlgmr.msra.gmra.mxu1 %vm1127_vm5, %v3195_v44  ;;  %4875 = vmatprep.subr.mxu1 %v5677_v0  ;;  %v3413_v44 = vld [vmem:[#allocation11] sm:$0xff] }
0x184b   : > { %4891 = vmatprep.mubr.msk.f32.mxu1 %vm5678_vm0, %v5677_v0 }
0x1902   : > { %v3050_v46 = vpop.f32.mrf.mxu1 }
0x1903   : > { %v3055_v58 = vrot.slane %v3050_v46, 6 }
0x1904   : > { %v4841_v47 = vpop.f32.mrf.mxu1 }
0x1905   : > { %v3057_v62 = vadd.f32 %v3055_v58, %v6463_v45  ;;  %v3066_v45 = vrot.slane %v6515_v28, 7  ;;  %v3502_v58 = vld [vmem:[%s6934_s14] sm:$0xff] }
0x1907   : > { %v4494_v2 = vmul.f32 -1.442695, %v3057_v62 }
0x190a   : > { %v3264_v48 = vpop.f32.mrf.mxu1 }
0x190b   : > { %v3269_v12 = vrot.slane %v3264_v48, 7 }
0x190c   : > { %v4863_v49 = vpop.f32.mrf.mxu1 }
0x190d   : > { %v3271_v50 = vadd.f32 %v3269_v12, %v6507_v5 }
0x190f   : > { %5199 = vtanh.f32 %v3271_v50  ;;  %v4497_v52 = vmul.f32 -1.442695, %v3271_v50 }
0x1911   : > { %5201 = vpow2.f32 %v4497_v52  ;;  %v3509_v52 = vld [vmem:[%s6934_s14 + $0x38] sm:$0xff] }
0x191c   : > { %v5200_v51 = vpop.eup %5199 }
0x191d   : > { %3284 = vrot.lane.b32.xlu0 %v5200_v51, %s5680_s9 }
0x191e   : > { %v5202_v7 = vpop.eup %5201 }
0x191f   : > { %v3275_v53 = vadd.f32 1.0, %v5202_v7  ;;  %v3508_v7 = vld [vmem:[%s6934_s14 + $0x30] sm:$0xff] }
0x1921   : > { %5203 = vrcp.f32 %v3275_v53  ;;  %v3507_v53 = vld [vmem:[%s6934_s14 + $0x28] sm:$0xff] }
0x192e   : > { %v5204_v54 = vpop.eup %5203 }
0x192f   : > { %v3282_v59 = vmul.f32 %v5204_v54, %v3280_v57  ;;  %v3503_v57 = vld [vmem:[%s6934_s14 + $0x8] sm:$0xff] }
0x198f   : > { %v3285_v55 = vpop.permute.xlu0 %3284 }
0x1990   : > { %v3287_v56 = vmul.f32 %v5204_v54, %v3285_v55  ;;  %v3505_v55 = vld [vmem:[%s6934_s14 + $0x18] sm:$0xff] }
0x1992   : > { %3289 = vrot.lane.b32.xlu1 %v3287_v56, %s6933_s6  ;;  %v3504_v56 = vld [vmem:[%s6934_s14 + $0x10] sm:$0xff] }
0x1a04   : > { %v3290_v60 = vpop.permute.xlu1 %3289 }
0x1a05   : > { %v3292_v61 = vadd.f32 %v3290_v60, %v3282_v59  ;;  %v4500_v59 = vld [vmem:[#allocation12] ss:$0 sm:$0xff] }
0x1a07   : > { %5205 = vtanh.f32 %v3292_v61  ;;  %v3388_v29 = vrot.slane %v3292_v61, 1 }
0x1a08   : > { %5207 = vtanh.f32 %v3057_v62 }
0x1a09   : > { %5209 = vpow2.f32 %v4494_v2 }
0x1a14   : > { %v5206_v63 = vpop.eup %5205 }
0x1a15   : > { %3295 = vrot.lane.b32.xlu0 %v5206_v63, %s5680_s9  ;;  %v5208_v1 = vpop.eup %5207 }
0x1a16   : > { %v5210_v40 = vpop.eup %5209 }
0x1a17   : > { %v3061_v42 = vadd.f32 1.0, %v5210_v40 }
0x1a19   : > { %3070 = vrot.lane.b32.xlu0 %v5208_v1, %s5680_s9  ;;  %5211 = vrcp.f32 %v3061_v42 }
0x1a26   : > { %v5212_v9 = vpop.eup %5211 }
0x1a27   : > { %v3068_v14 = vmul.f32 %v5212_v9, %v3066_v45 }
0x1a87   : > { %v3296_v3 = vpop.permute.xlu0 %3295 }
0x1a88   : > { %v3298_v4 = vmul.f32 %v5204_v54, %v3296_v3  ;;  %v3506_v54 = vld [vmem:[%s6934_s14 + $0x20] sm:$0xff] }
0x1a8a   : > { %v3304_v8 = vrot.slane %v3298_v4, 1 }
0x1a8b   : > { %v3071_v10 = vpop.permute.xlu0 %3070 }
0x1a8c   : > { %v3073_v11 = vmul.f32 %v5212_v9, %v3071_v10  ;;  %3305 = vrot.lane.b32.xlu1 %v3304_v8, %s6933_s6 }
0x1a8e   : > { %3075 = vrot.lane.b32.xlu0 %v3073_v11, %s6933_s6  ;;  %v5682_v11 = vmov 1.0  }
0x1afe   : > { %v3306_v13 = vpop.permute.xlu1 %3305 }
0x1aff   : > { %4873 = vmatmul.mubr.msk.f32.vlgmr.msra.gmra.mxu0 %vm1127_vm5, %v3306_v13  ;;  %vm3587_vm5 = vcmask 59392  }
0x1b00   : > { %v3076_v15 = vpop.permute.xlu0 %3075  ;;  %4910 = vmatprep.mubr.msk.f32.mxu0 %vm5678_vm0, %v5677_v0  ;;  %4895 = vmatpush3.msra.mxu0 %v3509_v52 }
0x1b01   : > { %v3078_v35 = vadd.f32 %v3076_v15, %v3068_v14  ;;  %4896 = vmatprep.subr.mxu0 %v5677_v0 }
0x1b02   : > { %4897 = vmatpush3.msra.mxu0 %v3508_v7 }
0x1b03   : > { %5213 = vtanh.f32 %v3078_v35  ;;  %4898 = vmatprep.subr.mxu0 %v5677_v0 }
0x1b04   : > { %4899 = vmatpush3.msra.mxu0 %v3507_v53 }
0x1b05   : > { %4900 = vmatprep.subr.mxu0 %v5677_v0 }
0x1b06   : > { %4901 = vmatpush3.msra.mxu0 %v3506_v54 }
0x1b07   : > { %4902 = vmatprep.subr.mxu0 %v5677_v0 }
0x1b08   : > { %4903 = vmatpush3.msra.mxu0 %v3505_v55 }
0x1b09   : > { %4904 = vmatprep.subr.mxu0 %v5677_v0 }
0x1b0a   : > { %4905 = vmatpush3.msra.mxu0 %v3504_v56 }
0x1b0b   : > { %4906 = vmatprep.subr.mxu0 %v5677_v0 }
0x1b0c   : > { %4907 = vmatpush3.msra.mxu0 %v3503_v57 }
0x1b0d   : > { %4908 = vmatprep.subr.mxu0 %v5677_v0 }
0x1b0e   : > { %4909 = vmatpush3.msra.mxu0 %v3502_v58 }
0x1b0f   : > { %4918 = vmatprep.subr.mxu0 %v5677_v0 }
0x1b10   : > { %v5214_v16 = vpop.eup %5213 }
0x1b11   : > { %3081 = vrot.lane.b32.xlu0 %v5214_v16, %s5680_s9 }
0x1b15   : > { %2975 = vrot.lane.b32.xlu0 %v6520_v36, %s6933_s6 }
0x1b19   : > { %3189 = vrot.lane.b32.xlu0 %v6524_v39, %s5680_s9  ;;  %v3416_v39 = vld [vmem:[#allocation11 + $0x18] sm:$0xff] }
0x1b83   : > { %v3082_v17 = vpop.permute.xlu0 %3081 }
0x1b84   : > { %v3084_v38 = vmul.f32 %v5212_v9, %v3082_v17 }
0x1b87   : > { %v2976_v18 = vpop.permute.xlu0 %2975 }
0x1b88   : > { %2978 = vst.msk [vmem:[#allocation2] sm:$0x2] %vm2217_vm9, %v2976_v18  ;;  %v3826_v18 = vld [vmem:[#allocation14] sm:$0xff] }
0x1b8b   : > { %v3190_v12 = vpop.permute.xlu0 %3189 }
0x1bbf   : > { %v3375_v19 = vpop.f32.mrf.mxu0 }
0x1bc0   : > { %v3379_v20 = vadd.f32 %v3375_v19, %v6507_v5  ;;  %v3420_v5 = vld [vmem:[#allocation11 + $0x38] sm:$0xff] }
0x1bc1   : > { %v4874_v21 = vpop.f32.mrf.mxu0  ;;  %4876 = vmatpush3.msra.mxu1 %v3420_v5  ;;  %v3974_v5 = vld [vmem:[%s6844_s20] sm:$0xff] }
0x1bc2   : > { %5215 = vtanh.f32 %v3379_v20  ;;  %v4499_v23 = vmul.f32 -1.442695, %v3379_v20  ;;  %4877 = vmatprep.subr.mxu1 %v5677_v0 }
0x1bc3   : > { %4878 = vmatpush3.msra.mxu1 %v3419_v33 }
0x1bc4   : > { %5217 = vpow2.f32 %v4499_v23  ;;  %4879 = vmatprep.subr.mxu1 %v5677_v0  ;;  %v3981_v23 = vld [vmem:[%s6844_s20 + $0x38] sm:$0xff] }
0x1bc5   : > { %4880 = vmatpush3.msra.mxu1 %v3418_v34 }
0x1bc6   : > { %4881 = vmatprep.subr.mxu1 %v5677_v0 }
0x1bc7   : > { %4882 = vmatpush3.msra.mxu1 %v3417_v37 }
0x1bc8   : > { %4883 = vmatprep.subr.mxu1 %v5677_v0 }
0x1bc9   : > { %4884 = vmatpush3.msra.mxu1 %v3416_v39 }
0x1bca   : > { %4885 = vmatprep.subr.mxu1 %v5677_v0 }
0x1bcb   : > { %4886 = vmatpush3.msra.mxu1 %v3415_v41 }
0x1bcc   : > { %4887 = vmatprep.subr.mxu1 %v5677_v0 }
0x1bcd   : > { %4888 = vmatpush3.msra.mxu1 %v3414_v43  ;;  %v5684_v43 = vmov 1966171168  }
0x1bce   : > { %4889 = vmatprep.subr.mxu1 %v5677_v0 }
0x1bcf   : > { %v5216_v22 = vpop.eup %5215  ;;  %4890 = vmatpush3.msra.mxu1 %v3413_v44  ;;  %v4069_v44 = vunpack.c.l.s4 %v5684_v43 }
0x1bd0   : > { %3392 = vrot.lane.b32.xlu1 %v5216_v22, %s5680_s9  ;;  %4913 = vmatprep.subr.mxu1 %v5677_v0 }
0x1bd1   : > { %v5218_v24 = vpop.eup %5217 }
0x1bd2   : > { %v3383_v25 = vadd.f32 1.0, %v5218_v24  ;;  %v3980_v24 = vld [vmem:[%s6844_s20 + $0x30] sm:$0xff] }
0x1bd4   : > { %5219 = vrcp.f32 %v3383_v25  ;;  %v3979_v25 = vld [vmem:[%s6844_s20 + $0x28] sm:$0xff] }
0x1be1   : > { %v5220_v26 = vpop.eup %5219 }
0x1be2   : > { %v3390_v30 = vmul.f32 %v5220_v26, %v3388_v29  ;;  %v3975_v29 = vld [vmem:[%s6844_s20 + $0x8] sm:$0xff] }
0x1c42   : > { %v3393_v27 = vpop.permute.xlu1 %3392 }
0x1c43   : > { %v3395_v28 = vmul.f32 %v5220_v26, %v3393_v27  ;;  %v3977_v27 = vld [vmem:[%s6844_s20 + $0x18] sm:$0xff] }
0x1c45   : > { %3397 = vrot.lane.b32.xlu1 %v3395_v28, %s6933_s6  ;;  %v3976_v28 = vld [vmem:[%s6844_s20 + $0x10] sm:$0xff] }
0x1cb7   : > { %v3398_v31 = vpop.permute.xlu1 %3397 }
0x1cb8   : > { %v3400_v32 = vadd.f32 %v3398_v31, %v3390_v30 }
0x1cba   : > { %5221 = vtanh.f32 %v3400_v32 }
0x1cc7   : > { %v5222_v36 = vpop.eup %5221 }
0x1cc8   : > { %3403 = vrot.lane.b32.xlu1 %v5222_v36, %s5680_s9 }
0x1ccc   : > { %3086 = vrot.lane.b32.xlu1 %v3084_v38, %s6933_s6  ;;  %s4096_s6 = sand.u32 1, %s5850_s28  }
0x1ccd   : > { %s6693_s0 = scalar_lea.sflag [#allocation22], %s4096_s6 }
0x1cd0   : > { %3300 = vrot.lane.b32.xlu1 %v3298_v4, %s5680_s9 }
0x1d3a   : > { %v3404_v46 = vpop.permute.xlu1 %3403 }
0x1d3b   : > { %v3406_v47 = vmul.f32 %v5220_v26, %v3404_v46  ;;  %v3978_v26 = vld [vmem:[%s6844_s20 + $0x20] sm:$0xff]  ;;  %v4070_v46 = vunpack.c.0.s8 %v4069_v44 }
0x1d3d   : > { %3408 = vrot.lane.b32.xlu0 %v3406_v47, %s5680_s9  ;;  %s1001_s9 = scalar_lea.vmem [#allocation21], %s6018_s13  ;;  %v4073_v47 = vsub.s32 %v4070_v46, %v6264_v6 }
0x1d3e   : > { %v3087_v48 = vpop.permute.xlu1 %3086  ;;  %s4130_s18 = sshll.u32 %s1001_s9, 4  ;;  %s4131_s18 = int_to_ptr.vmem [resolvable:$true] %s4130_s18 }
0x1d3f   : > { %3089 = vst.msk [vmem:[#allocation2] sm:$0x4] %vm2329_vm10, %v3087_v48  ;;  %s5493_s1 = scalar_lea.vmem %s4131_s18, 16 }
0x1d40   : > { %3192 = vst.msk [vmem:[#allocation2] sm:$0x4] %vm2433_vm11, %v3190_v12  ;;  %p5494_p9 = scmp.ne.s32.totalorder %s4131_s18, %s5493_s1 }
0x1d42   : > { %v3301_v49 = vpop.permute.xlu1 %3300  ;;  %p5495_p1 = pnand %p5494_p9, %p6936_p11 }
0x1d43   : > { %3303 = vst.msk [vmem:[#allocation2] sm:$0x2] %vm2545_vm12, %v3301_v49 }
0x1d44   : > { %p5496_p3 = pneg %p5495_p1 }
0x1daf   : > { %v3409_v50 = vpop.permute.xlu0 %3408 }
0x1db0   : > { %3411 = vst.msk [vmem:[#allocation2] sm:$0x1] %vm2654_vm13, %v3409_v50 }
0x1db7   : > { %v6579_v51 = vld [vmem:[#allocation2] sm:$0x7] }
0x1db8   : > { %4892 = vmatmul.mubr.msk.f32.vlgmr.msra.gmra.mxu1 %vm1317_vm8, %v6579_v51 }
0x1db9   : > { %4915 = vmatprep.mubr.msk.f32.mxu1 %vm5678_vm0, %v5677_v0 }
0x1e78   : > { %v3497_v60 = vpop.f32.mrf.mxu1 }
0x1e79   : > { %v3498_v61 = vadd.f32 %v4500_v59, %v3497_v60 }
0x1e7a   : > { %v4893_v62 = vpop.f32.mrf.mxu1 }
0x1e7b   : > { %5223 = vtanh.f32 %v3498_v61 }
0x1e88   : > { %v5224_v63 = vpop.eup %5223 }
0x1e89   : > { %4911 = vmatmul.mubr.msk.f32.vlgmr.msra.gmra.mxu0 %vm1317_vm8, %v5224_v63 }
0x1e8a   : > { %4920 = vmatprep.mubr.msk.f32.mxu0 %vm5678_vm0, %v5677_v0 }
0x1f49   : > { %v3579_v1 = vpop.f32.mrf.mxu0 }
0x1f4a   : > { %v3588_v2 = vsel %vm3587_vm5, %v3579_v1, -inf }
0x1f4b   : > { %v3589_v40 = vrot.slane %v3588_v2, 4  ;;  %v4912_v42 = vpop.f32.mrf.mxu0 }
0x1f4d   : > { %v3590_v3 = vmax.f32 %v3588_v2, %v3589_v40 }
0x1f4f   : > { %v3591_v4 = vrot.slane %v3590_v3, 2 }
0x1f51   : > { %v3592_v8 = vmax.f32 %v3590_v3, %v3591_v4 }
0x1f53   : > { %v3593_v9 = vrot.slane %v3592_v8, 1 }
0x1f55   : > { %v3594_v10 = vmax.f32 %v3592_v8, %v3593_v9 }
0x1f57   : > { %4914 = vmatpush3.msk.msra.mxu1 %vm3599_vm15, %v3594_v10 }
0x1f58   : > { %4916 = vmatmul.mubr.msk.f32.vlgmr.msra.gmra.mxu1 %vm3595_vm1, %v5682_v11  ;;  %4923 = vmatprep.subr.mxu1 %v5677_v0 }
0x1f59   : > { %4925 = vmatprep.mubr.msk.f32.mxu1 %vm5678_vm0, %v5677_v0 }
0x2018   : > { %v3669_v45 = vpop.f32.mrf.mxu1 }
0x2019   : > { %v3673_v13 = vsub.f32 %v3579_v1, %v3669_v45 }
0x201a   : > { %v4917_v14 = vpop.f32.mrf.mxu1 }
0x201b   : > { %v3674_v15 = vmul.f32 1.442695, %v3673_v13 }
0x201d   : > { %5225 = vpow2.f32 %v3674_v15 }
0x202a   : > { %v5226_v35 = vpop.eup %5225 }
0x202b   : > { %4919 = vmatpush3.msk.msra.mxu0 %vm1527_vm4, %v5226_v35 }
0x202c   : > { %4921 = vmatmul.mubr.msk.f32.vlgmr.msra.gmra.mxu0 %vm1523_vm6, %v5682_v11  ;;  %4928 = vmatprep.subr.mxu0 %v5677_v0 }
0x202d   : > { %4930 = vmatprep.mubr.msk.f32.mxu0 %vm5678_vm0, %v5677_v0  ;;  %4929 = vmatpush3.msra.mxu0 %v3826_v18 }
0x202e   : > { %4938 = vmatprep.subr.mxu0 %v5677_v0 }
0x20ec   : > { %v3747_v16 = vpop.f32.mrf.mxu0 }
0x20ed   : > { %4924 = vmatpush3.msk.msra.mxu1 %vm3599_vm15, %v3747_v16 }
0x20ee   : > { %v4922_v17 = vpop.f32.mrf.mxu0  ;;  %4926 = vmatmul.mubr.msk.f32.vlgmr.msra.gmra.mxu1 %vm3595_vm1, %v5682_v11  ;;  %4933 = vmatprep.subr.mxu1 %v5677_v0 }
0x20ef   : > { %4935 = vmatprep.mubr.msk.f32.mxu1 %vm5678_vm0, %v5677_v0 }
0x21ae   : > { %v3820_v19 = vpop.f32.mrf.mxu1 }
0x21af   : > { %5227 = vrcp.f32 %v3820_v19 }
0x21b0   : > { %v4927_v20 = vpop.f32.mrf.mxu1 }
0x21bc   : > { %v5228_v21 = vpop.eup %5227 }
0x21bd   : > { %v3825_v22 = vmul.f32 %v5228_v21, %v5226_v35 }
0x21bf   : > { %4931 = vmatmul.mubr.msk.f32.vlgmr.msra.gmra.mxu0 %vm1494_vm14, %v3825_v22 }
0x21c0   : > { %4954 = vmatprep.mubr.msk.f32.mxu0 %vm5678_vm0, %v5677_v0  ;;  %4939 = vmatpush3.msra.mxu0 %v3981_v23  ;;  %vm4059_vm0 = vcmask 122880  }
0x21c1   : > { %4940 = vmatprep.subr.mxu0 %v5677_v0 }
0x21c2   : > { %4941 = vmatpush3.msra.mxu0 %v3980_v24 }
0x21c3   : > { %4942 = vmatprep.subr.mxu0 %v5677_v0 }
0x21c4   : > { %4943 = vmatpush3.msra.mxu0 %v3979_v25 }
0x21c5   : > { %4944 = vmatprep.subr.mxu0 %v5677_v0 }
0x21c6   : > { %4945 = vmatpush3.msra.mxu0 %v3978_v26 }
0x21c7   : > { %4946 = vmatprep.subr.mxu0 %v5677_v0 }
0x21c8   : > { %4947 = vmatpush3.msra.mxu0 %v3977_v27 }
0x21c9   : > { %4948 = vmatprep.subr.mxu0 %v5677_v0 }
0x21ca   : > { %4949 = vmatpush3.msra.mxu0 %v3976_v28 }
0x21cb   : > { %4950 = vmatprep.subr.mxu0 %v5677_v0 }
0x21cc   : > { %4951 = vmatpush3.msra.mxu0 %v3975_v29 }
0x21cd   : > { %4952 = vmatprep.subr.mxu0 %v5677_v0  ;;  %v3982_v0 = vld [vmem:[#allocation18] sm:$0x1] }
0x21ce   : > { %4953 = vmatpush3.msra.mxu0 %v3974_v5 }
0x227f   : > { %v3896_v30 = vpop.f32.mrf.mxu0 }
0x2280   : > { %v3900_v31 = vmul.f32 %v3896_v30, %v6579_v51 }
0x2281   : > { %v4932_v32 = vpop.f32.mrf.mxu0 }
0x2282   : > { %4934 = vmatpush3.msk.msra.mxu1 %vm1527_vm4, %v3900_v31 }
0x2283   : > { %4936 = vmatmul.mubr.msk.f32.vlgmr.msra.gmra.mxu1 %vm1523_vm6, %v5682_v11 }
0x2343   : > { %v3970_v33 = vpop.f32.mrf.mxu1 }
0x2344   : > { %4955 = vmatmul.mubr.msk.f32.vlgmr.msra.gmra.mxu0 %vm1317_vm8, %v3970_v33 }
0x2345   : > { %v4937_v34 = vpop.f32.mrf.mxu1 }
0x2404   : > { %v4052_v36 = vpop.f32.mrf.mxu0 }
0x2405   : > { %v6674_v37 = vadd.f32 %v4052_v36, %v3982_v0 }
0x2406   : > { %v4956_v38 = vpop.f32.mrf.mxu0 }
0x2407   : > { %v4056_v39 = vmul.f32 0.5, %v6674_v37  ;;  %4062 = vrot.lane.b32.xlu0 %v6674_v37, %s6867_s26  ;;  %4060 = vst.msk [vmem:[%s1001_s9] sm:$0x1] %vm4059_vm0, %v6674_v37  ;;  %s5685_s26 = smov [#allocation21]  }
0x2408   : > { %s5497_s28 = sshll.u32 %s5685_s26, 4  ;;  %s5498_s28 = int_to_ptr.vmem [resolvable:$false] %s5497_s28 }
0x2409   : > { %v4057_v41 = vmul.f32 1.442695, %v4056_v39  ;;  %s5499_s11 = scalar_lea.vmem %s5498_s28, 32  ;;  %p5500_p4 = scmp.lt.s32.totalorder %s4131_s18, %s5498_s28 }
0x240a   : > { %p5501_p13 = scmp.lt.s32.totalorder %s5499_s11, %s5493_s1 }
0x240b   : > { %5229 = vpow2.f32 %v4057_v41 }
0x240c   : > { %p5502_p6 = por %p5501_p13, %p5500_p4 }
0x240e   : > { %p5503_p5 = pnand %p5502_p6, %p5496_p3 }
0x2410   : > { %5506 = shalt.err (!%p5503_p5)
}
0x2411   : > { %s5507_s9 = scalar_lea.hbm %s6690_s29, 16  ;;  %s5511_s26 = scalar_lea.hbm %s6935_s15, 32 }
0x2412   : > { %p5508_p7 = scmp.ne.s32.totalorder %s6690_s29, %s5507_s9  ;;  %p5512_p0 = scmp.lt.s32.totalorder %s6690_s29, %s6935_s15 }
0x2413   : > { %p5513_p2 = scmp.lt.s32.totalorder %s5511_s26, %s5507_s9 }
0x2414   : > { %p5509_p10 = pnand %p5508_p7, %p6936_p11 }
0x2415   : > { %p5514_p8 = por %p5513_p2, %p5512_p0 }
0x2416   : > { %p5510_p12 = pneg %p5509_p10 }
0x2418   : > { %p5515_p9 = pnand %p5514_p8, %p5510_p12 }
0x241a   : > { %5518 = shalt.err (!%p5515_p9)
}
0x241b   : > { %4996 = dma.vmem_to_hbm [thread:$0]  (%p6936_p11), %s4131_s18, 16, %s6690_s29, %s6693_s0   ;;  %v5230_v6 = vpop.eup %5229 }
0x241c   : > { %v4074_v48 = vrot.slane %v5230_v6, %v4073_v47  ;;  %s6937_s11 = smov 112   ;;  %s1007_s1 = scalar_lea.vmem [#allocation23], %s6018_s13 }
0x241d   : > { %s4143_s14 = sshll.u32 %s1007_s1, 4  ;;  %s6938_s6 = sld [smem:[#allocation58_spill]]  ;;  %s4144_s14 = int_to_ptr.vmem [resolvable:$true] %s4143_s14 }
0x241e   : > { %v4081_v12 = vrot.slane %v4074_v48, %v4073_v47  ;;  %s5519_s26 = scalar_lea.vmem %s4144_s14, 16  ;;  %s5686_s29 = smov [#allocation23]  }
0x241f   : > { %p5520_p1 = scmp.ne.s32.totalorder %s4144_s14, %s5519_s26  ;;  %s5523_s18 = sshll.u32 %s5686_s29, 4  ;;  %s5524_s18 = int_to_ptr.vmem [resolvable:$false] %s5523_s18 }
0x2420   : > { %4082 = vrot.lane.b32.xlu1 %v4081_v12, %s6937_s11  ;;  %s5525_s23 = scalar_lea.vmem %s5524_s18, 32  ;;  %p5526_p13 = scmp.lt.s32.totalorder %s4144_s14, %s5524_s18 }
0x2421   : > { %p5521_p3 = pnand %p5520_p1, %p6936_p11  ;;  %p5527_p6 = scmp.lt.s32.totalorder %s5525_s23, %s5519_s26 }
0x2423   : > { %s4141_s24 = scalar_lea.hbm %s6938_s6, %s6684_s10  ;;  %p5522_p4 = pneg %p5521_p3 }
0x2424   : > { %p5528_p5 = por %p5527_p6, %p5526_p13 }
0x2426   : > { %p5529_p7 = pnand %p5528_p5, %p5522_p4 }
0x2479   : > { %v4063_v49 = vpop.permute.xlu0 %4062 }
0x247a   : > { %4065 = vst.msk [vmem:[%s1007_s1] sm:$0x1] %vm4059_vm0, %v4063_v49 }
0x247b   : > { %5532 = shalt.err (!%p5529_p7)
}
0x247c   : > { %s5533_s11 = scalar_lea.hbm %s4141_s24, 16  ;;  %s5537_s9 = scalar_lea.hbm %s6938_s6, 32 }
0x247d   : > { %p5534_p10 = scmp.ne.s32.totalorder %s4141_s24, %s5533_s11  ;;  %p5538_p2 = scmp.lt.s32.totalorder %s4141_s24, %s6938_s6 }
0x247e   : > { %p5539_p8 = scmp.lt.s32.totalorder %s5537_s9, %s5533_s11 }
0x247f   : > { %p5535_p12 = pnand %p5534_p10, %p6936_p11 }
0x2480   : > { %p5540_p9 = por %p5539_p8, %p5538_p2 }
0x2481   : > { %p5536_p0 = pneg %p5535_p12 }
0x2483   : > { %p5541_p1 = pnand %p5540_p9, %p5536_p0 }
0x2485   : > { %5544 = shalt.err (!%p5541_p1)
}
0x2486   : > { %4997 = dma.vmem_to_hbm [thread:$0]  (%p6936_p11), %s4144_s14, 16, %s4141_s24, %s6693_s0  }
0x2487   : > { %s6939_s18 = sld [smem:[#allocation54_spill]]  ;;  %s995_s28 = scalar_lea.vmem [#allocation20], %s6018_s13 }
0x2488   : > { %s6940_s11 = sld [smem:[#allocation55_spill]]  ;;  %s4117_s9 = sshll.u32 %s995_s28, 4  ;;  %s6750_s9 = int_to_ptr.vmem [resolvable:$true] %s4117_s9 }
0x2489   : > { %s1013_s6 = scalar_lea.vmem [#allocation24], %s6018_s13  ;;  %s6941_s26 = sld [smem:[#allocation56_spill]] }
0x248a   : > { %s4156_s0 = sshll.u32 %s1013_s6, 4  ;;  %s4093_s15 = scalar_lea.sflag [#allocation5], %s6018_s13  ;;  %s6758_s0 = int_to_ptr.vmem [resolvable:$true] %s4156_s0 }
0x248d   : > { %s1020_s23 = scalar_lea.vmem %s6939_s18, %s6053_s12 }
0x248e   : > { %s1023_s1 = scalar_lea.vmem %s6940_s11, %s6053_s12  ;;  %v4066_v50 = vld [vmem:[%s1020_s23] sm:$0x1]  ;;  %s6942_s23 = sld [smem:[#allocation59_spill]] }
0x248f   : > { %v4088_v51 = vld [vmem:[%s1023_s1] sm:$0x1]  ;;  %s6746_s29 = scalar_lea.hbm %s6941_s26, %s6684_s10  ;;  %s5545_s11 = scalar_lea.vmem %s6750_s9, 16 }
0x2490   : > { %p5546_p3 = scmp.ne.s32.totalorder %s6750_s9, %s5545_s11  ;;  %s5687_s1 = smov [#allocation20]  }
0x2491   : > { %s5549_s14 = sshll.u32 %s5687_s1, 4  ;;  %s5550_s14 = int_to_ptr.vmem [resolvable:$false] %s5549_s14 }
0x2492   : > { %v4083_v52 = vpop.permute.xlu1 %4082  ;;  %p5547_p4 = pnand %p5546_p3, %p6936_p11  ;;  %s5551_s24 = scalar_lea.vmem %s5550_s14, 32 }
0x2493   : > { %v4085_v7 = vmul.f32 %v4083_v52, %v4066_v50  ;;  %v4089_v53 = vmul.f32 %v4088_v51, %v4083_v52  ;;  %p5552_p6 = scmp.lt.s32.totalorder %s6750_s9, %s5550_s14  ;;  %p5553_p5 = scmp.lt.s32.totalorder %s5551_s24, %s5545_s11 }
0x2494   : > { %s6756_s16 = scalar_lea.hbm %s6942_s23, %s6684_s10  ;;  %p5548_p13 = pneg %p5547_p4 }
0x2495   : > { %v4086_v54 = vadd.f32 %v4085_v7, %v6674_v37  ;;  %v4090_v55 = vadd.f32 %v4089_v53, %v6674_v37  ;;  %p5554_p7 = por %p5553_p5, %p5552_p6 }
0x2497   : > { %4087 = vst.msk [vmem:[%s995_s28] sm:$0x1] %vm4059_vm0, %v4086_v54  ;;  %4091 = vst.msk [vmem:[%s1013_s6] sm:$0x1] %vm4059_vm0, %v4090_v55  ;;  %p5555_p10 = pnand %p5554_p7, %p5548_p13 }
0x2499   : > { %5558 = shalt.err (!%p5555_p10)
}
0x249a   : > { %s5559_s10 = scalar_lea.hbm %s6746_s29, 16  ;;  %s5563_s12 = scalar_lea.hbm %s6941_s26, 32 }
0x249b   : > { %p5560_p12 = scmp.ne.s32.totalorder %s6746_s29, %s5559_s10  ;;  %p5564_p8 = scmp.lt.s32.totalorder %s6746_s29, %s6941_s26 }
0x249c   : > { %p5565_p9 = scmp.lt.s32.totalorder %s5563_s12, %s5559_s10 }
0x249d   : > { %p5561_p0 = pnand %p5560_p12, %p6936_p11 }
0x249e   : > { %p5566_p1 = por %p5565_p9, %p5564_p8 }
0x249f   : > { %p5562_p2 = pneg %p5561_p0 }
0x24a1   : > { %p5567_p3 = pnand %p5566_p1, %p5562_p2 }
0x24a3   : > { %5570 = shalt.err (!%p5567_p3)
}
0x24a4   : > { %4995 = dma.vmem_to_hbm [thread:$0]  (%p6936_p11), %s6750_s9, 16, %s6746_s29, %s4093_s15  }
0x24a5   : > { %s4105_s11 = scalar_lea.sflag [#allocation25], %s6018_s13  ;;  %s5571_s14 = scalar_lea.vmem %s6758_s0, 16 }
0x24a6   : > { %p5572_p4 = scmp.ne.s32.totalorder %s6758_s0, %s5571_s14  ;;  %s5688_s24 = smov [#allocation24]  }
0x24a7   : > { %s5575_s10 = sshll.u32 %s5688_s24, 4  ;;  %s5576_s10 = int_to_ptr.vmem [resolvable:$false] %s5575_s10 }
0x24a8   : > { %p5573_p13 = pnand %p5572_p4, %p6936_p11  ;;  %s5577_s6 = scalar_lea.vmem %s5576_s10, 32 }
0x24a9   : > { %p5578_p5 = scmp.lt.s32.totalorder %s6758_s0, %s5576_s10  ;;  %p5579_p7 = scmp.lt.s32.totalorder %s5577_s6, %s5571_s14 }
0x24aa   : > { %p5574_p6 = pneg %p5573_p13 }
0x24ab   : > { %p5580_p10 = por %p5579_p7, %p5578_p5 }
0x24ad   : > { %p5581_p12 = pnand %p5580_p10, %p5574_p6 }
0x24af   : > { %5584 = shalt.err (!%p5581_p12)
}
0x24b0   : > { %s5585_s9 = scalar_lea.hbm %s6756_s16, 16  ;;  %s5589_s15 = scalar_lea.hbm %s6942_s23, 32 }
0x24b1   : > { %p5586_p0 = scmp.ne.s32.totalorder %s6756_s16, %s5585_s9  ;;  %p5590_p9 = scmp.lt.s32.totalorder %s6756_s16, %s6942_s23 }
0x24b2   : > { %p5591_p1 = scmp.lt.s32.totalorder %s5589_s15, %s5585_s9 }
0x24b3   : > { %p5587_p2 = pnand %p5586_p0, %p6936_p11 }
0x24b4   : > { %p5592_p3 = por %p5591_p1, %p5590_p9 }
0x24b5   : > { %p5588_p8 = pneg %p5587_p2 }
0x24b7   : > { %p5593_p4 = pnand %p5592_p3, %p5588_p8 }
0x24b9   : > { %5596 = shalt.err (!%p5593_p4)
}
0x24ba   : > { %4998 = dma.vmem_to_hbm [thread:$0]  (%p6936_p11), %s6758_s0, 16, %s6756_s16, %s4105_s11  }
0x24bb PF: > { %s4168_s18 = sand.u32 1, %s5651_s7   ;;  %p6943_p13 = scmp.ne.s32.totalorder %s6909_s3, 0 }
0x24bc   : > { %p6944_p6 = scmp.ge.s32.totalorder %s5663_s30, 2  ;;  %s4169_s1 = scalar_lea.sflag [#allocation5], %s4168_s18 }
0x24be   : > { %p5036_p5 = pnand %p6944_p6, %p6943_p13 }
0x24c0   : > { %p5037_p7 = pneg %p5036_p5 }
0x24c2   : > { %5638 = dma.done.wait (%p5037_p7), %s4169_s1, 16  }
0x24c3   : > { %5640 = vsyncadd (%p5037_p7), %s4169_s1, 4294967280  ;;  %s6945_s14 = sadd.s32 4294967294, %s5663_s30  }
0x24c4   : > { %s4176_s24 = sand.u32 1, %s6945_s14  }
0x24c5   : > { %s4177_s10 = scalar_lea.sflag [#allocation22], %s4176_s24 }
0x24c6   : > { %5642 = dma.done.wait (%p5037_p7), %s4177_s10, 32  }
0x24c7   : > { %5644 = vsyncadd (%p5037_p7), %s4177_s10, 4294967264  ;;  %s4193_s5 = scalar_lea.sflag [#allocation25], %s4168_s18 }
0x24c8   : > { %5646 = dma.done.wait (%p5037_p7), %s4193_s5, 16  }
0x24c9   : > { %5648 = vsyncadd (%p5037_p7), %s4193_s5, 4294967280  ;;  %p52_p11 = scmp.ge.s32.totalorder %s5959_s2, 4   ;;  %s6946_s7 = smov %s5655_s4 }
0x24ca   : > { %s6947_s4 = smov %s5659_s8  ;;  %s6948_s8 = smov %s5971_s25 }
0x24cb   : > { %s6949_s30 = smov %s5959_s2  ;;  %54 = sbr.rel (!%p52_p11) target bundleno = 40 (0x28), region = 259 }
0x24d0   :  { %4197 = vsyncpa [#allocation4], 1 }
0x24d1   :  { %4199 = vsyncpa [#allocation4 + $0x1], 1 }
0x24d2   :  { %4200 = vsyncpa [#allocation7], 1 }
0x24d3   :  { %4201 = vsyncpa [#allocation10], 1 }
0x24d4   :  { %4202 = vsyncpa [#allocation13], 1 }
0x24d5   :  { %4203 = vsyncpa [#allocation16], 1 }
0x24d6   :  { %4204 = vsyncpa [#allocation19], 1 }
0x24d7   :  { %4205 = vsyncpa [#allocation5], 1 }
0x24d8   :  { %4207 = vsyncpa [#allocation5 + $0x1], 1 }
0x24d9   :  { %4208 = vsyncpa [#allocation22], 1 }
0x24da   :  { %4210 = vsyncpa [#allocation22 + $0x1], 1 }
0x24db   :  { %4211 = vsyncpa [#allocation25], 1 }
0x24dc   :  { %4213 = vsyncpa [#allocation25 + $0x1], 1 }

</bundles_post_ra>
